<compile_context>
chip_gen: v7x
topology: tpu7x:2x2x1
jax: 0.10.0
libtpu: 0.0.40
codegen_flags: <defaults>
</compile_context>

<pallas_src>
import functools

import jax
import jax.numpy as jnp
from jax.experimental import pallas as pl
from jax.experimental.pallas import tpu as pltpu

_N_OUT_PAD = 128  # classifier logits padded to a full 128-lane row inside the kernel


# ----------------------------------------------------------------------------
# Fused kernel: conv1 + ReLU -> conv2 + ReLU -> global avg-pool -> fc1 + ReLU -> fc2
# One grid step == one batch sample; all intermediates stay in VMEM.
# ----------------------------------------------------------------------------
def _fused_cnn_kernel(
    x_ref,     # (1, H, W, Cin)   one NHWC sample
    w1_ref,    # (KK*CP, C1)      conv1 weight, im2col layout (Cin zero-padded to CP)
    b1_ref,    # (1, C1)
    w2_ref,    # (KK*CP, C2)      conv2 weight, im2col layout
    b2_ref,    # (1, C2)
    fw1_ref,   # (C2, HID)
    fb1_ref,   # (1, HID)
    fw2_ref,   # (HID, NOUT)      class axis zero-padded to NOUT
    fb2_ref,   # (1, NOUT)
    o_ref,     # (1, 1, NOUT)
    pad_ref,   # VMEM scratch (H+2, W+2, CP): spatially zero-padded activation
    col_ref,   # VMEM scratch (H, W, KK*CP):  im2col patches
    *, H, W, Cin, CP, C1, C2, K,
):
    inv_hw = 1.0 / float(H * W)

    def conv3x3_relu(w_col_ref, b_row_ref):
        # Build im2col patches with static-slice VMEM copies, then ONE MXU matmul.
        for kh in range(K):
            for kw in range(K):
                t = kh * K + kw
                col_ref[:, :, t * CP:(t + 1) * CP] = pad_ref[kh:kh + H, kw:kw + W, :]
        patches = col_ref[...].reshape(H * W, K * K * CP)
        acc = jnp.dot(patches, w_col_ref[...], preferred_element_type=jnp.float32)
        return jnp.maximum(acc + b_row_ref[...], 0.0)          # (H*W, Cout)

    # Spatial (and input-channel) zero padding, entirely in VMEM.
    pad_ref[...] = jnp.zeros_like(pad_ref)
    pad_ref[1:H + 1, 1:W + 1, 0:Cin] = x_ref[0]                # channels [Cin, CP) stay 0

    act1 = conv3x3_relu(w1_ref, b1_ref)                        # (H*W, C1)

    # Feed conv2: overwrite the interior with conv1's activation (C1 == CP, so the
    # full channel width is rewritten; the zero border is untouched).
    pad_ref[1:H + 1, 1:W + 1, :] = act1.reshape(H, W, C1)

    act2 = conv3x3_relu(w2_ref, b2_ref)                        # (H*W, C2)

    # Global average pool (+ implicit flatten).
    pooled = jnp.sum(act2, axis=0, keepdims=True) * inv_hw     # (1, C2)

    # Classifier head, fused into the same kernel.
    h = jnp.dot(pooled, fw1_ref[...], preferred_element_type=jnp.float32) + fb1_ref[...]
    h = jnp.maximum(h, 0.0)
    logits = jnp.dot(h, fw2_ref[...], preferred_element_type=jnp.float32) + fb2_ref[...]
    o_ref[...] = logits.reshape(1, 1, -1)                      # lane-dense (1,1,128) store


# ----------------------------------------------------------------------------
# Parameter packing (done once; zero padding is numerically exact).
# ----------------------------------------------------------------------------
def _pack_params(params):
    kh, kw, cin, c1 = params["conv1_w"].shape
    _, _, c1b, c2 = params["conv2_w"].shape
    hid = params["fc1_w"].shape[1]
    nc = params["fc2_w"].shape[1]
    assert kh == kw and c1b == c1
    cp = max(cin, c1)
    assert cp == c1, "pad scratch is reused as conv2 input: need conv1_out == CP"

    w1 = jnp.pad(params["conv1_w"], ((0, 0), (0, 0), (0, cp - cin), (0, 0)))  # Cin -> CP
    packed = dict(
        w1=w1.reshape(kh * kw * cp, c1),
        b1=params["conv1_b"].reshape(1, c1),
        w2=params["conv2_w"].reshape(kh * kw * cp, c2),
        b2=params["conv2_b"].reshape(1, c2),
        fw1=params["fc1_w"],
        fb1=params["fc1_b"].reshape(1, hid),
        fw2=jnp.pad(params["fc2_w"], ((0, 0), (0, _N_OUT_PAD - nc))),
        fb2=jnp.pad(params["fc2_b"], (0, _N_OUT_PAD - nc)).reshape(1, _N_OUT_PAD),
    )
    meta = dict(K=kh, Cin=cin, CP=cp, C1=c1, C2=c2, HID=hid, NC=nc)
    return packed, meta


# ----------------------------------------------------------------------------
# Public forward (NCHW interface, matching the PyTorch module).
# ----------------------------------------------------------------------------
def cnn_phenotype_forward(x_nchw, params):
    packed, m = _pack_params(params)
    B, Cin, H, W = x_nchw.shape
    assert Cin == m["Cin"]
    K, CP, C1, C2, HID, NC = m["K"], m["CP"], m["C1"], m["C2"], m["HID"], m["NC"]
    KK = K * K

    # NCHW -> NHWC layout glue (tiny; fuses under jit).
    x = jnp.transpose(x_nchw, (0, 2, 3, 1)).astype(jnp.float32)

    def full(shape):  # whole-array block, VMEM-resident across the grid
        return pl.BlockSpec(shape, lambda *_: (0,) * len(shape))

    kernel = functools.partial(
        _fused_cnn_kernel, H=H, W=W, Cin=Cin, CP=CP, C1=C1, C2=C2, K=K)

    logits_padded = pl.pallas_call(
        kernel,
        out_shape=jax.ShapeDtypeStruct((B, 1, _N_OUT_PAD), jnp.float32),
        grid=(B,),                                   # one sample per grid step
        in_specs=[
            pl.BlockSpec((1, H, W, Cin), lambda b: (b, 0, 0, 0)),
            full((KK * CP, C1)), full((1, C1)),
            full((KK * CP, C2)), full((1, C2)),
            full((C2, HID)), full((1, HID)),
            full((HID, _N_OUT_PAD)), full((1, _N_OUT_PAD)),
        ],
        out_specs=pl.BlockSpec((1, 1, _N_OUT_PAD), lambda b: (b, 0, 0)),
        scratch_shapes=[
            pltpu.VMEM((H + 2, W + 2, CP), jnp.float32),   # padded activation (~10 KB)
            pltpu.VMEM((H, W, KK * CP), jnp.float32),      # im2col patches   (~74 KB)
        ],
        compiler_params=pltpu.CompilerParams(
            dimension_semantics=("parallel",)),            # shards batch over v7x's 2 TCs
    )(x, packed["w1"], packed["b1"], packed["w2"], packed["b2"],
      packed["fw1"], packed["fb1"], packed["fw2"], packed["fb2"])

    return logits_padded[:, 0, :NC]                        # drop class padding (glue slice)


# ----------------------------------------------------------------------------
# Synthetic parameters + pure-JAX reference for a correctness check.
# ----------------------------------------------------------------------------
def init_params(key):
    ks = jax.random.split(key, 8)

    def normal(k, shape, scale):
        return jax.random.normal(k, shape, dtype=jnp.float32) * scale

    return {
        # conv weights stored HWIO = (kh, kw, Cin, Cout)
        "conv1_w": normal(ks[0], (3, 3, 4, 8), 0.1),
        "conv1_b": normal(ks[1], (8,), 0.01),
        "conv2_w": normal(ks[2], (3, 3, 8, 16), 0.1),
        "conv2_b": normal(ks[3], (16,), 0.01),
        # linear weights stored (in_features, out_features)
        "fc1_w": normal(ks[4], (16, 32), 0.1),
        "fc1_b": normal(ks[5], (32,), 0.01),
        "fc2_w": normal(ks[6], (32, 10), 0.1),
        "fc2_b": normal(ks[7], (10,), 0.01),
    }


def _reference_forward(x_nchw, params):
    hi = jax.lax.Precision.HIGHEST
    x = jnp.transpose(x_nchw, (0, 2, 3, 1)).astype(jnp.float32)
    for w, b in ((params["conv1_w"], params["conv1_b"]),
                 (params["conv2_w"], params["conv2_b"])):
        dn = jax.lax.conv_dimension_numbers(x.shape, w.shape, ("NHWC", "HWIO", "NHWC"))
        x = jax.lax.conv_general_dilated(x, w, (1, 1), "SAME",
                                         dimension_numbers=dn, precision=hi)
        x = jnp.maximum(x + b, 0.0)
    pooled = jnp.mean(x, axis=(1, 2))
    h = jnp.maximum(jnp.dot(pooled, params["fc1_w"], precision=hi) + params["fc1_b"], 0.0)
    return jnp.dot(h, params["fc2_w"], precision=hi) + params["fc2_b"]


if __name__ == "__main__":
    key = jax.random.PRNGKey(0)
    k_x, k_p = jax.random.split(key)
    # PyTorch-style NCHW input: batch=2, channels=4, spatial=16x16.
    x = jax.random.normal(k_x, (2, 4, 16, 16), dtype=jnp.float32)
    params = init_params(k_p)

    fwd = jax.jit(cnn_phenotype_forward)
    out = fwd(x, params)
    jax.block_until_ready(out)
    assert out.shape == (2, 10), out.shape
    assert out.dtype == jnp.float32, out.dtype

    ref = _reference_forward(x, params)
    err = float(jnp.max(jnp.abs(out - ref)))
    assert jnp.allclose(out, ref, rtol=1e-3, atol=1e-3), f"max abs err {err}"
    print("KERNEL_OK")
</pallas_src>

<mosaic_0001>
module attributes {stable_mosaic.version = 11 : i64} {
  func.func @_fused_cnn_kernel(%arg0: i32, %arg1: memref<1x16x16x4xf32, #tpu.memory_space<vmem>>, %arg2: memref<72x8xf32, #tpu.memory_space<vmem>>, %arg3: memref<1x8xf32, #tpu.memory_space<vmem>>, %arg4: memref<72x16xf32, #tpu.memory_space<vmem>>, %arg5: memref<1x16xf32, #tpu.memory_space<vmem>>, %arg6: memref<16x32xf32, #tpu.memory_space<vmem>>, %arg7: memref<1x32xf32, #tpu.memory_space<vmem>>, %arg8: memref<32x128xf32, #tpu.memory_space<vmem>>, %arg9: memref<1x128xf32, #tpu.memory_space<vmem>>, %arg10: memref<1x1x128xf32, #tpu.memory_space<vmem>>, %arg11: memref<18x18x8xf32, #tpu.memory_space<vmem>>, %arg12: memref<16x16x72xf32, #tpu.memory_space<vmem>>) attributes {dimension_semantics = [#tpu.dimension_semantics<parallel>], iteration_bounds = array<i64: 2>, scalar_prefetch = 0 : i64, scratch_operands = 2 : i64, tpu.core_type = #tpu.core_type<tc>, window_params = [{transform_indices = @transform_0, window_bounds = array<i64: 1, 16, 16, 4>}, {pipeline_mode = #tpu.pipeline_mode<synchronous>, transform_indices = @transform_1, window_bounds = array<i64: 72, 8>}, {pipeline_mode = #tpu.pipeline_mode<synchronous>, transform_indices = @transform_2, window_bounds = array<i64: 1, 8>}, {pipeline_mode = #tpu.pipeline_mode<synchronous>, transform_indices = @transform_3, window_bounds = array<i64: 72, 16>}, {pipeline_mode = #tpu.pipeline_mode<synchronous>, transform_indices = @transform_4, window_bounds = array<i64: 1, 16>}, {pipeline_mode = #tpu.pipeline_mode<synchronous>, transform_indices = @transform_5, window_bounds = array<i64: 16, 32>}, {pipeline_mode = #tpu.pipeline_mode<synchronous>, transform_indices = @transform_6, window_bounds = array<i64: 1, 32>}, {pipeline_mode = #tpu.pipeline_mode<synchronous>, transform_indices = @transform_7, window_bounds = array<i64: 32, 128>}, {pipeline_mode = #tpu.pipeline_mode<synchronous>, transform_indices = @transform_8, window_bounds = array<i64: 1, 128>}, {transform_indices = @transform_9, window_bounds = array<i64: 1, 1, 128>}]} {
    %cst = arith.constant 0.000000e+00 : f32
    %0 = vector.broadcast %cst : f32 to vector<18x18x8xf32>
    %c0 = arith.constant 0 : index
    %c0_0 = arith.constant 0 : index
    %c0_1 = arith.constant 0 : index
    %1 = vector.load %arg11[%c0, %c0_0, %c0_1] : memref<18x18x8xf32, #tpu.memory_space<vmem>>, vector<18x18x8xf32>
    tpu.vector_store %arg11[%c0, %c0_0, %c0_1], %0 {strides = array<i32>} : memref<18x18x8xf32, #tpu.memory_space<vmem>>, vector<18x18x8xf32>,
    %c0_2 = arith.constant 0 : index
    %c0_3 = arith.constant 0 : index
    %c0_4 = arith.constant 0 : index
    %c0_5 = arith.constant 0 : index
    %2 = vector.load %arg1[%c0_2, %c0_3, %c0_4, %c0_5] : memref<1x16x16x4xf32, #tpu.memory_space<vmem>>, vector<1x16x16x4xf32>
    %3 = vector.shape_cast %2 : vector<1x16x16x4xf32> to vector<16x16x4xf32>
    %c1 = arith.constant 1 : index
    %c1_6 = arith.constant 1 : index
    %c0_7 = arith.constant 0 : index
    %4 = vector.load %arg11[%c1, %c1_6, %c0_7] : memref<18x18x8xf32, #tpu.memory_space<vmem>>, vector<16x16x4xf32>
    tpu.vector_store %arg11[%c1, %c1_6, %c0_7], %3 {strides = array<i32>} : memref<18x18x8xf32, #tpu.memory_space<vmem>>, vector<16x16x4xf32>,
    %c0_8 = arith.constant 0 : index
    %c0_9 = arith.constant 0 : index
    %c0_10 = arith.constant 0 : index
    %5 = vector.load %arg11[%c0_8, %c0_9, %c0_10] : memref<18x18x8xf32, #tpu.memory_space<vmem>>, vector<16x16x8xf32>
    %c0_11 = arith.constant 0 : index
    %c0_12 = arith.constant 0 : index
    %c0_13 = arith.constant 0 : index
    %6 = vector.load %arg12[%c0_11, %c0_12, %c0_13] : memref<16x16x72xf32, #tpu.memory_space<vmem>>, vector<16x16x8xf32>
    tpu.vector_store %arg12[%c0_11, %c0_12, %c0_13], %5 {strides = array<i32>} : memref<16x16x72xf32, #tpu.memory_space<vmem>>, vector<16x16x8xf32>,
    %c0_14 = arith.constant 0 : index
    %c1_15 = arith.constant 1 : index
    %c0_16 = arith.constant 0 : index
    %7 = vector.load %arg11[%c0_14, %c1_15, %c0_16] : memref<18x18x8xf32, #tpu.memory_space<vmem>>, vector<16x16x8xf32>
    %c0_17 = arith.constant 0 : index
    %c0_18 = arith.constant 0 : index
    %c8 = arith.constant 8 : index
    %8 = vector.load %arg12[%c0_17, %c0_18, %c8] : memref<16x16x72xf32, #tpu.memory_space<vmem>>, vector<16x16x8xf32>
    tpu.vector_store %arg12[%c0_17, %c0_18, %c8], %7 {strides = array<i32>} : memref<16x16x72xf32, #tpu.memory_space<vmem>>, vector<16x16x8xf32>,
    %c0_19 = arith.constant 0 : index
    %c2 = arith.constant 2 : index
    %c0_20 = arith.constant 0 : index
    %9 = vector.load %arg11[%c0_19, %c2, %c0_20] : memref<18x18x8xf32, #tpu.memory_space<vmem>>, vector<16x16x8xf32>
    %c0_21 = arith.constant 0 : index
    %c0_22 = arith.constant 0 : index
    %c16 = arith.constant 16 : index
    %10 = vector.load %arg12[%c0_21, %c0_22, %c16] : memref<16x16x72xf32, #tpu.memory_space<vmem>>, vector<16x16x8xf32>
    tpu.vector_store %arg12[%c0_21, %c0_22, %c16], %9 {strides = array<i32>} : memref<16x16x72xf32, #tpu.memory_space<vmem>>, vector<16x16x8xf32>,
    %c1_23 = arith.constant 1 : index
    %c0_24 = arith.constant 0 : index
    %c0_25 = arith.constant 0 : index
    %11 = vector.load %arg11[%c1_23, %c0_24, %c0_25] : memref<18x18x8xf32, #tpu.memory_space<vmem>>, vector<16x16x8xf32>
    %c0_26 = arith.constant 0 : index
    %c0_27 = arith.constant 0 : index
    %c24 = arith.constant 24 : index
    %12 = vector.load %arg12[%c0_26, %c0_27, %c24] : memref<16x16x72xf32, #tpu.memory_space<vmem>>, vector<16x16x8xf32>
    tpu.vector_store %arg12[%c0_26, %c0_27, %c24], %11 {strides = array<i32>} : memref<16x16x72xf32, #tpu.memory_space<vmem>>, vector<16x16x8xf32>,
    %c1_28 = arith.constant 1 : index
    %c1_29 = arith.constant 1 : index
    %c0_30 = arith.constant 0 : index
    %13 = vector.load %arg11[%c1_28, %c1_29, %c0_30] : memref<18x18x8xf32, #tpu.memory_space<vmem>>, vector<16x16x8xf32>
    %c0_31 = arith.constant 0 : index
    %c0_32 = arith.constant 0 : index
    %c32 = arith.constant 32 : index
    %14 = vector.load %arg12[%c0_31, %c0_32, %c32] : memref<16x16x72xf32, #tpu.memory_space<vmem>>, vector<16x16x8xf32>
    tpu.vector_store %arg12[%c0_31, %c0_32, %c32], %13 {strides = array<i32>} : memref<16x16x72xf32, #tpu.memory_space<vmem>>, vector<16x16x8xf32>,
    %c1_33 = arith.constant 1 : index
    %c2_34 = arith.constant 2 : index
    %c0_35 = arith.constant 0 : index
    %15 = vector.load %arg11[%c1_33, %c2_34, %c0_35] : memref<18x18x8xf32, #tpu.memory_space<vmem>>, vector<16x16x8xf32>
    %c0_36 = arith.constant 0 : index
    %c0_37 = arith.constant 0 : index
    %c40 = arith.constant 40 : index
    %16 = vector.load %arg12[%c0_36, %c0_37, %c40] : memref<16x16x72xf32, #tpu.memory_space<vmem>>, vector<16x16x8xf32>
    tpu.vector_store %arg12[%c0_36, %c0_37, %c40], %15 {strides = array<i32>} : memref<16x16x72xf32, #tpu.memory_space<vmem>>, vector<16x16x8xf32>,
    %c2_38 = arith.constant 2 : index
    %c0_39 = arith.constant 0 : index
    %c0_40 = arith.constant 0 : index
    %17 = vector.load %arg11[%c2_38, %c0_39, %c0_40] : memref<18x18x8xf32, #tpu.memory_space<vmem>>, vector<16x16x8xf32>
    %c0_41 = arith.constant 0 : index
    %c0_42 = arith.constant 0 : index
    %c48 = arith.constant 48 : index
    %18 = vector.load %arg12[%c0_41, %c0_42, %c48] : memref<16x16x72xf32, #tpu.memory_space<vmem>>, vector<16x16x8xf32>
    tpu.vector_store %arg12[%c0_41, %c0_42, %c48], %17 {strides = array<i32>} : memref<16x16x72xf32, #tpu.memory_space<vmem>>, vector<16x16x8xf32>,
    %c2_43 = arith.constant 2 : index
    %c1_44 = arith.constant 1 : index
    %c0_45 = arith.constant 0 : index
    %19 = vector.load %arg11[%c2_43, %c1_44, %c0_45] : memref<18x18x8xf32, #tpu.memory_space<vmem>>, vector<16x16x8xf32>
    %c0_46 = arith.constant 0 : index
    %c0_47 = arith.constant 0 : index
    %c56 = arith.constant 56 : index
    %20 = vector.load %arg12[%c0_46, %c0_47, %c56] : memref<16x16x72xf32, #tpu.memory_space<vmem>>, vector<16x16x8xf32>
    tpu.vector_store %arg12[%c0_46, %c0_47, %c56], %19 {strides = array<i32>} : memref<16x16x72xf32, #tpu.memory_space<vmem>>, vector<16x16x8xf32>,
    %c2_48 = arith.constant 2 : index
    %c2_49 = arith.constant 2 : index
    %c0_50 = arith.constant 0 : index
    %21 = vector.load %arg11[%c2_48, %c2_49, %c0_50] : memref<18x18x8xf32, #tpu.memory_space<vmem>>, vector<16x16x8xf32>
    %c0_51 = arith.constant 0 : index
    %c0_52 = arith.constant 0 : index
    %c64 = arith.constant 64 : index
    %22 = vector.load %arg12[%c0_51, %c0_52, %c64] : memref<16x16x72xf32, #tpu.memory_space<vmem>>, vector<16x16x8xf32>
    tpu.vector_store %arg12[%c0_51, %c0_52, %c64], %21 {strides = array<i32>} : memref<16x16x72xf32, #tpu.memory_space<vmem>>, vector<16x16x8xf32>,
    %c0_53 = arith.constant 0 : index
    %c0_54 = arith.constant 0 : index
    %c0_55 = arith.constant 0 : index
    %23 = vector.load %arg12[%c0_53, %c0_54, %c0_55] : memref<16x16x72xf32, #tpu.memory_space<vmem>>, vector<16x16x72xf32>
    %24 = vector.shape_cast %23 : vector<16x16x72xf32> to vector<256x72xf32>
    %c0_56 = arith.constant 0 : index
    %c0_57 = arith.constant 0 : index
    %25 = vector.load %arg2[%c0_56, %c0_57] : memref<72x8xf32, #tpu.memory_space<vmem>>, vector<72x8xf32>
    %cst_58 = arith.constant dense<0.000000e+00> : vector<256x8xf32>
    %26 = tpu.matmul %24, %25, %cst_58 {dimension_numbers = #tpu.dot_dimension_numbers<[1], [0], [0], [1], [0, 0, 1, 1], [], []>} : vector<256x72xf32>, vector<72x8xf32>, vector<256x8xf32> -> vector<256x8xf32>
    %c0_59 = arith.constant 0 : index
    %c0_60 = arith.constant 0 : index
    %27 = vector.load %arg3[%c0_59, %c0_60] : memref<1x8xf32, #tpu.memory_space<vmem>>, vector<1x8xf32>
    %28 = vector.broadcast %27 : vector<1x8xf32> to vector<256x8xf32>
    %29 = arith.addf %26, %28 : vector<256x8xf32>
    %cst_61 = arith.constant 0.000000e+00 : f32
    %30 = vector.broadcast %cst_61 : f32 to vector<256x8xf32>
    %31 = arith.maximumf %29, %30 : vector<256x8xf32>
    %32 = vector.shape_cast %31 : vector<256x8xf32> to vector<16x16x8xf32>
    %c1_62 = arith.constant 1 : index
    %c1_63 = arith.constant 1 : index
    %c0_64 = arith.constant 0 : index
    %33 = vector.load %arg11[%c1_62, %c1_63, %c0_64] : memref<18x18x8xf32, #tpu.memory_space<vmem>>, vector<16x16x8xf32>
    tpu.vector_store %arg11[%c1_62, %c1_63, %c0_64], %32 {strides = array<i32>} : memref<18x18x8xf32, #tpu.memory_space<vmem>>, vector<16x16x8xf32>,
    %c0_65 = arith.constant 0 : index
    %c0_66 = arith.constant 0 : index
    %c0_67 = arith.constant 0 : index
    %34 = vector.load %arg11[%c0_65, %c0_66, %c0_67] : memref<18x18x8xf32, #tpu.memory_space<vmem>>, vector<16x16x8xf32>
    %c0_68 = arith.constant 0 : index
    %c0_69 = arith.constant 0 : index
    %c0_70 = arith.constant 0 : index
    %35 = vector.load %arg12[%c0_68, %c0_69, %c0_70] : memref<16x16x72xf32, #tpu.memory_space<vmem>>, vector<16x16x8xf32>
    tpu.vector_store %arg12[%c0_68, %c0_69, %c0_70], %34 {strides = array<i32>} : memref<16x16x72xf32, #tpu.memory_space<vmem>>, vector<16x16x8xf32>,
    %c0_71 = arith.constant 0 : index
    %c1_72 = arith.constant 1 : index
    %c0_73 = arith.constant 0 : index
    %36 = vector.load %arg11[%c0_71, %c1_72, %c0_73] : memref<18x18x8xf32, #tpu.memory_space<vmem>>, vector<16x16x8xf32>
    %c0_74 = arith.constant 0 : index
    %c0_75 = arith.constant 0 : index
    %c8_76 = arith.constant 8 : index
    %37 = vector.load %arg12[%c0_74, %c0_75, %c8_76] : memref<16x16x72xf32, #tpu.memory_space<vmem>>, vector<16x16x8xf32>
    tpu.vector_store %arg12[%c0_74, %c0_75, %c8_76], %36 {strides = array<i32>} : memref<16x16x72xf32, #tpu.memory_space<vmem>>, vector<16x16x8xf32>,
    %c0_77 = arith.constant 0 : index
    %c2_78 = arith.constant 2 : index
    %c0_79 = arith.constant 0 : index
    %38 = vector.load %arg11[%c0_77, %c2_78, %c0_79] : memref<18x18x8xf32, #tpu.memory_space<vmem>>, vector<16x16x8xf32>
    %c0_80 = arith.constant 0 : index
    %c0_81 = arith.constant 0 : index
    %c16_82 = arith.constant 16 : index
    %39 = vector.load %arg12[%c0_80, %c0_81, %c16_82] : memref<16x16x72xf32, #tpu.memory_space<vmem>>, vector<16x16x8xf32>
    tpu.vector_store %arg12[%c0_80, %c0_81, %c16_82], %38 {strides = array<i32>} : memref<16x16x72xf32, #tpu.memory_space<vmem>>, vector<16x16x8xf32>,
    %c1_83 = arith.constant 1 : index
    %c0_84 = arith.constant 0 : index
    %c0_85 = arith.constant 0 : index
    %40 = vector.load %arg11[%c1_83, %c0_84, %c0_85] : memref<18x18x8xf32, #tpu.memory_space<vmem>>, vector<16x16x8xf32>
    %c0_86 = arith.constant 0 : index
    %c0_87 = arith.constant 0 : index
    %c24_88 = arith.constant 24 : index
    %41 = vector.load %arg12[%c0_86, %c0_87, %c24_88] : memref<16x16x72xf32, #tpu.memory_space<vmem>>, vector<16x16x8xf32>
    tpu.vector_store %arg12[%c0_86, %c0_87, %c24_88], %40 {strides = array<i32>} : memref<16x16x72xf32, #tpu.memory_space<vmem>>, vector<16x16x8xf32>,
    %c1_89 = arith.constant 1 : index
    %c1_90 = arith.constant 1 : index
    %c0_91 = arith.constant 0 : index
    %42 = vector.load %arg11[%c1_89, %c1_90, %c0_91] : memref<18x18x8xf32, #tpu.memory_space<vmem>>, vector<16x16x8xf32>
    %c0_92 = arith.constant 0 : index
    %c0_93 = arith.constant 0 : index
    %c32_94 = arith.constant 32 : index
    %43 = vector.load %arg12[%c0_92, %c0_93, %c32_94] : memref<16x16x72xf32, #tpu.memory_space<vmem>>, vector<16x16x8xf32>
    tpu.vector_store %arg12[%c0_92, %c0_93, %c32_94], %42 {strides = array<i32>} : memref<16x16x72xf32, #tpu.memory_space<vmem>>, vector<16x16x8xf32>,
    %c1_95 = arith.constant 1 : index
    %c2_96 = arith.constant 2 : index
    %c0_97 = arith.constant 0 : index
    %44 = vector.load %arg11[%c1_95, %c2_96, %c0_97] : memref<18x18x8xf32, #tpu.memory_space<vmem>>, vector<16x16x8xf32>
    %c0_98 = arith.constant 0 : index
    %c0_99 = arith.constant 0 : index
    %c40_100 = arith.constant 40 : index
    %45 = vector.load %arg12[%c0_98, %c0_99, %c40_100] : memref<16x16x72xf32, #tpu.memory_space<vmem>>, vector<16x16x8xf32>
    tpu.vector_store %arg12[%c0_98, %c0_99, %c40_100], %44 {strides = array<i32>} : memref<16x16x72xf32, #tpu.memory_space<vmem>>, vector<16x16x8xf32>,
    %c2_101 = arith.constant 2 : index
    %c0_102 = arith.constant 0 : index
    %c0_103 = arith.constant 0 : index
    %46 = vector.load %arg11[%c2_101, %c0_102, %c0_103] : memref<18x18x8xf32, #tpu.memory_space<vmem>>, vector<16x16x8xf32>
    %c0_104 = arith.constant 0 : index
    %c0_105 = arith.constant 0 : index
    %c48_106 = arith.constant 48 : index
    %47 = vector.load %arg12[%c0_104, %c0_105, %c48_106] : memref<16x16x72xf32, #tpu.memory_space<vmem>>, vector<16x16x8xf32>
    tpu.vector_store %arg12[%c0_104, %c0_105, %c48_106], %46 {strides = array<i32>} : memref<16x16x72xf32, #tpu.memory_space<vmem>>, vector<16x16x8xf32>,
    %c2_107 = arith.constant 2 : index
    %c1_108 = arith.constant 1 : index
    %c0_109 = arith.constant 0 : index
    %48 = vector.load %arg11[%c2_107, %c1_108, %c0_109] : memref<18x18x8xf32, #tpu.memory_space<vmem>>, vector<16x16x8xf32>
    %c0_110 = arith.constant 0 : index
    %c0_111 = arith.constant 0 : index
    %c56_112 = arith.constant 56 : index
    %49 = vector.load %arg12[%c0_110, %c0_111, %c56_112] : memref<16x16x72xf32, #tpu.memory_space<vmem>>, vector<16x16x8xf32>
    tpu.vector_store %arg12[%c0_110, %c0_111, %c56_112], %48 {strides = array<i32>} : memref<16x16x72xf32, #tpu.memory_space<vmem>>, vector<16x16x8xf32>,
    %c2_113 = arith.constant 2 : index
    %c2_114 = arith.constant 2 : index
    %c0_115 = arith.constant 0 : index
    %50 = vector.load %arg11[%c2_113, %c2_114, %c0_115] : memref<18x18x8xf32, #tpu.memory_space<vmem>>, vector<16x16x8xf32>
    %c0_116 = arith.constant 0 : index
    %c0_117 = arith.constant 0 : index
    %c64_118 = arith.constant 64 : index
    %51 = vector.load %arg12[%c0_116, %c0_117, %c64_118] : memref<16x16x72xf32, #tpu.memory_space<vmem>>, vector<16x16x8xf32>
    tpu.vector_store %arg12[%c0_116, %c0_117, %c64_118], %50 {strides = array<i32>} : memref<16x16x72xf32, #tpu.memory_space<vmem>>, vector<16x16x8xf32>,
    %c0_119 = arith.constant 0 : index
    %c0_120 = arith.constant 0 : index
    %c0_121 = arith.constant 0 : index
    %52 = vector.load %arg12[%c0_119, %c0_120, %c0_121] : memref<16x16x72xf32, #tpu.memory_space<vmem>>, vector<16x16x72xf32>
    %53 = vector.shape_cast %52 : vector<16x16x72xf32> to vector<256x72xf32>
    %c0_122 = arith.constant 0 : index
    %c0_123 = arith.constant 0 : index
    %54 = vector.load %arg4[%c0_122, %c0_123] : memref<72x16xf32, #tpu.memory_space<vmem>>, vector<72x16xf32>
    %cst_124 = arith.constant dense<0.000000e+00> : vector<256x16xf32>
    %55 = tpu.matmul %53, %54, %cst_124 {dimension_numbers = #tpu.dot_dimension_numbers<[1], [0], [0], [1], [0, 0, 1, 1], [], []>} : vector<256x72xf32>, vector<72x16xf32>, vector<256x16xf32> -> vector<256x16xf32>
    %c0_125 = arith.constant 0 : index
    %c0_126 = arith.constant 0 : index
    %56 = vector.load %arg5[%c0_125, %c0_126] : memref<1x16xf32, #tpu.memory_space<vmem>>, vector<1x16xf32>
    %57 = vector.broadcast %56 : vector<1x16xf32> to vector<256x16xf32>
    %58 = arith.addf %55, %57 : vector<256x16xf32>
    %cst_127 = arith.constant 0.000000e+00 : f32
    %59 = vector.broadcast %cst_127 : f32 to vector<256x16xf32>
    %60 = arith.maximumf %58, %59 : vector<256x16xf32>
    %cst_128 = arith.constant dense<0.000000e+00> : vector<16xf32>
    %61 = vector.multi_reduction <add>, %60, %cst_128 [0] : vector<256x16xf32> to vector<16xf32>
    %62 = vector.shape_cast %61 : vector<16xf32> to vector<1x16xf32>
    %cst_129 = arith.constant 3.906250e-03 : f32
    %63 = vector.broadcast %cst_129 : f32 to vector<1x16xf32>
    %64 = arith.mulf %62, %63 : vector<1x16xf32>
    %c0_130 = arith.constant 0 : index
    %c0_131 = arith.constant 0 : index
    %65 = vector.load %arg6[%c0_130, %c0_131] : memref<16x32xf32, #tpu.memory_space<vmem>>, vector<16x32xf32>
    %cst_132 = arith.constant dense<0.000000e+00> : vector<1x32xf32>
    %66 = tpu.matmul %64, %65, %cst_132 {dimension_numbers = #tpu.dot_dimension_numbers<[1], [0], [0], [1], [0, 0, 1, 1], [], []>} : vector<1x16xf32>, vector<16x32xf32>, vector<1x32xf32> -> vector<1x32xf32>
    %c0_133 = arith.constant 0 : index
    %c0_134 = arith.constant 0 : index
    %67 = vector.load %arg7[%c0_133, %c0_134] : memref<1x32xf32, #tpu.memory_space<vmem>>, vector<1x32xf32>
    %68 = arith.addf %66, %67 : vector<1x32xf32>
    %cst_135 = arith.constant 0.000000e+00 : f32
    %69 = vector.broadcast %cst_135 : f32 to vector<1x32xf32>
    %70 = arith.maximumf %68, %69 : vector<1x32xf32>
    %c0_136 = arith.constant 0 : index
    %c0_137 = arith.constant 0 : index
    %71 = vector.load %arg8[%c0_136, %c0_137] : memref<32x128xf32, #tpu.memory_space<vmem>>, vector<32x128xf32>
    %cst_138 = arith.constant dense<0.000000e+00> : vector<1x128xf32>
    %72 = tpu.matmul %70, %71, %cst_138 {dimension_numbers = #tpu.dot_dimension_numbers<[1], [0], [0], [1], [0, 0, 1, 1], [], []>} : vector<1x32xf32>, vector<32x128xf32>, vector<1x128xf32> -> vector<1x128xf32>
    %c0_139 = arith.constant 0 : index
    %c0_140 = arith.constant 0 : index
    %73 = vector.load %arg9[%c0_139, %c0_140] : memref<1x128xf32, #tpu.memory_space<vmem>>, vector<1x128xf32>
    %74 = arith.addf %72, %73 : vector<1x128xf32>
    %75 = vector.shape_cast %74 : vector<1x128xf32> to vector<1x1x128xf32>
    %c0_141 = arith.constant 0 : index
    %c0_142 = arith.constant 0 : index
    %c0_143 = arith.constant 0 : index
    %76 = vector.load %arg10[%c0_141, %c0_142, %c0_143] : memref<1x1x128xf32, #tpu.memory_space<vmem>>, vector<1x1x128xf32>
    tpu.vector_store %arg10[%c0_141, %c0_142, %c0_143], %75 {strides = array<i32>} : memref<1x1x128xf32, #tpu.memory_space<vmem>>, vector<1x1x128xf32>,
    return
  }
  func.func @transform_0(%arg0: i32) -> (i32, i32, i32, i32) {
    %c0_i32 = arith.constant 0 : i32
    %c0_i32_0 = arith.constant 0 : i32
    %c0_i32_1 = arith.constant 0 : i32
    %c0_i32_2 = arith.constant 0 : i32
    return %arg0, %c0_i32, %c0_i32_0, %c0_i32_1 : i32, i32, i32, i32
  }
  func.func @transform_1(%arg0: i32) -> (i32, i32) {
    %c0_i32 = arith.constant 0 : i32
    %c0_i32_0 = arith.constant 0 : i32
    %c0_i32_1 = arith.constant 0 : i32
    return %c0_i32, %c0_i32_0 : i32, i32
  }
  func.func @transform_2(%arg0: i32) -> (i32, i32) {
    %c0_i32 = arith.constant 0 : i32
    %c0_i32_0 = arith.constant 0 : i32
    %c0_i32_1 = arith.constant 0 : i32
    return %c0_i32, %c0_i32_0 : i32, i32
  }
  func.func @transform_3(%arg0: i32) -> (i32, i32) {
    %c0_i32 = arith.constant 0 : i32
    %c0_i32_0 = arith.constant 0 : i32
    %c0_i32_1 = arith.constant 0 : i32
    return %c0_i32, %c0_i32_0 : i32, i32
  }
  func.func @transform_4(%arg0: i32) -> (i32, i32) {
    %c0_i32 = arith.constant 0 : i32
    %c0_i32_0 = arith.constant 0 : i32
    %c0_i32_1 = arith.constant 0 : i32
    return %c0_i32, %c0_i32_0 : i32, i32
  }
  func.func @transform_5(%arg0: i32) -> (i32, i32) {
    %c0_i32 = arith.constant 0 : i32
    %c0_i32_0 = arith.constant 0 : i32
    %c0_i32_1 = arith.constant 0 : i32
    return %c0_i32, %c0_i32_0 : i32, i32
  }
  func.func @transform_6(%arg0: i32) -> (i32, i32) {
    %c0_i32 = arith.constant 0 : i32
    %c0_i32_0 = arith.constant 0 : i32
    %c0_i32_1 = arith.constant 0 : i32
    return %c0_i32, %c0_i32_0 : i32, i32
  }
  func.func @transform_7(%arg0: i32) -> (i32, i32) {
    %c0_i32 = arith.constant 0 : i32
    %c0_i32_0 = arith.constant 0 : i32
    %c0_i32_1 = arith.constant 0 : i32
    return %c0_i32, %c0_i32_0 : i32, i32
  }
  func.func @transform_8(%arg0: i32) -> (i32, i32) {
    %c0_i32 = arith.constant 0 : i32
    %c0_i32_0 = arith.constant 0 : i32
    %c0_i32_1 = arith.constant 0 : i32
    return %c0_i32, %c0_i32_0 : i32, i32
  }
  func.func @transform_9(%arg0: i32) -> (i32, i32, i32) {
    %c0_i32 = arith.constant 0 : i32
    %c0_i32_0 = arith.constant 0 : i32
    %c0_i32_1 = arith.constant 0 : i32
    return %arg0, %c0_i32, %c0_i32_0 : i32, i32, i32
  }
}

</mosaic_0001>

<bundles_post_ra>
// kernel: cnn_phenotype_forward.1
= control target key start
LH: loop header
LB: loop body
LE: loop exit
PB: predicated region body
PF: predicated region fallthrough
CT: control target
= control target key end

     0   :  { %14 = vsyncpa [#allocation5], 0  ;;  %s7260_s0 = inlined_call_operand.vmem [shape: f32[2,16,16,4], index: 0, kind: input, shape index: {}]   ;;  %s7261_s1 = inlined_call_operand.vmem [shape: f32[72,8], index: 1, kind: input, shape index: {}]   ;;  %s7262_s2 = inlined_call_operand.vmem [shape: f32[1,8], index: 2, kind: input, shape index: {}]   ;;  %s7263_s3 = inlined_call_operand.vmem [shape: f32[72,16], index: 3, kind: input, shape index: {}]   ;;  %s7264_s4 = inlined_call_operand.vmem [shape: f32[1,16], index: 4, kind: input, shape index: {}]   ;;  %s7265_s5 = inlined_call_operand.vmem [shape: f32[16,32], index: 5, kind: input, shape index: {}]   ;;  %s7266_s6 = inlined_call_operand.vmem [shape: f32[1,32], index: 6, kind: input, shape index: {}]   ;;  %s7267_s7 = inlined_call_operand.vmem [shape: f32[32,128], index: 7, kind: input, shape index: {}]   ;;  %s7268_s8 = inlined_call_operand.vmem [shape: f32[1,128], index: 8, kind: input, shape index: {}]   ;;  %s7269_s9 = inlined_call_operand.hbm [shape: f32[2,1,128], index: 9, kind: output, shape index: {}]  }
   0x1   :  { %16 = vsyncpa [#allocation5 + $0x1], 0  ;;  %s5330_s30 = smov 0   ;;  %s5332_s10 = smov 0  }
   0x2   :  { %s5334_s11 = smov 0   ;;  %s5336_s12 = smov 0  }
   0x3 LB: > { %s5351_s13 = sadd.s32 4294967295, %s5266_s12   ;;  %s4792_s14 = sadd.s32 4294967294, %s5266_s12   ;;  %s5266_s12 = sphi %s5336_s12, %s7284_s12   ;;  %s5262_s11 = sphi %s5334_s11, %s7283_s11   ;;  %s5258_s10 = sphi %s5332_s10, %s7282_s10   ;;  %s5254_s30 = sphi %s5330_s30, %s7281_s30  }
   0x4   : > { %s5355_s15 = sadd.s32 1, %s5266_s12   ;;  %s223_s16 = sadd.s32 1, %s5262_s11 }
   0x5   : > { %s220_s17 = ssub.s32 %s5266_s12, %s5355_s15  ;;  %p233_p0 = scmp.ne.s32.totalorder %s5262_s11, %s5258_s10 }
   0x6   : > { %p221_p1 = scmp.eq.s32.totalorder %s220_s17, 0  ;;  %p234_p2 = scmp.eq.s32.totalorder %s5351_s13, 1 }
   0x7   : > { %p239_p3 = scmp.ne.s32.totalorder %s5258_s10, %s5254_s30  ;;  %p240_p4 = scmp.eq.s32.totalorder %s4792_s14, 1 }
   0x8   : > { %s5366_s18 = scalar_select %p221_p1, %s5262_s11, %s223_s16  }
   0x9   : > { %p5368_p5 = por %p234_p2, %p233_p0  ;;  %p5372_p6 = por %p240_p4, %p239_p3 }
   0xa   : > { %p4795_p7 = scmp.ge.s32.totalorder %s5266_s12, 1  ;;  %p290_p8 = scmp.lt.s32.totalorder %s5266_s12, 3 }
   0xc   : > { %p291_p9 = pnand %p4795_p7, %p290_p8 }
   0xd   : > { %vm330_vm0 = vcmask (!%p291_p9), 64512   ;;  %vm333_vm1 = vcmask (!%p291_p9), 58368   ;;  %v5268_v0 = vmov (!%p291_p9), 0.0   ;;  %p325_p10 = scmp.lt.s32.totalorder (!%p291_p9), %s5351_s13, 1  ;;  %vm419_vm2 = vcmask (!%p291_p9), 31744   ;;  %s5269_s26 = smov (!%p291_p9), 16  }
   0xe   : > { %294 = sbr.rel (%p291_p9) target bundleno = 1865 (0x749), region = 56  ;;  %331 = vst.msk [vmem:[#allocation2] sm:$0xff] (!%p291_p9), %vm330_vm0, %v5268_v0  ;;  %332 = vst.msk [vmem:[#allocation2 + $0x8] sm:$0xff] (!%p291_p9), %vm330_vm0, %v5268_v0  ;;  %s7272_s27 = smov (!%p291_p9), 8   ;;  %v2093_v32 = vld [vmem:[%s7261_s1] sm:$0xff] (!%p291_p9)  ;;  %v2094_v33 = vld [vmem:[%s7261_s1 + $0x8] sm:$0xff] (!%p291_p9) }
   0xf   : > { %335 = vst.msk [vmem:[#allocation2 + $0x18] sm:$0xff] (!%p291_p9), %vm330_vm0, %v5268_v0  ;;  %336 = vst.msk [vmem:[#allocation2 + $0x20] sm:$0xff] (!%p291_p9), %vm330_vm0, %v5268_v0  ;;  %s5271_s28 = smov (!%p291_p9), 24   ;;  %s7274_s29 = smov (!%p291_p9), 32   ;;  %v5110_v34 = vpack.c.bf16 (!%p291_p9), %v2094_v33, %v2093_v32  ;;  %v2095_v37 = vld [vmem:[%s7261_s1 + $0x10] sm:$0xff] (!%p291_p9)  ;;  %v2096_v38 = vld [vmem:[%s7261_s1 + $0x18] sm:$0xff] (!%p291_p9) }
  0x10   : > { %338 = vst.msk [vmem:[#allocation2 + $0x30] sm:$0xff] (!%p291_p9), %vm330_vm0, %v5268_v0  ;;  %339 = vst.msk [vmem:[#allocation2 + $0x38] sm:$0xff] (!%p291_p9), %vm330_vm0, %v5268_v0  ;;  %s7270_s14 = smov (!%p291_p9), 40   ;;  %s5274_s23 = smov (!%p291_p9), 48   ;;  %v5114_v39 = vpack.c.bf16 (!%p291_p9), %v2096_v38, %v2095_v37  ;;  %v2097_v41 = vld [vmem:[%s7261_s1 + $0x20] sm:$0xff] (!%p291_p9)  ;;  %v2098_v42 = vld [vmem:[%s7261_s1 + $0x28] sm:$0xff] (!%p291_p9) }
  0x11   : > { %341 = vst.msk [vmem:[#allocation2 + $0x48] sm:$0xff] (!%p291_p9), %vm330_vm0, %v5268_v0  ;;  %342 = vst.msk [vmem:[#allocation2 + $0x50] sm:$0xff] (!%p291_p9), %vm330_vm0, %v5268_v0  ;;  %5111 = vmatprep.subr.bf16.mxu0 (!%p291_p9), %v5110_v34  ;;  %v5118_v44 = vpack.c.bf16 (!%p291_p9), %v2098_v42, %v2097_v41  ;;  %s5275_s24 = smov (!%p291_p9), 56   ;;  %v2099_v45 = vld [vmem:[%s7261_s1 + $0x30] sm:$0xff] (!%p291_p9)  ;;  %v2100_v46 = vld [vmem:[%s7261_s1 + $0x38] sm:$0xff] (!%p291_p9)  ;;  %s7280_s17 = smov (!%p291_p9), 40  }
  0x12   : > { %344 = vst.msk [vmem:[#allocation2 + $0x60] sm:$0xff] (!%p291_p9), %vm330_vm0, %v5268_v0  ;;  %345 = vst.msk [vmem:[#allocation2 + $0x68] sm:$0xff] (!%p291_p9), %vm330_vm0, %v5268_v0  ;;  %5113 = vmatpush3.bf16.msra.mxu0 (!%p291_p9), %v5110_v34  ;;  %v5122_v47 = vpack.c.bf16 (!%p291_p9), %v2100_v46, %v2099_v45  ;;  %v2101_v50 = vld [vmem:[%s7261_s1 + $0x40] sm:$0xff] (!%p291_p9)  ;;  %vm676_vm3 = vcmask (!%p291_p9), 130112   ;;  %vm869_vm4 = vcmask (!%p291_p9), 195712   ;;  %vm1062_vm5 = vcmask (!%p291_p9), 261312  }
  0x13   : > { %347 = vst.msk [vmem:[#allocation2 + $0x78] sm:$0xff] (!%p291_p9), %vm330_vm0, %v5268_v0  ;;  %348 = vst.msk [vmem:[#allocation2 + $0x80] sm:$0xff] (!%p291_p9), %vm330_vm0, %v5268_v0  ;;  %5115 = vmatprep.subr.bf16.mxu0 (!%p291_p9), %v5114_v39  ;;  %vm1255_vm6 = vcmask (!%p291_p9), 326912   ;;  %vm1448_vm7 = vcmask (!%p291_p9), 392512   ;;  %vm1642_vm8 = vcmask (!%p291_p9), 458112   ;;  %vm1835_vm9 = vcmask (!%p291_p9), 523712  }
  0x14   : > { %350 = vst.msk [vmem:[#allocation2 + $0x90] sm:$0xff] (!%p291_p9), %vm330_vm0, %v5268_v0  ;;  %351 = vst.msk [vmem:[#allocation2 + $0x98] sm:$0xff] (!%p291_p9), %vm330_vm0, %v5268_v0  ;;  %vm2028_vm10 = vcmask (!%p291_p9), 589312   ;;  %vm2109_vm11 = vcmask (!%p291_p9), 588800   ;;  %vm4496_vm12 = vcmask (!%p291_p9), 130048   ;;  %vm5278_vm13 = vmmov (!%p291_p9), 0  }
  0x15   : > { %353 = vst.msk [vmem:[#allocation2 + $0xa8] sm:$0xff] %vm330_vm0, %v5268_v0  ;;  %354 = vst.msk [vmem:[#allocation2 + $0xb0] sm:$0xff] %vm330_vm0, %v5268_v0  ;;  %s326_s21 = scalar_select %p325_p10, %s5351_s13, 1  ;;  %v709_v4 = vld [vmem:[#allocation2 + $0x2] sm:$0xff]  ;;  %vm4649_vm14 = vcmask 261120  }
  0x16   : > { %356 = vst.msk [vmem:[#allocation2 + $0xc0] sm:$0xff] %vm330_vm0, %v5268_v0  ;;  %357 = vst.msk [vmem:[#allocation2 + $0xc8] sm:$0xff] %vm330_vm0, %v5268_v0  ;;  %v516_v5 = vld [vmem:[#allocation2 + $0x1] sm:$0xff]  ;;  %773 = vrot.lane.b32.xlu1 %v709_v4, %s5269_s26  ;;  %5117 = vmatpush3.bf16.msra.mxu0 %v5114_v39 }
  0x17   : > { %359 = vst.msk [vmem:[#allocation2 + $0xd8] sm:$0xff] %vm330_vm0, %v5268_v0  ;;  %360 = vst.msk [vmem:[#allocation2 + $0xe0] sm:$0xff] %vm330_vm0, %v5268_v0  ;;  %s4869_s22 = sshll.u32 %s326_s21, 8  ;;  %580 = vrot.lane.b32.xlu0 %v516_v5, %s7272_s27  ;;  %v452_v13 = vld [vmem:[#allocation2] sm:$0xff]  ;;  %v453_v14 = vld [vmem:[#allocation2 + $0x8] sm:$0xff]  ;;  %5119 = vmatprep.subr.bf16.mxu0 %v5118_v44  ;;  %s5276_s21 = smov 64  }
  0x18   : > { %362 = vst.msk [vmem:[#allocation2 + $0xf0] sm:$0xff] %vm330_vm0, %v5268_v0  ;;  %363 = vst.msk [vmem:[#allocation2 + $0xf8] sm:$0xff] %vm330_vm0, %v5268_v0  ;;  %s5491_s25 = scalar_lea.vmem %s7260_s0, %s4869_s22 }
  0x19   : > { %365 = vst.msk [vmem:[#allocation2 + $0x108] sm:$0xff] %vm330_vm0, %v5268_v0  ;;  %366 = vst.msk [vmem:[#allocation2 + $0x110] sm:$0xff] %vm330_vm0, %v5268_v0  ;;  %v386_v1 = vld [vmem:[%s5491_s25] sm:$0xff]  ;;  %v387_v2 = vld [vmem:[%s5491_s25 + $0x8] sm:$0xff] }
  0x1a   : > { %368 = vst.msk [vmem:[#allocation2 + $0x120] sm:$0xff] %vm330_vm0, %v5268_v0  ;;  %369 = vst.msk [vmem:[#allocation2 + $0x128] sm:$0xff] %vm330_vm0, %v5268_v0  ;;  %v388_v3 = vld [vmem:[%s5491_s25 + $0x10] sm:$0xff]  ;;  %v389_v8 = vld [vmem:[%s5491_s25 + $0x18] sm:$0xff]  ;;  %5121 = vmatpush3.bf16.msra.mxu0 %v5118_v44 }
  0x1b   : > { %371 = vst.msk [vmem:[#allocation2 + $0x138] sm:$0xff] %vm330_vm0, %v5268_v0  ;;  %372 = vst.msk [vmem:[#allocation2 + $0x140] sm:$0xff] %vm330_vm0, %v5268_v0  ;;  %v390_v9 = vld [vmem:[%s5491_s25 + $0x20] sm:$0xff]  ;;  %v391_v10 = vld [vmem:[%s5491_s25 + $0x28] sm:$0xff]  ;;  %5123 = vmatprep.subr.bf16.mxu0 %v5122_v47 }
  0x1c   : > { %374 = vst.msk [vmem:[#allocation2 + $0x150] sm:$0xff] %vm330_vm0, %v5268_v0  ;;  %375 = vst.msk [vmem:[#allocation2 + $0x158] sm:$0xff] %vm330_vm0, %v5268_v0  ;;  %v392_v11 = vld [vmem:[%s5491_s25 + $0x30] sm:$0xff]  ;;  %v393_v12 = vld [vmem:[%s5491_s25 + $0x38] sm:$0xff] }
  0x1d   : > { %377 = vst.msk [vmem:[#allocation2 + $0x168] sm:$0xff] %vm330_vm0, %v5268_v0  ;;  %378 = vst.msk [vmem:[#allocation2 + $0x170] sm:$0xff] %vm330_vm0, %v5268_v0  ;;  %v394_v15 = vld [vmem:[%s5491_s25 + $0x40] sm:$0xff]  ;;  %v395_v16 = vld [vmem:[%s5491_s25 + $0x48] sm:$0xff] }
  0x1e   : > { %380 = vst.msk [vmem:[#allocation2 + $0x180] sm:$0xff] %vm330_vm0, %v5268_v0  ;;  %381 = vst.msk [vmem:[#allocation2 + $0x188] sm:$0xff] %vm330_vm0, %v5268_v0  ;;  %v396_v30 = vld [vmem:[%s5491_s25 + $0x50] sm:$0xff]  ;;  %v397_v35 = vld [vmem:[%s5491_s25 + $0x58] sm:$0xff]  ;;  %5125 = vmatpush3.bf16.msra.mxu0 %v5122_v47 }
  0x1f   : > { %383 = vst.msk [vmem:[#allocation2 + $0x198] sm:$0xff] %vm330_vm0, %v5268_v0  ;;  %384 = vst.msk [vmem:[#allocation2 + $0x1a0] sm:$0xff] %vm330_vm0, %v5268_v0  ;;  %4976 = vmatprep.subr.mxu0 %v2101_v50  ;;  %v398_v52 = vld [vmem:[%s5491_s25 + $0x60] sm:$0xff]  ;;  %v399_v54 = vld [vmem:[%s5491_s25 + $0x68] sm:$0xff] }
  0x20   : > { %334 = vst.msk [vmem:[#allocation2 + $0x10] sm:$0x3] %vm333_vm1, %v5268_v0  ;;  %337 = vst.msk [vmem:[#allocation2 + $0x28] sm:$0x3] %vm333_vm1, %v5268_v0  ;;  %v400_v60 = vld [vmem:[%s5491_s25 + $0x70] sm:$0xff]  ;;  %v401_v62 = vld [vmem:[%s5491_s25 + $0x78] sm:$0xff] }
  0x21   : > { %340 = vst.msk [vmem:[#allocation2 + $0x40] sm:$0x3] %vm333_vm1, %v5268_v0  ;;  %343 = vst.msk [vmem:[#allocation2 + $0x58] sm:$0x3] %vm333_vm1, %v5268_v0  ;;  %v402_v5 = vld [vmem:[%s5491_s25 + $0x80] sm:$0xff] }
  0x22   : > { %346 = vst.msk [vmem:[#allocation2 + $0x70] sm:$0x3] %vm333_vm1, %v5268_v0  ;;  %349 = vst.msk [vmem:[#allocation2 + $0x88] sm:$0x3] %vm333_vm1, %v5268_v0  ;;  %4977 = vmatpush3.msra.mxu0 %v2101_v50 }
  0x23   : > { %352 = vst.msk [vmem:[#allocation2 + $0xa0] sm:$0x3] %vm333_vm1, %v5268_v0  ;;  %355 = vst.msk [vmem:[#allocation2 + $0xb8] sm:$0x3] %vm333_vm1, %v5268_v0 }
  0x24   : > { %358 = vst.msk [vmem:[#allocation2 + $0xd0] sm:$0x3] %vm333_vm1, %v5268_v0  ;;  %361 = vst.msk [vmem:[#allocation2 + $0xe8] sm:$0x3] %vm333_vm1, %v5268_v0 }
  0x25   : > { %364 = vst.msk [vmem:[#allocation2 + $0x100] sm:$0x3] %vm333_vm1, %v5268_v0  ;;  %367 = vst.msk [vmem:[#allocation2 + $0x118] sm:$0x3] %vm333_vm1, %v5268_v0 }
  0x26   : > { %370 = vst.msk [vmem:[#allocation2 + $0x130] sm:$0x3] %vm333_vm1, %v5268_v0  ;;  %373 = vst.msk [vmem:[#allocation2 + $0x148] sm:$0x3] %vm333_vm1, %v5268_v0 }
  0x27   : > { %376 = vst.msk [vmem:[#allocation2 + $0x160] sm:$0x3] %vm333_vm1, %v5268_v0  ;;  %379 = vst.msk [vmem:[#allocation2 + $0x178] sm:$0x3] %vm333_vm1, %v5268_v0  ;;  %v710_v6 = vld [vmem:[#allocation2 + $0xa] sm:$0xff] }
  0x28   : > { %382 = vst.msk [vmem:[#allocation2 + $0x190] sm:$0x3] %vm333_vm1, %v5268_v0  ;;  %385 = vst.msk [vmem:[#allocation2 + $0x1a8] sm:$0x3] %vm333_vm1, %v5268_v0  ;;  %v517_v7 = vld [vmem:[#allocation2 + $0x9] sm:$0xff]  ;;  %775 = vrot.lane.b32.xlu1 %v710_v6, %s5269_s26 }
  0x29   : > { %420 = vst.msk [vmem:[#allocation2 + $0x19] sm:$0xff] %vm419_vm2, %v386_v1  ;;  %421 = vst.msk [vmem:[#allocation2 + $0x21] sm:$0xff] %vm419_vm2, %v387_v2  ;;  %582 = vrot.lane.b32.xlu0 %v517_v7, %s7272_s27 }
  0x2a   : > { %422 = vst.msk [vmem:[#allocation2 + $0x31] sm:$0xff] %vm419_vm2, %v388_v3  ;;  %423 = vst.msk [vmem:[#allocation2 + $0x39] sm:$0xff] %vm419_vm2, %v389_v8 }
  0x2b   : > { %424 = vst.msk [vmem:[#allocation2 + $0x49] sm:$0xff] %vm419_vm2, %v390_v9  ;;  %425 = vst.msk [vmem:[#allocation2 + $0x51] sm:$0xff] %vm419_vm2, %v391_v10 }
  0x2c   : > { %426 = vst.msk [vmem:[#allocation2 + $0x61] sm:$0xff] %vm419_vm2, %v392_v11  ;;  %427 = vst.msk [vmem:[#allocation2 + $0x69] sm:$0xff] %vm419_vm2, %v393_v12  ;;  %v403_v11 = vld [vmem:[%s5491_s25 + $0x88] sm:$0xff] }
  0x2d   : > { %484 = vst.msk [vmem:[#allocation3] sm:$0xff] %vm330_vm0, %v452_v13  ;;  %485 = vst.msk [vmem:[#allocation3 + $0x8] sm:$0xff] %vm330_vm0, %v453_v14 }
  0x2e   : > { %428 = vst.msk [vmem:[#allocation2 + $0x79] sm:$0xff] %vm419_vm2, %v394_v15  ;;  %429 = vst.msk [vmem:[#allocation2 + $0x81] sm:$0xff] %vm419_vm2, %v395_v16 }
  0x2f   : > { %430 = vst.msk [vmem:[#allocation2 + $0x91] sm:$0xff] %vm419_vm2, %v396_v30  ;;  %431 = vst.msk [vmem:[#allocation2 + $0x99] sm:$0xff] %vm419_vm2, %v397_v35  ;;  %v405_v35 = vld [vmem:[%s5491_s25 + $0x98] sm:$0xff] }
  0x30   : > { %v903_v17 = vld [vmem:[#allocation2 + $0x20] sm:$0xff]  ;;  %v902_v18 = vld [vmem:[#allocation2 + $0x18] sm:$0xff]  ;;  %432 = vst.msk [vmem:[#allocation2 + $0xa9] sm:$0xff] %vm419_vm2, %v398_v52  ;;  %433 = vst.msk [vmem:[#allocation2 + $0xb1] sm:$0xff] %vm419_vm2, %v399_v54 }
  0x31   : > { %486 = vst.msk [vmem:[#allocation3 + $0x10] sm:$0xff] %vm330_vm0, %v902_v18  ;;  %487 = vst.msk [vmem:[#allocation3 + $0x18] sm:$0xff] %vm330_vm0, %v903_v17  ;;  %968 = vrot.lane.b32.xlu1 %v903_v17, %s5271_s28  ;;  %966 = vrot.lane.b32.xlu0 %v902_v18, %s5271_s28  ;;  %v1482_v19 = vld [vmem:[#allocation2 + $0x30] sm:$0xff]  ;;  %v1483_v20 = vld [vmem:[#allocation2 + $0x38] sm:$0xff] }
  0x32   : > { %v1095_v21 = vld [vmem:[#allocation2 + $0x19] sm:$0xff]  ;;  %488 = vst.msk [vmem:[#allocation3 + $0x20] sm:$0xff] %vm330_vm0, %v1482_v19  ;;  %489 = vst.msk [vmem:[#allocation3 + $0x28] sm:$0xff] %vm330_vm0, %v1483_v20  ;;  %v5525_v22 = vld [vmem:[#allocation2 + $0x48] sm:$0xff] }
  0x33   : > { %v5527_v23 = vld [vmem:[#allocation2 + $0x50] sm:$0xff]  ;;  %490 = vst.msk [vmem:[#allocation3 + $0x30] sm:$0xff] %vm330_vm0, %v5525_v22  ;;  %v5535_v24 = vld [vmem:[#allocation2 + $0x60] sm:$0xff]  ;;  %v5537_v25 = vld [vmem:[#allocation2 + $0x68] sm:$0xff] }
  0x34   : > { %491 = vst.msk [vmem:[#allocation3 + $0x38] sm:$0xff] %vm330_vm0, %v5527_v23  ;;  %v1096_v26 = vld [vmem:[#allocation2 + $0x21] sm:$0xff]  ;;  %492 = vst.msk [vmem:[#allocation3 + $0x40] sm:$0xff] %vm330_vm0, %v5535_v24  ;;  %v1675_v40 = vld [vmem:[#allocation2 + $0x31] sm:$0xff] }
  0x35   : > { %1159 = vrot.lane.b32.xlu0 %v1095_v21, %s7274_s29  ;;  %584 = vrot.lane.b32.xlu1 %v1095_v21, %s7272_s27  ;;  %v1288_v27 = vld [vmem:[#allocation2 + $0x1a] sm:$0xff]  ;;  %493 = vst.msk [vmem:[#allocation3 + $0x48] sm:$0xff] %vm330_vm0, %v5537_v25  ;;  %v1289_v31 = vld [vmem:[#allocation2 + $0x22] sm:$0xff]  ;;  %v1868_v49 = vld [vmem:[#allocation2 + $0x32] sm:$0xff] }
  0x36   : > { %v5543_v28 = vld [vmem:[#allocation2 + $0x78] sm:$0xff]  ;;  %v5545_v29 = vld [vmem:[#allocation2 + $0x80] sm:$0xff]  ;;  %v5566_v36 = vld [vmem:[#allocation2 + $0x90] sm:$0xff]  ;;  %434 = vst.msk [vmem:[#allocation2 + $0xc1] sm:$0xff] %vm419_vm2, %v400_v60 }
  0x37   : > { %494 = vst.msk [vmem:[#allocation3 + $0x50] sm:$0xff] %vm330_vm0, %v5543_v28  ;;  %495 = vst.msk [vmem:[#allocation3 + $0x58] sm:$0xff] %vm330_vm0, %v5545_v29  ;;  %v5585_v43 = vld [vmem:[#allocation2 + $0x98] sm:$0xff]  ;;  %v5612_v53 = vld [vmem:[#allocation2 + $0xa8] sm:$0xff] }
  0x38   : > { %496 = vst.msk [vmem:[#allocation3 + $0x60] sm:$0xff] %vm330_vm0, %v5566_v36  ;;  %497 = vst.msk [vmem:[#allocation3 + $0x68] sm:$0xff] %vm330_vm0, %v5585_v43  ;;  %v1676_v48 = vld [vmem:[#allocation2 + $0x39] sm:$0xff]  ;;  %v1677_v55 = vld [vmem:[#allocation2 + $0x49] sm:$0xff] }
  0x39   : > { %1161 = vrot.lane.b32.xlu0 %v1096_v26, %s7274_s29  ;;  %1352 = vrot.lane.b32.xlu1 %v1288_v27, %s7270_s14  ;;  %s7278_s29 = smov 32   ;;  %v1869_v51 = vld [vmem:[#allocation2 + $0x3a] sm:$0xff]  ;;  %498 = vst.msk [vmem:[#allocation3 + $0x70] sm:$0xff] %vm330_vm0, %v5612_v53  ;;  %v5624_v56 = vld [vmem:[#allocation2 + $0xb0] sm:$0xff]  ;;  %v1872_v3 = vld [vmem:[#allocation2 + $0x62] sm:$0xff] }
  0x3a   : > { %499 = vst.msk [vmem:[#allocation3 + $0x78] sm:$0xff] %vm330_vm0, %v5624_v56  ;;  %v1678_v57 = vld [vmem:[#allocation2 + $0x51] sm:$0xff]  ;;  %v1679_v63 = vld [vmem:[#allocation2 + $0x61] sm:$0xff]  ;;  %v1680_v2 = vld [vmem:[#allocation2 + $0x69] sm:$0xff] }
  0x3b   : > { %v1870_v58 = vld [vmem:[#allocation2 + $0x4a] sm:$0xff]  ;;  %v1871_v59 = vld [vmem:[#allocation2 + $0x52] sm:$0xff]  ;;  %435 = vst.msk [vmem:[#allocation2 + $0xc9] sm:$0xff] %vm419_vm2, %v401_v62  ;;  %436 = vst.msk [vmem:[#allocation2 + $0xd9] sm:$0xff] %vm419_vm2, %v402_v5 }
  0x3c   : > { %v1873_v4 = vld [vmem:[#allocation2 + $0x6a] sm:$0xff]  ;;  %437 = vst.msk [vmem:[#allocation2 + $0xe1] sm:$0xff] %vm419_vm2, %v403_v11  ;;  %v1681_v14 = vld [vmem:[#allocation2 + $0x79] sm:$0xff]  ;;  %439 = vst.msk [vmem:[#allocation2 + $0xf9] sm:$0xff] %vm419_vm2, %v405_v35 }
  0x3d   : > { %586 = vrot.lane.b32.xlu0 %v1096_v26, %s7272_s27  ;;  %777 = vrot.lane.b32.xlu1 %v1288_v27, %s5269_s26  ;;  %v5644_v61 = vld [vmem:[#allocation2 + $0xc0] sm:$0xff]  ;;  %v1683_v39 = vld [vmem:[#allocation2 + $0x91] sm:$0xff]  ;;  %v1685_v5 = vld [vmem:[#allocation2 + $0xa9] sm:$0xff] }
  0x3e   : > { %500 = vst.msk [vmem:[#allocation3 + $0x80] sm:$0xff] %vm330_vm0, %v5644_v61  ;;  %v1874_v21 = vld [vmem:[#allocation2 + $0x7a] sm:$0xff]  ;;  %v1875_v26 = vld [vmem:[#allocation2 + $0x82] sm:$0xff]  ;;  %v1876_v47 = vld [vmem:[#allocation2 + $0x92] sm:$0xff] }
  0x3f   : > { %v1684_v46 = vld [vmem:[#allocation2 + $0x99] sm:$0xff] }
  0x41   : > { %1354 = vrot.lane.b32.xlu0 %v1289_v31, %s7270_s14  ;;  %1546 = vrot.lane.b32.xlu1 %v1482_v19, %s5274_s23  ;;  %s7279_s14 = smov 8  }
  0x42   : > { %v5656_v1 = vld [vmem:[#allocation2 + $0xc8] sm:$0xff]  ;;  %v5679_v10 = vld [vmem:[#allocation2 + $0xd8] sm:$0xff] }
  0x43   : > { %501 = vst.msk [vmem:[#allocation3 + $0x88] sm:$0xff] %vm330_vm0, %v5656_v1  ;;  %502 = vst.msk [vmem:[#allocation3 + $0x90] sm:$0xff] %vm330_vm0, %v5679_v10  ;;  %v5696_v17 = vld [vmem:[#allocation2 + $0xe0] sm:$0xff] }
  0x44   : > { %503 = vst.msk [vmem:[#allocation3 + $0x98] sm:$0xff] %vm330_vm0, %v5696_v17 }
  0x45   : > { %779 = vrot.lane.b32.xlu0 %v1289_v31, %s5269_s26  ;;  %970 = vrot.lane.b32.xlu1 %v1482_v19, %s5271_s28 }
  0x49   : > { %1548 = vrot.lane.b32.xlu0 %v1483_v20, %s5274_s23  ;;  %1739 = vrot.lane.b32.xlu1 %v1675_v40, %s5275_s24 }
  0x4d   : > { %972 = vrot.lane.b32.xlu0 %v1483_v20, %s5271_s28  ;;  %1163 = vrot.lane.b32.xlu1 %v1675_v40, %s7278_s29  ;;  %v1682_v20 = vld [vmem:[#allocation2 + $0x81] sm:$0xff] }
  0x51   : > { %1741 = vrot.lane.b32.xlu0 %v1676_v48, %s5275_s24  ;;  %1932 = vrot.lane.b32.xlu1 %v1868_v49, %s5276_s21 }
  0x55   : > { %588 = vrot.lane.b32.xlu0 %v1675_v40, %s7279_s14  ;;  %1165 = vrot.lane.b32.xlu1 %v1676_v48, %s7278_s29 }
  0x59   : > { %1356 = vrot.lane.b32.xlu0 %v1868_v49, %s7280_s17  ;;  %1934 = vrot.lane.b32.xlu1 %v1869_v51, %s5276_s21 }
  0x5d   : > { %590 = vrot.lane.b32.xlu0 %v1676_v48, %s7279_s14  ;;  %781 = vrot.lane.b32.xlu1 %v1868_v49, %s5269_s26 }
  0x61   : > { %1358 = vrot.lane.b32.xlu0 %v1869_v51, %s7280_s17  ;;  %1550 = vrot.lane.b32.xlu1 %v5525_v22, %s5274_s23 }
  0x65   : > { %783 = vrot.lane.b32.xlu0 %v1869_v51, %s5269_s26  ;;  %974 = vrot.lane.b32.xlu1 %v5525_v22, %s5271_s28 }
  0x69   : > { %1552 = vrot.lane.b32.xlu0 %v5527_v23, %s5274_s23  ;;  %1743 = vrot.lane.b32.xlu1 %v1677_v55, %s5275_s24 }
  0x6d   : > { %976 = vrot.lane.b32.xlu0 %v5527_v23, %s5271_s28  ;;  %1167 = vrot.lane.b32.xlu1 %v1677_v55, %s7278_s29 }
  0x71   : > { %1745 = vrot.lane.b32.xlu0 %v1678_v57, %s5275_s24  ;;  %1936 = vrot.lane.b32.xlu1 %v1870_v58, %s5276_s21 }
  0x75   : > { %592 = vrot.lane.b32.xlu0 %v1677_v55, %s7279_s14  ;;  %1169 = vrot.lane.b32.xlu1 %v1678_v57, %s7278_s29 }
  0x79   : > { %1360 = vrot.lane.b32.xlu0 %v1870_v58, %s7280_s17  ;;  %1938 = vrot.lane.b32.xlu1 %v1871_v59, %s5276_s21 }
  0x7d   : > { %594 = vrot.lane.b32.xlu0 %v1678_v57, %s7279_s14  ;;  %785 = vrot.lane.b32.xlu1 %v1870_v58, %s5269_s26  ;;  %v406_v57 = vld [vmem:[%s5491_s25 + $0xa0] sm:$0xff] }
  0x7e   : > { %440 = vst.msk [vmem:[#allocation2 + $0x109] sm:$0xff] %vm419_vm2, %v406_v57 }
  0x81   : > { %1362 = vrot.lane.b32.xlu0 %v1871_v59, %s7280_s17  ;;  %1554 = vrot.lane.b32.xlu1 %v5535_v24, %s5274_s23 }
  0x85   : > { %787 = vrot.lane.b32.xlu0 %v1871_v59, %s5269_s26  ;;  %978 = vrot.lane.b32.xlu1 %v5535_v24, %s5271_s28 }
  0x88   : > { %v774_v6 = vpop.permute.xlu1 %773 }
  0x89   : > { %1556 = vrot.lane.b32.xlu0 %v5537_v25, %s5274_s23  ;;  %1747 = vrot.lane.b32.xlu1 %v1679_v63, %s5275_s24  ;;  %v581_v7 = vpop.permute.xlu0 %580 }
  0x8a   : > { %677 = vst.msk [vmem:[#allocation3] sm:$0xff] %vm676_vm3, %v581_v7 }
  0x8b   : > { %870 = vst.msk [vmem:[#allocation3] sm:$0xff] %vm869_vm4, %v774_v6 }
  0x8d   : > { %980 = vrot.lane.b32.xlu0 %v5537_v25, %s5271_s28  ;;  %1171 = vrot.lane.b32.xlu1 %v1679_v63, %s7278_s29 }
  0x91   : > { %1749 = vrot.lane.b32.xlu0 %v1680_v2, %s5275_s24  ;;  %1940 = vrot.lane.b32.xlu1 %v1872_v3, %s5276_s21 }
  0x95   : > { %596 = vrot.lane.b32.xlu0 %v1679_v63, %s7279_s14  ;;  %1173 = vrot.lane.b32.xlu1 %v1680_v2, %s7278_s29  ;;  %v5778_v63 = vld [vmem:[#allocation2 + $0x108] sm:$0xff] }
  0x96   : > { %506 = vst.msk [vmem:[#allocation3 + $0xb0] sm:$0xff] %vm330_vm0, %v5778_v63 }
  0x99   : > { %1364 = vrot.lane.b32.xlu0 %v1872_v3, %s7280_s17  ;;  %1942 = vrot.lane.b32.xlu1 %v1873_v4, %s5276_s21 }
  0x9a   : > { %v776_v8 = vpop.permute.xlu1 %775 }
  0x9b   : > { %v583_v9 = vpop.permute.xlu0 %582 }
  0x9c   : > { %678 = vst.msk [vmem:[#allocation3 + $0x8] sm:$0xff] %vm676_vm3, %v583_v9 }
  0x9d   : > { %598 = vrot.lane.b32.xlu0 %v1680_v2, %s7279_s14  ;;  %789 = vrot.lane.b32.xlu1 %v1872_v3, %s5269_s26  ;;  %871 = vst.msk [vmem:[#allocation3 + $0x8] sm:$0xff] %vm869_vm4, %v776_v8  ;;  %v407_v2 = vld [vmem:[%s5491_s25 + $0xa8] sm:$0xff] }
  0x9e   : > { %441 = vst.msk [vmem:[#allocation2 + $0x111] sm:$0xff] %vm419_vm2, %v407_v2 }
  0xa1   : > { %1366 = vrot.lane.b32.xlu0 %v1873_v4, %s7280_s17  ;;  %1558 = vrot.lane.b32.xlu1 %v5543_v28, %s5274_s23 }
  0xa3   : > { %v969_v12 = vpop.permute.xlu1 %968  ;;  %v967_v13 = vpop.permute.xlu0 %966 }
  0xa4   : > { %1064 = vst.msk [vmem:[#allocation3 + $0x8] sm:$0xff] %vm1062_vm5, %v969_v12  ;;  %1063 = vst.msk [vmem:[#allocation3] sm:$0xff] %vm1062_vm5, %v967_v13  ;;  %v1686_v12 = vld [vmem:[#allocation2 + $0xb1] sm:$0xff] }
  0xa5   : > { %791 = vrot.lane.b32.xlu0 %v1873_v4, %s5269_s26  ;;  %982 = vrot.lane.b32.xlu1 %v5543_v28, %s5271_s28  ;;  %v5794_v8 = vld [vmem:[#allocation2 + $0x110] sm:$0xff] }
  0xa6   : > { %507 = vst.msk [vmem:[#allocation3 + $0xb8] sm:$0xff] %vm330_vm0, %v5794_v8  ;;  %v1878_v13 = vld [vmem:[#allocation2 + $0xaa] sm:$0xff] }
  0xa7   : > { %v1160_v15 = vpop.permute.xlu0 %1159  ;;  %v585_v16 = vpop.permute.xlu1 %584 }
  0xa8   : > { %1256 = vst.msk [vmem:[#allocation3] sm:$0xff] %vm1255_vm6, %v1160_v15 }
  0xa9   : > { %679 = vst.msk [vmem:[#allocation3 + $0x10] sm:$0xff] %vm676_vm3, %v585_v16  ;;  %1560 = vrot.lane.b32.xlu0 %v5545_v29, %s5274_s23  ;;  %1751 = vrot.lane.b32.xlu1 %v1681_v14, %s5275_s24 }
  0xab   : > { %v1162_v18 = vpop.permute.xlu0 %1161  ;;  %v1353_v19 = vpop.permute.xlu1 %1352 }
  0xac   : > { %1257 = vst.msk [vmem:[#allocation3 + $0x8] sm:$0xff] %vm1255_vm6, %v1162_v18 }
  0xad   : > { %1449 = vst.msk [vmem:[#allocation3] sm:$0xff] %vm1448_vm7, %v1353_v19  ;;  %984 = vrot.lane.b32.xlu0 %v5545_v29, %s5271_s28  ;;  %1175 = vrot.lane.b32.xlu1 %v1681_v14, %s7278_s29  ;;  %v404_v29 = vld [vmem:[%s5491_s25 + $0x90] sm:$0xff] }
  0xae   : > { %438 = vst.msk [vmem:[#allocation2 + $0xf1] sm:$0xff] %vm419_vm2, %v404_v29 }
  0xaf   : > { %v587_v22 = vpop.permute.xlu0 %586  ;;  %v778_v23 = vpop.permute.xlu1 %777 }
  0xb0   : > { %680 = vst.msk [vmem:[#allocation3 + $0x18] sm:$0xff] %vm676_vm3, %v587_v22  ;;  %v408_v22 = vld [vmem:[%s5491_s25 + $0xb0] sm:$0xff] }
  0xb1   : > { %872 = vst.msk [vmem:[#allocation3 + $0x10] sm:$0xff] %vm869_vm4, %v778_v23  ;;  %1753 = vrot.lane.b32.xlu0 %v1682_v20, %s5275_s24  ;;  %1944 = vrot.lane.b32.xlu1 %v1874_v21, %s5276_s21 }
  0xb2   : > { %442 = vst.msk [vmem:[#allocation2 + $0x121] sm:$0xff] %vm419_vm2, %v408_v22 }
  0xb3   : > { %v1355_v24 = vpop.permute.xlu0 %1354  ;;  %v1547_v25 = vpop.permute.xlu1 %1546 }
  0xb4   : > { %1450 = vst.msk [vmem:[#allocation3 + $0x8] sm:$0xff] %vm1448_vm7, %v1355_v24 }
  0xb5   : > { %1643 = vst.msk [vmem:[#allocation3] sm:$0xff] %vm1642_vm8, %v1547_v25  ;;  %600 = vrot.lane.b32.xlu0 %v1681_v14, %s7279_s14  ;;  %1177 = vrot.lane.b32.xlu1 %v1682_v20, %s7278_s29  ;;  %v5728_v34 = vld [vmem:[#allocation2 + $0xf0] sm:$0xff]  ;;  %v5744_v42 = vld [vmem:[#allocation2 + $0xf8] sm:$0xff] }
  0xb6   : > { %504 = vst.msk [vmem:[#allocation3 + $0xa0] sm:$0xff] %vm330_vm0, %v5728_v34  ;;  %505 = vst.msk [vmem:[#allocation3 + $0xa8] sm:$0xff] %vm330_vm0, %v5744_v42 }
  0xb7   : > { %v780_v27 = vpop.permute.xlu0 %779  ;;  %v971_v28 = vpop.permute.xlu1 %970 }
  0xb8   : > { %873 = vst.msk [vmem:[#allocation3 + $0x18] sm:$0xff] %vm869_vm4, %v780_v27 }
  0xb9   : > { %1065 = vst.msk [vmem:[#allocation3 + $0x10] sm:$0xff] %vm1062_vm5, %v971_v28  ;;  %1368 = vrot.lane.b32.xlu0 %v1874_v21, %s7280_s17  ;;  %1946 = vrot.lane.b32.xlu1 %v1875_v26, %s5276_s21  ;;  %v5828_v27 = vld [vmem:[#allocation2 + $0x120] sm:$0xff]  ;;  %v409_v28 = vld [vmem:[%s5491_s25 + $0xb8] sm:$0xff] }
  0xba   : > { %443 = vst.msk [vmem:[#allocation2 + $0x129] sm:$0xff] %vm419_vm2, %v409_v28 }
  0xbb   : > { %v1549_v30 = vpop.permute.xlu0 %1548  ;;  %v1740_v31 = vpop.permute.xlu1 %1739  ;;  %508 = vst.msk [vmem:[#allocation3 + $0xc0] sm:$0xff] %vm330_vm0, %v5828_v27 }
  0xbc   : > { %1644 = vst.msk [vmem:[#allocation3 + $0x8] sm:$0xff] %vm1642_vm8, %v1549_v30 }
  0xbd   : > { %1836 = vst.msk [vmem:[#allocation3] sm:$0xff] %vm1835_vm9, %v1740_v31  ;;  %602 = vrot.lane.b32.xlu0 %v1682_v20, %s7279_s14  ;;  %793 = vrot.lane.b32.xlu1 %v1874_v21, %s5269_s26  ;;  %v1687_v31 = vld [vmem:[#allocation2 + $0xc1] sm:$0xff] }
  0xbf   : > { %v973_v32 = vpop.permute.xlu0 %972  ;;  %v1164_v33 = vpop.permute.xlu1 %1163 }
  0xc0   : > { %1066 = vst.msk [vmem:[#allocation3 + $0x18] sm:$0xff] %vm1062_vm5, %v973_v32 }
  0xc1   : > { %1258 = vst.msk [vmem:[#allocation3 + $0x10] sm:$0xff] %vm1255_vm6, %v1164_v33  ;;  %1370 = vrot.lane.b32.xlu0 %v1875_v26, %s7280_s17  ;;  %1562 = vrot.lane.b32.xlu1 %v5566_v36, %s5274_s23  ;;  %v5844_v35 = vld [vmem:[#allocation2 + $0x128] sm:$0xff] }
  0xc2   : > { %509 = vst.msk [vmem:[#allocation3 + $0xc8] sm:$0xff] %vm330_vm0, %v5844_v35 }
  0xc3   : > { %v1742_v37 = vpop.permute.xlu0 %1741  ;;  %v1933_v38 = vpop.permute.xlu1 %1932 }
  0xc4   : > { %1837 = vst.msk [vmem:[#allocation3 + $0x8] sm:$0xff] %vm1835_vm9, %v1742_v37 }
  0xc5   : > { %2029 = vst.msk [vmem:[#allocation3] sm:$0xff] %vm2028_vm10, %v1933_v38  ;;  %795 = vrot.lane.b32.xlu0 %v1875_v26, %s5269_s26  ;;  %986 = vrot.lane.b32.xlu1 %v5566_v36, %s5271_s28 }
  0xc7   : > { %v589_v40 = vpop.permute.xlu0 %588  ;;  %v1166_v41 = vpop.permute.xlu1 %1165 }
  0xc8   : > { %681 = vst.msk [vmem:[#allocation3 + $0x20] sm:$0xff] %vm676_vm3, %v589_v40  ;;  %v1880_v40 = vld [vmem:[#allocation2 + $0xc2] sm:$0xff] }
  0xc9   : > { %1259 = vst.msk [vmem:[#allocation3 + $0x18] sm:$0xff] %vm1255_vm6, %v1166_v41  ;;  %1564 = vrot.lane.b32.xlu0 %v5585_v43, %s5274_s23  ;;  %1755 = vrot.lane.b32.xlu1 %v1683_v39, %s5275_s24 }
  0xcb   : > { %v1357_v44 = vpop.permute.xlu0 %1356  ;;  %v1935_v36 = vpop.permute.xlu1 %1934 }
  0xcc   : > { %v2061_v45 = vld [vmem:[#allocation3] sm:$0xff]  ;;  %1451 = vst.msk [vmem:[#allocation3 + $0x10] sm:$0xff] %vm1448_vm7, %v1357_v44 }
  0xcd   : > { %2030 = vst.msk [vmem:[#allocation3 + $0x8] sm:$0xff] %vm2028_vm10, %v1935_v36  ;;  %4978 = vmatprep.mubr.msk.f32.mxu0 %vm2109_vm11, %v2061_v45  ;;  %988 = vrot.lane.b32.xlu0 %v5585_v43, %s5271_s28  ;;  %v1877_v43 = vld [vmem:[#allocation2 + $0x9a] sm:$0xff] }
  0xce   : > { %1179 = vrot.lane.b32.xlu1 %v1683_v39, %s7278_s29 }
  0xcf   : > { %v591_v48 = vpop.permute.xlu0 %590  ;;  %v782_v49 = vpop.permute.xlu1 %781 }
  0xd0   : > { %682 = vst.msk [vmem:[#allocation3 + $0x28] sm:$0xff] %vm676_vm3, %v591_v48 }
  0xd1   : > { %874 = vst.msk [vmem:[#allocation3 + $0x20] sm:$0xff] %vm869_vm4, %v782_v49  ;;  %1757 = vrot.lane.b32.xlu0 %v1684_v46, %s5275_s24  ;;  %v410_v49 = vld [vmem:[%s5491_s25 + $0xc0] sm:$0xff] }
  0xd2   : > { %1948 = vrot.lane.b32.xlu1 %v1876_v47, %s5276_s21  ;;  %444 = vst.msk [vmem:[#allocation2 + $0x139] sm:$0xff] %vm419_vm2, %v410_v49 }
  0xd3   : > { %v1359_v50 = vpop.permute.xlu0 %1358  ;;  %v1551_v51 = vpop.permute.xlu1 %1550 }
  0xd4   : > { %v2062_v52 = vld [vmem:[#allocation3 + $0x8] sm:$0xff]  ;;  %1452 = vst.msk [vmem:[#allocation3 + $0x18] sm:$0xff] %vm1448_vm7, %v1359_v50 }
  0xd5   : > { %1645 = vst.msk [vmem:[#allocation3 + $0x10] sm:$0xff] %vm1642_vm8, %v1551_v51  ;;  %4979 = vmatmul.mubr.msk.f32.vlgmr.msra.gmra.mrb[0].mxu0 %vm2109_vm11, %v2062_v52  ;;  %604 = vrot.lane.b32.xlu0 %v1683_v39, %s7279_s14  ;;  %v1688_v39 = vld [vmem:[#allocation2 + $0xc9] sm:$0xff] }
  0xd6   : > { %1181 = vrot.lane.b32.xlu1 %v1684_v46, %s7278_s29 }
  0xd7   : > { %v784_v54 = vpop.permute.xlu0 %783  ;;  %v975_v55 = vpop.permute.xlu1 %974 }
  0xd8   : > { %875 = vst.msk [vmem:[#allocation3 + $0x28] sm:$0xff] %vm869_vm4, %v784_v54 }
  0xd9   : > { %1067 = vst.msk [vmem:[#allocation3 + $0x20] sm:$0xff] %vm1062_vm5, %v975_v55  ;;  %1372 = vrot.lane.b32.xlu0 %v1876_v47, %s7280_s17  ;;  %v5878_v54 = vld [vmem:[#allocation2 + $0x138] sm:$0xff]  ;;  %v411_v55 = vld [vmem:[%s5491_s25 + $0xc8] sm:$0xff] }
  0xda   : > { %1950 = vrot.lane.b32.xlu1 %v1877_v43, %s5276_s21  ;;  %510 = vst.msk [vmem:[#allocation3 + $0xd0] sm:$0xff] %vm330_vm0, %v5878_v54 }
  0xdb   : > { %v1553_v58 = vpop.permute.xlu0 %1552  ;;  %v1744_v59 = vpop.permute.xlu1 %1743  ;;  %445 = vst.msk [vmem:[#allocation2 + $0x141] sm:$0xff] %vm419_vm2, %v411_v55 }
  0xdc   : > { %1646 = vst.msk [vmem:[#allocation3 + $0x18] sm:$0xff] %vm1642_vm8, %v1553_v58 }
  0xdd   : > { %1838 = vst.msk [vmem:[#allocation3 + $0x10] sm:$0xff] %vm1835_vm9, %v1744_v59  ;;  %606 = vrot.lane.b32.xlu0 %v1684_v46, %s7279_s14  ;;  %v1689_v59 = vld [vmem:[#allocation2 + $0xd9] sm:$0xff] }
  0xde   : > { %797 = vrot.lane.b32.xlu1 %v1876_v47, %s5269_s26 }
  0xdf   : > { %v977_v60 = vpop.permute.xlu0 %976  ;;  %v1168_v62 = vpop.permute.xlu1 %1167 }
  0xe0   : > { %1068 = vst.msk [vmem:[#allocation3 + $0x28] sm:$0xff] %vm1062_vm5, %v977_v60 }
  0xe1   : > { %1260 = vst.msk [vmem:[#allocation3 + $0x20] sm:$0xff] %vm1255_vm6, %v1168_v62  ;;  %1374 = vrot.lane.b32.xlu0 %v1877_v43, %s7280_s17 }
  0xe2   : > { %1566 = vrot.lane.b32.xlu1 %v5612_v53, %s5274_s23  ;;  %v5897_v2 = vld [vmem:[#allocation2 + $0x140] sm:$0xff] }
  0xe3   : > { %v1746_v3 = vpop.permute.xlu0 %1745  ;;  %v1937_v4 = vpop.permute.xlu1 %1936  ;;  %511 = vst.msk [vmem:[#allocation3 + $0xd8] sm:$0xff] %vm330_vm0, %v5897_v2 }
  0xe4   : > { %1839 = vst.msk [vmem:[#allocation3 + $0x18] sm:$0xff] %vm1835_vm9, %v1746_v3 }
  0xe5   : > { %2031 = vst.msk [vmem:[#allocation3 + $0x10] sm:$0xff] %vm2028_vm10, %v1937_v4  ;;  %799 = vrot.lane.b32.xlu0 %v1877_v43, %s5269_s26 }
  0xe6   : > { %990 = vrot.lane.b32.xlu1 %v5612_v53, %s5271_s28 }
  0xe7   : > { %v593_v6 = vpop.permute.xlu0 %592  ;;  %v1170_v7 = vpop.permute.xlu1 %1169 }
  0xe8   : > { %683 = vst.msk [vmem:[#allocation3 + $0x30] sm:$0xff] %vm676_vm3, %v593_v6  ;;  %v1882_v6 = vld [vmem:[#allocation2 + $0xda] sm:$0xff] }
  0xe9   : > { %1261 = vst.msk [vmem:[#allocation3 + $0x28] sm:$0xff] %vm1255_vm6, %v1170_v7  ;;  %1568 = vrot.lane.b32.xlu0 %v5624_v56, %s5274_s23 }
  0xea   : > { %1759 = vrot.lane.b32.xlu1 %v1685_v5, %s5275_s24 }
  0xeb   : > { %v1361_v9 = vpop.permute.xlu0 %1360  ;;  %v1939_v11 = vpop.permute.xlu1 %1938 }
  0xec   : > { %v2063_v53 = vld [vmem:[#allocation3 + $0x10] sm:$0xff]  ;;  %1453 = vst.msk [vmem:[#allocation3 + $0x20] sm:$0xff] %vm1448_vm7, %v1361_v9 }
  0xed   : > { %2032 = vst.msk [vmem:[#allocation3 + $0x18] sm:$0xff] %vm2028_vm10, %v1939_v11  ;;  %4981 = vmatprep.mubr.msk.f32.mxu0 %vm2109_vm11, %v2063_v53  ;;  %992 = vrot.lane.b32.xlu0 %v5624_v56, %s5271_s28  ;;  %v1879_v56 = vld [vmem:[#allocation2 + $0xb2] sm:$0xff] }
  0xee   : > { %1183 = vrot.lane.b32.xlu1 %v1685_v5, %s7278_s29 }
  0xef   : > { %v595_v14 = vpop.permute.xlu0 %594  ;;  %v786_v15 = vpop.permute.xlu1 %785 }
  0xf0   : > { %684 = vst.msk [vmem:[#allocation3 + $0x38] sm:$0xff] %vm676_vm3, %v595_v14 }
  0xf1   : > { %876 = vst.msk [vmem:[#allocation3 + $0x30] sm:$0xff] %vm869_vm4, %v786_v15  ;;  %1761 = vrot.lane.b32.xlu0 %v1686_v12, %s5275_s24  ;;  %v412_v15 = vld [vmem:[%s5491_s25 + $0xd0] sm:$0xff] }
  0xf2   : > { %1952 = vrot.lane.b32.xlu1 %v1878_v13, %s5276_s21  ;;  %446 = vst.msk [vmem:[#allocation2 + $0x151] sm:$0xff] %vm419_vm2, %v412_v15 }
  0xf3   : > { %v1363_v16 = vpop.permute.xlu0 %1362  ;;  %v1555_v18 = vpop.permute.xlu1 %1554 }
  0xf4   : > { %v2064_v19 = vld [vmem:[#allocation3 + $0x18] sm:$0xff]  ;;  %1454 = vst.msk [vmem:[#allocation3 + $0x28] sm:$0xff] %vm1448_vm7, %v1363_v16 }
  0xf5   : > { %1647 = vst.msk [vmem:[#allocation3 + $0x20] sm:$0xff] %vm1642_vm8, %v1555_v18  ;;  %4982 = vmatmul.mubr.msk.f32.gmra.mrb[2].mxu0 %vm2109_vm11, %v2064_v19  ;;  %608 = vrot.lane.b32.xlu0 %v1685_v5, %s7279_s14  ;;  %v1690_v5 = vld [vmem:[#allocation2 + $0xe1] sm:$0xff] }
  0xf6   : > { %1185 = vrot.lane.b32.xlu1 %v1686_v12, %s7278_s29 }
  0xf7   : > { %v788_v20 = vpop.permute.xlu0 %787  ;;  %v979_v21 = vpop.permute.xlu1 %978 }
  0xf8   : > { %877 = vst.msk [vmem:[#allocation3 + $0x38] sm:$0xff] %vm869_vm4, %v788_v20 }
  0xf9   : > { %1069 = vst.msk [vmem:[#allocation3 + $0x30] sm:$0xff] %vm1062_vm5, %v979_v21  ;;  %1376 = vrot.lane.b32.xlu0 %v1878_v13, %s7280_s17  ;;  %v5931_v20 = vld [vmem:[#allocation2 + $0x150] sm:$0xff]  ;;  %v413_v21 = vld [vmem:[%s5491_s25 + $0xd8] sm:$0xff] }
  0xfa   : > { %1954 = vrot.lane.b32.xlu1 %v1879_v56, %s5276_s21  ;;  %447 = vst.msk [vmem:[#allocation2 + $0x159] sm:$0xff] %vm419_vm2, %v413_v21 }
  0xfb   : > { %v1557_v23 = vpop.permute.xlu0 %1556  ;;  %v1748_v24 = vpop.permute.xlu1 %1747  ;;  %512 = vst.msk [vmem:[#allocation3 + $0xe0] sm:$0xff] %vm330_vm0, %v5931_v20 }
  0xfc   : > { %1648 = vst.msk [vmem:[#allocation3 + $0x28] sm:$0xff] %vm1642_vm8, %v1557_v23 }
  0xfd   : > { %1840 = vst.msk [vmem:[#allocation3 + $0x20] sm:$0xff] %vm1835_vm9, %v1748_v24  ;;  %610 = vrot.lane.b32.xlu0 %v1686_v12, %s7279_s14  ;;  %v1691_v24 = vld [vmem:[#allocation2 + $0xf1] sm:$0xff] }
  0xfe   : > { %801 = vrot.lane.b32.xlu1 %v1878_v13, %s5269_s26 }
  0xff   : > { %v981_v25 = vpop.permute.xlu0 %980  ;;  %v1172_v26 = vpop.permute.xlu1 %1171 }
 0x100   : > { %1070 = vst.msk [vmem:[#allocation3 + $0x38] sm:$0xff] %vm1062_vm5, %v981_v25 }
 0x101   : > { %1262 = vst.msk [vmem:[#allocation3 + $0x30] sm:$0xff] %vm1255_vm6, %v1172_v26  ;;  %1378 = vrot.lane.b32.xlu0 %v1879_v56, %s7280_s17  ;;  %v5947_v28 = vld [vmem:[#allocation2 + $0x158] sm:$0xff] }
 0x102   : > { %1570 = vrot.lane.b32.xlu1 %v5644_v61, %s5274_s23  ;;  %513 = vst.msk [vmem:[#allocation3 + $0xe8] sm:$0xff] %vm330_vm0, %v5947_v28 }
 0x103   : > { %v1750_v29 = vpop.permute.xlu0 %1749  ;;  %v1941_v30 = vpop.permute.xlu1 %1940 }
 0x104   : > { %1841 = vst.msk [vmem:[#allocation3 + $0x28] sm:$0xff] %vm1835_vm9, %v1750_v29 }
 0x105   : > { %2033 = vst.msk [vmem:[#allocation3 + $0x20] sm:$0xff] %vm2028_vm10, %v1941_v30  ;;  %803 = vrot.lane.b32.xlu0 %v1879_v56, %s5269_s26 }
 0x106   : > { %994 = vrot.lane.b32.xlu1 %v5644_v61, %s5271_s28 }
 0x107   : > { %v597_v32 = vpop.permute.xlu0 %596  ;;  %v1174_v33 = vpop.permute.xlu1 %1173 }
 0x108   : > { %685 = vst.msk [vmem:[#allocation3 + $0x40] sm:$0xff] %vm676_vm3, %v597_v32  ;;  %v1884_v32 = vld [vmem:[#allocation2 + $0xf2] sm:$0xff] }
 0x109   : > { %1263 = vst.msk [vmem:[#allocation3 + $0x38] sm:$0xff] %vm1255_vm6, %v1174_v33  ;;  %1572 = vrot.lane.b32.xlu0 %v5656_v1, %s5274_s23 }
 0x10a   : > { %1763 = vrot.lane.b32.xlu1 %v1687_v31, %s5275_s24 }
 0x10b   : > { %v1365_v37 = vpop.permute.xlu0 %1364  ;;  %v1943_v38 = vpop.permute.xlu1 %1942 }
 0x10c   : > { %v2065_v61 = vld [vmem:[#allocation3 + $0x20] sm:$0xff]  ;;  %1455 = vst.msk [vmem:[#allocation3 + $0x30] sm:$0xff] %vm1448_vm7, %v1365_v37 }
 0x10d   : > { %2034 = vst.msk [vmem:[#allocation3 + $0x28] sm:$0xff] %vm2028_vm10, %v1943_v38  ;;  %4984 = vmatprep.mubr.msk.f32.mxu0 %vm2109_vm11, %v2065_v61  ;;  %996 = vrot.lane.b32.xlu0 %v5656_v1, %s5271_s28  ;;  %v1881_v1 = vld [vmem:[#allocation2 + $0xca] sm:$0xff] }
 0x10e   : > { %1187 = vrot.lane.b32.xlu1 %v1687_v31, %s7278_s29 }
 0x10f   : > { %v599_v41 = vpop.permute.xlu0 %598  ;;  %v790_v44 = vpop.permute.xlu1 %789 }
 0x110   : > { %686 = vst.msk [vmem:[#allocation3 + $0x48] sm:$0xff] %vm676_vm3, %v599_v41 }
 0x111   : > { %878 = vst.msk [vmem:[#allocation3 + $0x40] sm:$0xff] %vm869_vm4, %v790_v44  ;;  %1765 = vrot.lane.b32.xlu0 %v1688_v39, %s5275_s24  ;;  %v414_v44 = vld [vmem:[%s5491_s25 + $0xe0] sm:$0xff] }
 0x112   : > { %1956 = vrot.lane.b32.xlu1 %v1880_v40, %s5276_s21  ;;  %448 = vst.msk [vmem:[#allocation2 + $0x169] sm:$0xff] %vm419_vm2, %v414_v44 }
 0x113   : > { %v1367_v36 = vpop.permute.xlu0 %1366  ;;  %v1559_v45 = vpop.permute.xlu1 %1558 }
 0x114   : > { %v2066_v46 = vld [vmem:[#allocation3 + $0x28] sm:$0xff]  ;;  %1456 = vst.msk [vmem:[#allocation3 + $0x38] sm:$0xff] %vm1448_vm7, %v1367_v36 }
 0x115   : > { %1649 = vst.msk [vmem:[#allocation3 + $0x30] sm:$0xff] %vm1642_vm8, %v1559_v45  ;;  %4985 = vmatmul.mubr.msk.f32.gmra.mrb[4].mxu0 %vm2109_vm11, %v2066_v46  ;;  %612 = vrot.lane.b32.xlu0 %v1687_v31, %s7279_s14  ;;  %v1692_v31 = vld [vmem:[#allocation2 + $0xf9] sm:$0xff] }
 0x116   : > { %1189 = vrot.lane.b32.xlu1 %v1688_v39, %s7278_s29 }
 0x117   : > { %v792_v47 = vpop.permute.xlu0 %791  ;;  %v983_v48 = vpop.permute.xlu1 %982 }
 0x118   : > { %879 = vst.msk [vmem:[#allocation3 + $0x48] sm:$0xff] %vm869_vm4, %v792_v47 }
 0x119   : > { %1071 = vst.msk [vmem:[#allocation3 + $0x40] sm:$0xff] %vm1062_vm5, %v983_v48  ;;  %1380 = vrot.lane.b32.xlu0 %v1880_v40, %s7280_s17  ;;  %v5981_v47 = vld [vmem:[#allocation2 + $0x168] sm:$0xff] }
 0x11a   : > { %1958 = vrot.lane.b32.xlu1 %v1881_v1, %s5276_s21  ;;  %v415_v48 = vld [vmem:[%s5491_s25 + $0xe8] sm:$0xff]  ;;  %514 = vst.msk [vmem:[#allocation3 + $0xf0] sm:$0xff] %vm330_vm0, %v5981_v47 }
 0x11b   : > { %v1561_v50 = vpop.permute.xlu0 %1560  ;;  %v1752_v51 = vpop.permute.xlu1 %1751  ;;  %449 = vst.msk [vmem:[#allocation2 + $0x171] sm:$0xff] %vm419_vm2, %v415_v48 }
 0x11c   : > { %1650 = vst.msk [vmem:[#allocation3 + $0x38] sm:$0xff] %vm1642_vm8, %v1561_v50 }
 0x11d   : > { %1842 = vst.msk [vmem:[#allocation3 + $0x30] sm:$0xff] %vm1835_vm9, %v1752_v51  ;;  %614 = vrot.lane.b32.xlu0 %v1688_v39, %s7279_s14  ;;  %v1693_v51 = vld [vmem:[#allocation2 + $0x109] sm:$0xff] }
 0x11e   : > { %805 = vrot.lane.b32.xlu1 %v1880_v40, %s5269_s26 }
 0x11f   : > { %v985_v52 = vpop.permute.xlu0 %984  ;;  %v1176_v43 = vpop.permute.xlu1 %1175 }
 0x120   : > { %1072 = vst.msk [vmem:[#allocation3 + $0x48] sm:$0xff] %vm1062_vm5, %v985_v52 }
 0x121   : > { %1264 = vst.msk [vmem:[#allocation3 + $0x40] sm:$0xff] %vm1255_vm6, %v1176_v43  ;;  %1382 = vrot.lane.b32.xlu0 %v1881_v1, %s7280_s17 }
 0x122   : > { %1574 = vrot.lane.b32.xlu1 %v5679_v10, %s5274_s23  ;;  %v5997_v55 = vld [vmem:[#allocation2 + $0x170] sm:$0xff] }
 0x123   : > { %v1754_v57 = vpop.permute.xlu0 %1753  ;;  %v1945_v58 = vpop.permute.xlu1 %1944  ;;  %515 = vst.msk [vmem:[#allocation3 + $0xf8] sm:$0xff] %vm330_vm0, %v5997_v55 }
 0x124   : > { %1843 = vst.msk [vmem:[#allocation3 + $0x38] sm:$0xff] %vm1835_vm9, %v1754_v57 }
 0x125   : > { %2035 = vst.msk [vmem:[#allocation3 + $0x30] sm:$0xff] %vm2028_vm10, %v1945_v58  ;;  %807 = vrot.lane.b32.xlu0 %v1881_v1, %s5269_s26 }
 0x126   : > { %998 = vrot.lane.b32.xlu1 %v5679_v10, %s5271_s28 }
 0x127   : > { %v601_v60 = vpop.permute.xlu0 %600  ;;  %v1178_v62 = vpop.permute.xlu1 %1177 }
 0x128   : > { %687 = vst.msk [vmem:[#allocation3 + $0x50] sm:$0xff] %vm676_vm3, %v601_v60  ;;  %v1886_v60 = vld [vmem:[#allocation2 + $0x10a] sm:$0xff] }
 0x129   : > { %1265 = vst.msk [vmem:[#allocation3 + $0x48] sm:$0xff] %vm1255_vm6, %v1178_v62  ;;  %1576 = vrot.lane.b32.xlu0 %v5696_v17, %s5274_s23 }
 0x12a   : > { %1767 = vrot.lane.b32.xlu1 %v1689_v59, %s5275_s24 }
 0x12b   : > { %v1369_v3 = vpop.permute.xlu0 %1368  ;;  %v1947_v4 = vpop.permute.xlu1 %1946 }
 0x12c   : > { %v2067_v10 = vld [vmem:[#allocation3 + $0x30] sm:$0xff]  ;;  %1457 = vst.msk [vmem:[#allocation3 + $0x40] sm:$0xff] %vm1448_vm7, %v1369_v3 }
 0x12d   : > { %2036 = vst.msk [vmem:[#allocation3 + $0x38] sm:$0xff] %vm2028_vm10, %v1947_v4  ;;  %4987 = vmatprep.mubr.msk.f32.mxu0 %vm2109_vm11, %v2067_v10  ;;  %1000 = vrot.lane.b32.xlu0 %v5696_v17, %s5271_s28  ;;  %v1883_v17 = vld [vmem:[#allocation2 + $0xe2] sm:$0xff] }
 0x12e   : > { %1191 = vrot.lane.b32.xlu1 %v1689_v59, %s7278_s29 }
 0x12f   : > { %v603_v7 = vpop.permute.xlu0 %602  ;;  %v794_v9 = vpop.permute.xlu1 %793 }
 0x130   : > { %688 = vst.msk [vmem:[#allocation3 + $0x58] sm:$0xff] %vm676_vm3, %v603_v7 }
 0x131   : > { %880 = vst.msk [vmem:[#allocation3 + $0x50] sm:$0xff] %vm869_vm4, %v794_v9  ;;  %1769 = vrot.lane.b32.xlu0 %v1690_v5, %s5275_s24  ;;  %v416_v9 = vld [vmem:[%s5491_s25 + $0xf0] sm:$0xff] }
 0x132   : > { %1960 = vrot.lane.b32.xlu1 %v1882_v6, %s5276_s21  ;;  %450 = vst.msk [vmem:[#allocation2 + $0x181] sm:$0xff] %vm419_vm2, %v416_v9 }
 0x133   : > { %v1371_v11 = vpop.permute.xlu0 %1370  ;;  %v1563_v53 = vpop.permute.xlu1 %1562 }
 0x134   : > { %v2068_v12 = vld [vmem:[#allocation3 + $0x38] sm:$0xff]  ;;  %1458 = vst.msk [vmem:[#allocation3 + $0x48] sm:$0xff] %vm1448_vm7, %v1371_v11 }
 0x135   : > { %1651 = vst.msk [vmem:[#allocation3 + $0x40] sm:$0xff] %vm1642_vm8, %v1563_v53  ;;  %4988 = vmatmul.mubr.msk.f32.gmra.mrb[6].mxu0 %vm2109_vm11, %v2068_v12  ;;  %616 = vrot.lane.b32.xlu0 %v1689_v59, %s7279_s14  ;;  %v1694_v59 = vld [vmem:[#allocation2 + $0x111] sm:$0xff] }
 0x136   : > { %1193 = vrot.lane.b32.xlu1 %v1690_v5, %s7278_s29 }
 0x137   : > { %v796_v13 = vpop.permute.xlu0 %795  ;;  %v987_v14 = vpop.permute.xlu1 %986 }
 0x138   : > { %881 = vst.msk [vmem:[#allocation3 + $0x58] sm:$0xff] %vm869_vm4, %v796_v13  ;;  %v417_v13 = vld [vmem:[%s5491_s25 + $0xf8] sm:$0xff] }
 0x139   : > { %1073 = vst.msk [vmem:[#allocation3 + $0x50] sm:$0xff] %vm1062_vm5, %v987_v14  ;;  %1384 = vrot.lane.b32.xlu0 %v1882_v6, %s7280_s17 }
 0x13a   : > { %1962 = vrot.lane.b32.xlu1 %v1883_v17, %s5276_s21  ;;  %451 = vst.msk [vmem:[#allocation2 + $0x189] sm:$0xff] %vm419_vm2, %v417_v13 }
 0x13b   : > { %v1565_v16 = vpop.permute.xlu0 %1564  ;;  %v1756_v18 = vpop.permute.xlu1 %1755 }
 0x13c   : > { %1652 = vst.msk [vmem:[#allocation3 + $0x48] sm:$0xff] %vm1642_vm8, %v1565_v16  ;;  %v1695_v16 = vld [vmem:[#allocation2 + $0x121] sm:$0xff] }
 0x13d   : > { %1844 = vst.msk [vmem:[#allocation3 + $0x40] sm:$0xff] %vm1835_vm9, %v1756_v18  ;;  %618 = vrot.lane.b32.xlu0 %v1690_v5, %s7279_s14 }
 0x13e   : > { %809 = vrot.lane.b32.xlu1 %v1882_v6, %s5269_s26 }
 0x13f   : > { %v989_v19 = vpop.permute.xlu0 %988 }
 0x140   : > { %v1180_v56 = vpop.permute.xlu1 %1179  ;;  %1074 = vst.msk [vmem:[#allocation3 + $0x58] sm:$0xff] %vm1062_vm5, %v989_v19 }
 0x141   : > { %1266 = vst.msk [vmem:[#allocation3 + $0x50] sm:$0xff] %vm1255_vm6, %v1180_v56  ;;  %1386 = vrot.lane.b32.xlu0 %v1883_v17, %s7280_s17 }
 0x142   : > { %1578 = vrot.lane.b32.xlu1 %v5728_v34, %s5274_s23 }
 0x143   : > { %v1758_v22 = vpop.permute.xlu0 %1757 }
 0x144   : > { %v1949_v23 = vpop.permute.xlu1 %1948  ;;  %1845 = vst.msk [vmem:[#allocation3 + $0x48] sm:$0xff] %vm1835_vm9, %v1758_v22 }
 0x145   : > { %2037 = vst.msk [vmem:[#allocation3 + $0x40] sm:$0xff] %vm2028_vm10, %v1949_v23  ;;  %811 = vrot.lane.b32.xlu0 %v1883_v17, %s5269_s26  ;;  %v1888_v23 = vld [vmem:[#allocation2 + $0x122] sm:$0xff] }
 0x146   : > { %1002 = vrot.lane.b32.xlu1 %v5728_v34, %s5271_s28 }
 0x147   : > { %v605_v25 = vpop.permute.xlu0 %604 }
 0x148   : > { %v1182_v26 = vpop.permute.xlu1 %1181  ;;  %689 = vst.msk [vmem:[#allocation3 + $0x60] sm:$0xff] %vm676_vm3, %v605_v25 }
 0x149   : > { %1267 = vst.msk [vmem:[#allocation3 + $0x58] sm:$0xff] %vm1255_vm6, %v1182_v26  ;;  %1580 = vrot.lane.b32.xlu0 %v5744_v42, %s5274_s23 }
 0x14a   : > { %1771 = vrot.lane.b32.xlu1 %v1691_v24, %s5275_s24 }
 0x14b   : > { %v1373_v29 = vpop.permute.xlu0 %1372 }
 0x14c   : > { %v1951_v30 = vpop.permute.xlu1 %1950  ;;  %v2069_v34 = vld [vmem:[#allocation3 + $0x40] sm:$0xff]  ;;  %1459 = vst.msk [vmem:[#allocation3 + $0x50] sm:$0xff] %vm1448_vm7, %v1373_v29 }
 0x14d   : > { %2038 = vst.msk [vmem:[#allocation3 + $0x48] sm:$0xff] %vm2028_vm10, %v1951_v30  ;;  %4990 = vmatprep.mubr.msk.f32.mxu0 %vm2109_vm11, %v2069_v34  ;;  %1004 = vrot.lane.b32.xlu0 %v5744_v42, %s5271_s28  ;;  %v1885_v42 = vld [vmem:[#allocation2 + $0xfa] sm:$0xff] }
 0x14e   : > { %1195 = vrot.lane.b32.xlu1 %v1691_v24, %s7278_s29 }
 0x14f   : > { %v607_v33 = vpop.permute.xlu0 %606 }
 0x150   : > { %v798_v37 = vpop.permute.xlu1 %797  ;;  %690 = vst.msk [vmem:[#allocation3 + $0x68] sm:$0xff] %vm676_vm3, %v607_v33 }
 0x151   : > { %882 = vst.msk [vmem:[#allocation3 + $0x60] sm:$0xff] %vm869_vm4, %v798_v37  ;;  %1773 = vrot.lane.b32.xlu0 %v1692_v31, %s5275_s24 }
 0x152   : > { %1964 = vrot.lane.b32.xlu1 %v1884_v32, %s5276_s21 }
 0x153   : > { %v1375_v38 = vpop.permute.xlu0 %1374 }
 0x154   : > { %v1567_v61 = vpop.permute.xlu1 %1566  ;;  %v2070_v39 = vld [vmem:[#allocation3 + $0x48] sm:$0xff]  ;;  %1460 = vst.msk [vmem:[#allocation3 + $0x58] sm:$0xff] %vm1448_vm7, %v1375_v38 }
 0x155   : > { %1653 = vst.msk [vmem:[#allocation3 + $0x50] sm:$0xff] %vm1642_vm8, %v1567_v61  ;;  %4991 = vmatmul.mubr.msk.f32.gmra.mrb[8].mxu0 %vm2109_vm11, %v2070_v39  ;;  %620 = vrot.lane.b32.xlu0 %v1691_v24, %s7279_s14 }
 0x156   : > { %1197 = vrot.lane.b32.xlu1 %v1692_v31, %s7278_s29 }
 0x157   : > { %v800_v40 = vpop.permute.xlu0 %799 }
 0x158   : > { %v991_v41 = vpop.permute.xlu1 %990  ;;  %883 = vst.msk [vmem:[#allocation3 + $0x68] sm:$0xff] %vm869_vm4, %v800_v40  ;;  %v1697_v40 = vld [vmem:[#allocation2 + $0x139] sm:$0xff] }
 0x159   : > { %1075 = vst.msk [vmem:[#allocation3 + $0x60] sm:$0xff] %vm1062_vm5, %v991_v41  ;;  %1388 = vrot.lane.b32.xlu0 %v1884_v32, %s7280_s17 }
 0x15a   : > { %1966 = vrot.lane.b32.xlu1 %v1885_v42, %s5276_s21 }
 0x15b   : > { %v1569_v36 = vpop.permute.xlu0 %1568 }
 0x15c   : > { %v1760_v45 = vpop.permute.xlu1 %1759  ;;  %1654 = vst.msk [vmem:[#allocation3 + $0x58] sm:$0xff] %vm1642_vm8, %v1569_v36 }
 0x15d   : > { %1846 = vst.msk [vmem:[#allocation3 + $0x50] sm:$0xff] %vm1835_vm9, %v1760_v45  ;;  %622 = vrot.lane.b32.xlu0 %v1692_v31, %s7279_s14 }
 0x15e   : > { %813 = vrot.lane.b32.xlu1 %v1884_v32, %s5269_s26 }
 0x15f   : > { %v993_v46 = vpop.permute.xlu0 %992 }
 0x160   : > { %v1184_v1 = vpop.permute.xlu1 %1183  ;;  %1076 = vst.msk [vmem:[#allocation3 + $0x68] sm:$0xff] %vm1062_vm5, %v993_v46 }
 0x161   : > { %1268 = vst.msk [vmem:[#allocation3 + $0x60] sm:$0xff] %vm1255_vm6, %v1184_v1  ;;  %1390 = vrot.lane.b32.xlu0 %v1885_v42, %s7280_s17 }
 0x162   : > { %1582 = vrot.lane.b32.xlu1 %v5778_v63, %s5274_s23 }
 0x163   : > { %v1762_v49 = vpop.permute.xlu0 %1761 }
 0x164   : > { %v1953_v50 = vpop.permute.xlu1 %1952  ;;  %1847 = vst.msk [vmem:[#allocation3 + $0x58] sm:$0xff] %vm1835_vm9, %v1762_v49 }
 0x165   : > { %2039 = vst.msk [vmem:[#allocation3 + $0x50] sm:$0xff] %vm2028_vm10, %v1953_v50  ;;  %815 = vrot.lane.b32.xlu0 %v1885_v42, %s5269_s26  ;;  %v6079_v42 = vld [vmem:[%s7262_s2] ss:$0 sm:$0xff] }
 0x166   : > { %1006 = vrot.lane.b32.xlu1 %v5778_v63, %s5271_s28 }
 0x167   : > { %v609_v52 = vpop.permute.xlu0 %608 }
 0x168   : > { %v1186_v43 = vpop.permute.xlu1 %1185  ;;  %691 = vst.msk [vmem:[#allocation3 + $0x70] sm:$0xff] %vm676_vm3, %v609_v52  ;;  %v1698_v52 = vld [vmem:[#allocation2 + $0x141] sm:$0xff] }
 0x169   : > { %1269 = vst.msk [vmem:[#allocation3 + $0x68] sm:$0xff] %vm1255_vm6, %v1186_v43  ;;  %1584 = vrot.lane.b32.xlu0 %v5794_v8, %s5274_s23  ;;  %v1890_v43 = vld [vmem:[#allocation2 + $0x13a] sm:$0xff] }
 0x16a   : > { %1775 = vrot.lane.b32.xlu1 %v1693_v51, %s5275_s24 }
 0x16b   : > { %v1377_v57 = vpop.permute.xlu0 %1376 }
 0x16c   : > { %v1955_v58 = vpop.permute.xlu1 %1954  ;;  %v2071_v63 = vld [vmem:[#allocation3 + $0x50] sm:$0xff]  ;;  %1461 = vst.msk [vmem:[#allocation3 + $0x60] sm:$0xff] %vm1448_vm7, %v1377_v57 }
 0x16d   : > { %2040 = vst.msk [vmem:[#allocation3 + $0x58] sm:$0xff] %vm2028_vm10, %v1955_v58  ;;  %4993 = vmatprep.mubr.msk.f32.mxu0 %vm2109_vm11, %v2071_v63  ;;  %1008 = vrot.lane.b32.xlu0 %v5794_v8, %s5271_s28  ;;  %v1887_v8 = vld [vmem:[#allocation2 + $0x112] sm:$0xff] }
 0x16e   : > { %1199 = vrot.lane.b32.xlu1 %v1693_v51, %s7278_s29 }
 0x16f   : > { %v611_v62 = vpop.permute.xlu0 %610 }
 0x170   : > { %v802_v3 = vpop.permute.xlu1 %801  ;;  %692 = vst.msk [vmem:[#allocation3 + $0x78] sm:$0xff] %vm676_vm3, %v611_v62 }
 0x171   : > { %884 = vst.msk [vmem:[#allocation3 + $0x70] sm:$0xff] %vm869_vm4, %v802_v3  ;;  %1777 = vrot.lane.b32.xlu0 %v1694_v59, %s5275_s24 }
 0x172   : > { %1968 = vrot.lane.b32.xlu1 %v1886_v60, %s5276_s21 }
 0x173   : > { %v1379_v4 = vpop.permute.xlu0 %1378 }
 0x174   : > { %v1571_v10 = vpop.permute.xlu1 %1570  ;;  %v2072_v5 = vld [vmem:[#allocation3 + $0x58] sm:$0xff]  ;;  %1462 = vst.msk [vmem:[#allocation3 + $0x68] sm:$0xff] %vm1448_vm7, %v1379_v4 }
 0x175   : > { %1655 = vst.msk [vmem:[#allocation3 + $0x60] sm:$0xff] %vm1642_vm8, %v1571_v10  ;;  %4994 = vmatmul.mubr.msk.f32.gmra.mrb[10].mxu0 %vm2109_vm11, %v2072_v5  ;;  %624 = vrot.lane.b32.xlu0 %v1693_v51, %s7279_s14  ;;  %v1891_v4 = vld [vmem:[#allocation2 + $0x142] sm:$0xff] }
 0x176   : > { %1201 = vrot.lane.b32.xlu1 %v1694_v59, %s7278_s29 }
 0x177   : > { %v804_v6 = vpop.permute.xlu0 %803 }
 0x178   : > { %v995_v7 = vpop.permute.xlu1 %994  ;;  %885 = vst.msk [vmem:[#allocation3 + $0x78] sm:$0xff] %vm869_vm4, %v804_v6 }
 0x179   : > { %1077 = vst.msk [vmem:[#allocation3 + $0x70] sm:$0xff] %vm1062_vm5, %v995_v7  ;;  %1392 = vrot.lane.b32.xlu0 %v1886_v60, %s7280_s17 }
 0x17a   : > { %1970 = vrot.lane.b32.xlu1 %v1887_v8, %s5276_s21 }
 0x17b   : > { %v1573_v11 = vpop.permute.xlu0 %1572 }
 0x17c   : > { %v1764_v53 = vpop.permute.xlu1 %1763  ;;  %1656 = vst.msk [vmem:[#allocation3 + $0x68] sm:$0xff] %vm1642_vm8, %v1573_v11 }
 0x17d   : > { %1848 = vst.msk [vmem:[#allocation3 + $0x60] sm:$0xff] %vm1835_vm9, %v1764_v53  ;;  %626 = vrot.lane.b32.xlu0 %v1694_v59, %s7279_s14 }
 0x17e   : > { %817 = vrot.lane.b32.xlu1 %v1886_v60, %s5269_s26 }
 0x17f   : > { %v997_v12 = vpop.permute.xlu0 %996 }
 0x180   : > { %v1188_v17 = vpop.permute.xlu1 %1187  ;;  %1078 = vst.msk [vmem:[#allocation3 + $0x78] sm:$0xff] %vm1062_vm5, %v997_v12 }
 0x181   : > { %1270 = vst.msk [vmem:[#allocation3 + $0x70] sm:$0xff] %vm1255_vm6, %v1188_v17  ;;  %1394 = vrot.lane.b32.xlu0 %v1887_v8, %s7280_s17  ;;  %v1699_v17 = vld [vmem:[#allocation2 + $0x151] sm:$0xff] }
 0x182   : > { %1586 = vrot.lane.b32.xlu1 %v5828_v27, %s5274_s23 }
 0x183   : > { %v1766_v14 = vpop.permute.xlu0 %1765 }
 0x184   : > { %v1957_v15 = vpop.permute.xlu1 %1956  ;;  %1849 = vst.msk [vmem:[#allocation3 + $0x68] sm:$0xff] %vm1835_vm9, %v1766_v14 }
 0x185   : > { %2041 = vst.msk [vmem:[#allocation3 + $0x60] sm:$0xff] %vm2028_vm10, %v1957_v15  ;;  %819 = vrot.lane.b32.xlu0 %v1887_v8, %s5269_s26 }
 0x186   : > { %1010 = vrot.lane.b32.xlu1 %v5828_v27, %s5271_s28  ;;  %v1696_v27 = vld [vmem:[#allocation2 + $0x129] sm:$0xff] }
 0x187   : > { %v613_v18 = vpop.permute.xlu0 %612 }
 0x188   : > { %v1190_v19 = vpop.permute.xlu1 %1189  ;;  %693 = vst.msk [vmem:[#allocation3 + $0x80] sm:$0xff] %vm676_vm3, %v613_v18 }
 0x189   : > { %1271 = vst.msk [vmem:[#allocation3 + $0x78] sm:$0xff] %vm1255_vm6, %v1190_v19  ;;  %1588 = vrot.lane.b32.xlu0 %v5844_v35, %s5274_s23 }
 0x18a   : > { %1779 = vrot.lane.b32.xlu1 %v1695_v16, %s5275_s24 }
 0x18b   : > { %v1381_v56 = vpop.permute.xlu0 %1380 }
 0x18c   : > { %v1959_v21 = vpop.permute.xlu1 %1958  ;;  %v2073_v22 = vld [vmem:[#allocation3 + $0x60] sm:$0xff]  ;;  %1463 = vst.msk [vmem:[#allocation3 + $0x70] sm:$0xff] %vm1448_vm7, %v1381_v56 }
 0x18d   : > { %2042 = vst.msk [vmem:[#allocation3 + $0x68] sm:$0xff] %vm2028_vm10, %v1959_v21  ;;  %4996 = vmatprep.mubr.msk.f32.mxu0 %vm2109_vm11, %v2073_v22  ;;  %1012 = vrot.lane.b32.xlu0 %v5844_v35, %s5271_s28  ;;  %v1889_v35 = vld [vmem:[#allocation2 + $0x12a] sm:$0xff]  ;;  %v1700_v22 = vld [vmem:[#allocation2 + $0x159] sm:$0xff] }
 0x18e   : > { %1203 = vrot.lane.b32.xlu1 %v1695_v16, %s7278_s29 }
 0x18f   : > { %v615_v24 = vpop.permute.xlu0 %614 }
 0x190   : > { %v806_v25 = vpop.permute.xlu1 %805  ;;  %694 = vst.msk [vmem:[#allocation3 + $0x88] sm:$0xff] %vm676_vm3, %v615_v24 }
 0x191   : > { %886 = vst.msk [vmem:[#allocation3 + $0x80] sm:$0xff] %vm869_vm4, %v806_v25  ;;  %1781 = vrot.lane.b32.xlu0 %v1696_v27, %s5275_s24 }
 0x192   : > { %1972 = vrot.lane.b32.xlu1 %v1888_v23, %s5276_s21 }
 0x193   : > { %v1383_v26 = vpop.permute.xlu0 %1382 }
 0x194   : > { %v1575_v29 = vpop.permute.xlu1 %1574  ;;  %v2074_v30 = vld [vmem:[#allocation3 + $0x68] sm:$0xff]  ;;  %1464 = vst.msk [vmem:[#allocation3 + $0x78] sm:$0xff] %vm1448_vm7, %v1383_v26 }
 0x195   : > { %1657 = vst.msk [vmem:[#allocation3 + $0x70] sm:$0xff] %vm1642_vm8, %v1575_v29  ;;  %4997 = vmatmul.mubr.msk.f32.gmra.mrb[12].mxu0 %vm2109_vm11, %v2074_v30  ;;  %628 = vrot.lane.b32.xlu0 %v1695_v16, %s7279_s14 }
 0x196   : > { %1205 = vrot.lane.b32.xlu1 %v1696_v27, %s7278_s29 }
 0x197   : > { %v808_v34 = vpop.permute.xlu0 %807 }
 0x198   : > { %v999_v31 = vpop.permute.xlu1 %998  ;;  %887 = vst.msk [vmem:[#allocation3 + $0x88] sm:$0xff] %vm869_vm4, %v808_v34  ;;  %v1893_v34 = vld [vmem:[#allocation2 + $0x15a] sm:$0xff] }
 0x199   : > { %1079 = vst.msk [vmem:[#allocation3 + $0x80] sm:$0xff] %vm1062_vm5, %v999_v31  ;;  %1396 = vrot.lane.b32.xlu0 %v1888_v23, %s7280_s17 }
 0x19a   : > { %1974 = vrot.lane.b32.xlu1 %v1889_v35, %s5276_s21 }
 0x19b   : > { %v1577_v32 = vpop.permute.xlu0 %1576 }
 0x19c   : > { %v1768_v33 = vpop.permute.xlu1 %1767  ;;  %1658 = vst.msk [vmem:[#allocation3 + $0x78] sm:$0xff] %vm1642_vm8, %v1577_v32 }
 0x19d   : > { %1850 = vst.msk [vmem:[#allocation3 + $0x70] sm:$0xff] %vm1835_vm9, %v1768_v33  ;;  %630 = vrot.lane.b32.xlu0 %v1696_v27, %s7279_s14 }
 0x19e   : > { %821 = vrot.lane.b32.xlu1 %v1888_v23, %s5269_s26  ;;  %v1892_v23 = vld [vmem:[#allocation2 + $0x152] sm:$0xff] }
 0x19f   : > { %v1001_v37 = vpop.permute.xlu0 %1000 }
 0x1a0   : > { %v1192_v38 = vpop.permute.xlu1 %1191  ;;  %1080 = vst.msk [vmem:[#allocation3 + $0x88] sm:$0xff] %vm1062_vm5, %v1001_v37 }
 0x1a1   : > { %1272 = vst.msk [vmem:[#allocation3 + $0x80] sm:$0xff] %vm1255_vm6, %v1192_v38  ;;  %1398 = vrot.lane.b32.xlu0 %v1889_v35, %s7280_s17 }
 0x1a2   : > { %1590 = vrot.lane.b32.xlu1 %v5878_v54, %s5274_s23 }
 0x1a3   : > { %v1770_v61 = vpop.permute.xlu0 %1769 }
 0x1a4   : > { %v1961_v39 = vpop.permute.xlu1 %1960  ;;  %1851 = vst.msk [vmem:[#allocation3 + $0x78] sm:$0xff] %vm1835_vm9, %v1770_v61 }
 0x1a5   : > { %2043 = vst.msk [vmem:[#allocation3 + $0x70] sm:$0xff] %vm2028_vm10, %v1961_v39  ;;  %823 = vrot.lane.b32.xlu0 %v1889_v35, %s5269_s26 }
 0x1a6   : > { %1014 = vrot.lane.b32.xlu1 %v5878_v54, %s5271_s28 }
 0x1a7   : > { %v617_v41 = vpop.permute.xlu0 %616 }
 0x1a8   : > { %v4980_v44 = vpop.f32.mrb[0].mxu0  ;;  %695 = vst.msk [vmem:[#allocation3 + $0x90] sm:$0xff] %vm676_vm3, %v617_v41  ;;  %v1194_v45 = vpop.permute.xlu1 %1193 }
 0x1a9   : > { %v2278_v36 = vadd.f32 %v4980_v44, %v6079_v42  ;;  %v2272_v46 = vpop.f32.mrb[1].mxu0  ;;  %1273 = vst.msk [vmem:[#allocation3 + $0x88] sm:$0xff] %vm1255_vm6, %v1194_v45  ;;  %1592 = vrot.lane.b32.xlu0 %v5897_v2, %s5274_s23  ;;  %v1701_v44 = vld [vmem:[#allocation2 + $0x169] sm:$0xff] }
 0x1aa   : > { %v2273_v1 = vadd.f32 %v6079_v42, %v2272_v46  ;;  %1783 = vrot.lane.b32.xlu1 %v1697_v40, %s5275_s24 }
 0x1ab   : > { %v2432_v54 = vmax.f32 %v2278_v36, 0.0  ;;  %v1385_v49 = vpop.permute.xlu0 %1384 }
 0x1ac   : > { %v2431_v48 = vmax.f32 %v2273_v1, 0.0  ;;  %v2075_v50 = vld [vmem:[#allocation3 + $0x70] sm:$0xff]  ;;  %1465 = vst.msk [vmem:[#allocation3 + $0x80] sm:$0xff] %vm1448_vm7, %v1385_v49  ;;  %v1963_v51 = vpop.permute.xlu1 %1962 }
 0x1ad   : > { %2464 = vst.msk [vmem:[#allocation2 + $0x21] sm:$0xff] %vm330_vm0, %v2432_v54  ;;  %4999 = vmatprep.mubr.msk.f32.mxu0 %vm2109_vm11, %v2075_v50  ;;  %1016 = vrot.lane.b32.xlu0 %v5897_v2, %s5271_s28 }
 0x1ae   : > { %2463 = vst.msk [vmem:[#allocation2 + $0x19] sm:$0xff] %vm330_vm0, %v2431_v48  ;;  %1207 = vrot.lane.b32.xlu1 %v1697_v40, %s7278_s29 }
 0x1af   : > { %2044 = vst.msk [vmem:[#allocation3 + $0x78] sm:$0xff] %vm2028_vm10, %v1963_v51  ;;  %v619_v57 = vpop.permute.xlu0 %618  ;;  %v1702_v51 = vld [vmem:[#allocation2 + $0x171] sm:$0xff] }
 0x1b0   : > { %696 = vst.msk [vmem:[#allocation3 + $0x98] sm:$0xff] %vm676_vm3, %v619_v57  ;;  %v810_v58 = vpop.permute.xlu1 %809 }
 0x1b1   : > { %888 = vst.msk [vmem:[#allocation3 + $0x90] sm:$0xff] %vm869_vm4, %v810_v58  ;;  %1785 = vrot.lane.b32.xlu0 %v1698_v52, %s5275_s24 }
 0x1b2   : > { %1976 = vrot.lane.b32.xlu1 %v1890_v43, %s5276_s21 }
 0x1b3   : > { %v1387_v63 = vpop.permute.xlu0 %1386 }
 0x1b4   : > { %1466 = vst.msk [vmem:[#allocation3 + $0x88] sm:$0xff] %vm1448_vm7, %v1387_v63  ;;  %v1579_v59 = vpop.permute.xlu1 %1578 }
 0x1b5   : > { %v6101_v2 = vld [vmem:[#allocation2 + $0x20] sm:$0xff]  ;;  %v6103_v62 = vld [vmem:[#allocation2 + $0x18] sm:$0xff]  ;;  %1659 = vst.msk [vmem:[#allocation3 + $0x80] sm:$0xff] %vm1642_vm8, %v1579_v59  ;;  %632 = vrot.lane.b32.xlu0 %v1697_v40, %s7279_s14 }
 0x1b6   : > { %v2076_v60 = vld [vmem:[#allocation3 + $0x78] sm:$0xff]  ;;  %2529 = vst.msk [vmem:[#allocation3 + $0x10] sm:$0xff] %vm330_vm0, %v6103_v62  ;;  %2530 = vst.msk [vmem:[#allocation3 + $0x18] sm:$0xff] %vm330_vm0, %v6101_v2  ;;  %1209 = vrot.lane.b32.xlu1 %v1698_v52, %s7278_s29 }
 0x1b7   : > { %5000 = vmatmul.mubr.msk.f32.gmra.mrb[14].mxu0 %vm2109_vm11, %v2076_v60  ;;  %v812_v3 = vpop.permute.xlu0 %811 }
 0x1b8   : > { %889 = vst.msk [vmem:[#allocation3 + $0x98] sm:$0xff] %vm869_vm4, %v812_v3  ;;  %v1003_v10 = vpop.permute.xlu1 %1002 }
 0x1b9   : > { %1081 = vst.msk [vmem:[#allocation3 + $0x90] sm:$0xff] %vm1062_vm5, %v1003_v10  ;;  %1400 = vrot.lane.b32.xlu0 %v1890_v43, %s7280_s17 }
 0x1ba   : > { %1978 = vrot.lane.b32.xlu1 %v1891_v4, %s5276_s21 }
 0x1bb   : > { %v1581_v5 = vpop.permute.xlu0 %1580 }
 0x1bc   : > { %1660 = vst.msk [vmem:[#allocation3 + $0x88] sm:$0xff] %vm1642_vm8, %v1581_v5  ;;  %v1772_v8 = vpop.permute.xlu1 %1771 }
 0x1bd   : > { %1852 = vst.msk [vmem:[#allocation3 + $0x80] sm:$0xff] %vm1835_vm9, %v1772_v8  ;;  %634 = vrot.lane.b32.xlu0 %v1698_v52, %s7279_s14 }
 0x1be   : > { %825 = vrot.lane.b32.xlu1 %v1890_v43, %s5269_s26  ;;  %v1894_v43 = vld [vmem:[#allocation2 + $0x16a] sm:$0xff] }
 0x1bf   : > { %v1005_v6 = vpop.permute.xlu0 %1004 }
 0x1c0   : > { %1082 = vst.msk [vmem:[#allocation3 + $0x98] sm:$0xff] %vm1062_vm5, %v1005_v6  ;;  %v1196_v7 = vpop.permute.xlu1 %1195 }
 0x1c1   : > { %1274 = vst.msk [vmem:[#allocation3 + $0x90] sm:$0xff] %vm1255_vm6, %v1196_v7  ;;  %1402 = vrot.lane.b32.xlu0 %v1891_v4, %s7280_s17  ;;  %v1510_v7 = vld [vmem:[#allocation2 + $0x180] sm:$0xff] }
 0x1c2   : > { %1594 = vrot.lane.b32.xlu1 %v5931_v20, %s5274_s23 }
 0x1c3   : > { %v1774_v9 = vpop.permute.xlu0 %1773 }
 0x1c4   : > { %1853 = vst.msk [vmem:[#allocation3 + $0x88] sm:$0xff] %vm1835_vm9, %v1774_v9  ;;  %v1965_v11 = vpop.permute.xlu1 %1964 }
 0x1c5   : > { %2045 = vst.msk [vmem:[#allocation3 + $0x80] sm:$0xff] %vm2028_vm10, %v1965_v11  ;;  %827 = vrot.lane.b32.xlu0 %v1891_v4, %s5269_s26  ;;  %v1895_v4 = vld [vmem:[#allocation2 + $0x172] sm:$0xff] }
 0x1c6   : > { %1018 = vrot.lane.b32.xlu1 %v5931_v20, %s5271_s28 }
 0x1c7   : > { %v621_v53 = vpop.permute.xlu0 %620 }
 0x1c8   : > { %v4983_v12 = vpop.f32.mrb[2].mxu0  ;;  %697 = vst.msk [vmem:[#allocation3 + $0xa0] sm:$0xff] %vm676_vm3, %v621_v53  ;;  %v1198_v13 = vpop.permute.xlu1 %1197 }
 0x1c9   : > { %v2288_v14 = vadd.f32 %v4983_v12, %v6079_v42  ;;  %v2282_v15 = vpop.f32.mrb[3].mxu0  ;;  %1275 = vst.msk [vmem:[#allocation3 + $0x98] sm:$0xff] %vm1255_vm6, %v1198_v13  ;;  %1596 = vrot.lane.b32.xlu0 %v5947_v28, %s5274_s23  ;;  %v1511_v12 = vld [vmem:[#allocation2 + $0x188] sm:$0xff] }
 0x1ca   : > { %v2283_v16 = vadd.f32 %v6079_v42, %v2282_v15  ;;  %1787 = vrot.lane.b32.xlu1 %v1699_v17, %s5275_s24 }
 0x1cb   : > { %v2434_v18 = vmax.f32 %v2288_v14, 0.0  ;;  %v1389_v19 = vpop.permute.xlu0 %1388  ;;  %v1703_v14 = vld [vmem:[#allocation2 + $0x181] sm:$0xff] }
 0x1cc   : > { %v2433_v20 = vmax.f32 %v2283_v16, 0.0  ;;  %1467 = vst.msk [vmem:[#allocation3 + $0x90] sm:$0xff] %vm1448_vm7, %v1389_v19  ;;  %v1967_v56 = vpop.permute.xlu1 %1966  ;;  %v2077_v21 = vld [vmem:[#allocation3 + $0x80] sm:$0xff] }
 0x1cd   : > { %2466 = vst.msk [vmem:[#allocation2 + $0x39] sm:$0xff] %vm330_vm0, %v2434_v18  ;;  %1020 = vrot.lane.b32.xlu0 %v5947_v28, %s5271_s28  ;;  %5002 = vmatprep.mubr.msk.f32.mxu0 %vm2109_vm11, %v2077_v21 }
 0x1ce   : > { %2465 = vst.msk [vmem:[#allocation2 + $0x31] sm:$0xff] %vm330_vm0, %v2433_v20  ;;  %1211 = vrot.lane.b32.xlu1 %v1699_v17, %s7278_s29 }
 0x1cf   : > { %2046 = vst.msk [vmem:[#allocation3 + $0x88] sm:$0xff] %vm2028_vm10, %v1967_v56  ;;  %v623_v27 = vpop.permute.xlu0 %622 }
 0x1d0   : > { %698 = vst.msk [vmem:[#allocation3 + $0xa8] sm:$0xff] %vm676_vm3, %v623_v27  ;;  %v814_v24 = vpop.permute.xlu1 %813 }
 0x1d1   : > { %890 = vst.msk [vmem:[#allocation3 + $0xa0] sm:$0xff] %vm869_vm4, %v814_v24  ;;  %1789 = vrot.lane.b32.xlu0 %v1700_v22, %s5275_s24 }
 0x1d2   : > { %1980 = vrot.lane.b32.xlu1 %v1892_v23, %s5276_s21 }
 0x1d3   : > { %v1391_v25 = vpop.permute.xlu0 %1390 }
 0x1d4   : > { %1468 = vst.msk [vmem:[#allocation3 + $0x98] sm:$0xff] %vm1448_vm7, %v1391_v25  ;;  %v1583_v28 = vpop.permute.xlu1 %1582  ;;  %v1896_v25 = vld [vmem:[#allocation2 + $0x182] sm:$0xff] }
 0x1d5   : > { %v6151_v29 = vld [vmem:[#allocation2 + $0x30] sm:$0xff]  ;;  %v6153_v30 = vld [vmem:[#allocation2 + $0x38] sm:$0xff]  ;;  %1661 = vst.msk [vmem:[#allocation3 + $0x90] sm:$0xff] %vm1642_vm8, %v1583_v28  ;;  %636 = vrot.lane.b32.xlu0 %v1699_v17, %s7279_s14 }
 0x1d6   : > { %v2078_v26 = vld [vmem:[#allocation3 + $0x88] sm:$0xff]  ;;  %2531 = vst.msk [vmem:[#allocation3 + $0x20] sm:$0xff] %vm330_vm0, %v6151_v29  ;;  %2532 = vst.msk [vmem:[#allocation3 + $0x28] sm:$0xff] %vm330_vm0, %v6153_v30  ;;  %1213 = vrot.lane.b32.xlu1 %v1700_v22, %s7278_s29 }
 0x1d7   : > { %5003 = vmatmul.mubr.msk.f32.gmra.mrb[16].mxu0 %vm2109_vm11, %v2078_v26  ;;  %v816_v35 = vpop.permute.xlu0 %815 }
 0x1d8   : > { %891 = vst.msk [vmem:[#allocation3 + $0xa8] sm:$0xff] %vm869_vm4, %v816_v35  ;;  %v1007_v31 = vpop.permute.xlu1 %1006 }
 0x1d9   : > { %1083 = vst.msk [vmem:[#allocation3 + $0xa0] sm:$0xff] %vm1062_vm5, %v1007_v31  ;;  %1404 = vrot.lane.b32.xlu0 %v1892_v23, %s7280_s17 }
 0x1da   : > { %1982 = vrot.lane.b32.xlu1 %v1893_v34, %s5276_s21 }
 0x1db   : > { %v1585_v32 = vpop.permute.xlu0 %1584 }
 0x1dc   : > { %1662 = vst.msk [vmem:[#allocation3 + $0x98] sm:$0xff] %vm1642_vm8, %v1585_v32  ;;  %v1776_v33 = vpop.permute.xlu1 %1775 }
 0x1dd   : > { %1854 = vst.msk [vmem:[#allocation3 + $0x90] sm:$0xff] %vm1835_vm9, %v1776_v33  ;;  %638 = vrot.lane.b32.xlu0 %v1700_v22, %s7279_s14  ;;  %v1897_v33 = vld [vmem:[#allocation2 + $0x18a] sm:$0xff] }
 0x1de   : > { %829 = vrot.lane.b32.xlu1 %v1892_v23, %s5269_s26  ;;  %v1704_v23 = vld [vmem:[#allocation2 + $0x189] sm:$0xff] }
 0x1df   : > { %v1009_v37 = vpop.permute.xlu0 %1008 }
 0x1e0   : > { %1084 = vst.msk [vmem:[#allocation3 + $0xa8] sm:$0xff] %vm1062_vm5, %v1009_v37  ;;  %v1200_v38 = vpop.permute.xlu1 %1199 }
 0x1e1   : > { %1276 = vst.msk [vmem:[#allocation3 + $0xa0] sm:$0xff] %vm1255_vm6, %v1200_v38  ;;  %1406 = vrot.lane.b32.xlu0 %v1893_v34, %s7280_s17 }
 0x1e2   : > { %1598 = vrot.lane.b32.xlu1 %v5981_v47, %s5274_s23 }
 0x1e3   : > { %v1778_v61 = vpop.permute.xlu0 %1777 }
 0x1e4   : > { %1855 = vst.msk [vmem:[#allocation3 + $0x98] sm:$0xff] %vm1835_vm9, %v1778_v61  ;;  %v1969_v39 = vpop.permute.xlu1 %1968  ;;  %v1512_v61 = vld [vmem:[#allocation2 + $0x198] sm:$0xff] }
 0x1e5   : > { %2047 = vst.msk [vmem:[#allocation3 + $0x90] sm:$0xff] %vm2028_vm10, %v1969_v39  ;;  %831 = vrot.lane.b32.xlu0 %v1893_v34, %s5269_s26  ;;  %v2495_v39 = vld [vmem:[#allocation2] sm:$0xff] }
 0x1e6   : > { %1022 = vrot.lane.b32.xlu1 %v5981_v47, %s5271_s28  ;;  %2527 = vst.msk [vmem:[#allocation3] sm:$0xff] %vm330_vm0, %v2495_v39 }
 0x1e7   : > { %v625_v40 = vpop.permute.xlu0 %624 }
 0x1e8   : > { %v4986_v41 = vpop.f32.mrb[4].mxu0  ;;  %699 = vst.msk [vmem:[#allocation3 + $0xb0] sm:$0xff] %vm676_vm3, %v625_v40  ;;  %v1202_v36 = vpop.permute.xlu1 %1201 }
 0x1e9   : > { %v2298_v45 = vadd.f32 %v4986_v41, %v6079_v42  ;;  %v2292_v46 = vpop.f32.mrb[5].mxu0  ;;  %1277 = vst.msk [vmem:[#allocation3 + $0xa8] sm:$0xff] %vm1255_vm6, %v1202_v36  ;;  %1600 = vrot.lane.b32.xlu0 %v5997_v55, %s5274_s23  ;;  %v1513_v41 = vld [vmem:[#allocation2 + $0x1a0] sm:$0xff]  ;;  %v2496_v36 = vld [vmem:[#allocation2 + $0x8] sm:$0xff] }
 0x1ea   : > { %v2293_v1 = vadd.f32 %v6079_v42, %v2292_v46  ;;  %1791 = vrot.lane.b32.xlu1 %v1701_v44, %s5275_s24  ;;  %2528 = vst.msk [vmem:[#allocation3 + $0x8] sm:$0xff] %vm330_vm0, %v2496_v36  ;;  %v3711_v36 = vld [vmem:[#allocation2 + $0x31] sm:$0xff] }
 0x1eb   : > { %v2436_v54 = vmax.f32 %v2298_v45, 0.0  ;;  %v1393_v48 = vpop.permute.xlu0 %1392  ;;  %v1705_v45 = vld [vmem:[#allocation2 + $0x199] sm:$0xff] }
 0x1ec   : > { %v2435_v47 = vmax.f32 %v2293_v1, 0.0  ;;  %1469 = vst.msk [vmem:[#allocation3 + $0xa0] sm:$0xff] %vm1448_vm7, %v1393_v48  ;;  %v1971_v49 = vpop.permute.xlu1 %1970  ;;  %v2079_v50 = vld [vmem:[#allocation3 + $0x90] sm:$0xff] }
 0x1ed   : > { %2468 = vst.msk [vmem:[#allocation2 + $0x51] sm:$0xff] %vm330_vm0, %v2436_v54  ;;  %1024 = vrot.lane.b32.xlu0 %v5997_v55, %s5271_s28  ;;  %5005 = vmatprep.mubr.msk.f32.mxu0 %vm2109_vm11, %v2079_v50  ;;  %v1706_v1 = vld [vmem:[#allocation2 + $0x1a1] sm:$0xff] }
 0x1ee   : > { %2467 = vst.msk [vmem:[#allocation2 + $0x49] sm:$0xff] %vm330_vm0, %v2435_v47  ;;  %1215 = vrot.lane.b32.xlu1 %v1701_v44, %s7278_s29  ;;  %v1898_v47 = vld [vmem:[#allocation2 + $0x19a] sm:$0xff] }
 0x1ef   : > { %2048 = vst.msk [vmem:[#allocation3 + $0x98] sm:$0xff] %vm2028_vm10, %v1971_v49  ;;  %v627_v52 = vpop.permute.xlu0 %626  ;;  %v1899_v49 = vld [vmem:[#allocation2 + $0x1a2] sm:$0xff] }
 0x1f0   : > { %700 = vst.msk [vmem:[#allocation3 + $0xb8] sm:$0xff] %vm676_vm3, %v627_v52  ;;  %v818_v57 = vpop.permute.xlu1 %817 }
 0x1f1   : > { %892 = vst.msk [vmem:[#allocation3 + $0xb0] sm:$0xff] %vm869_vm4, %v818_v57  ;;  %1793 = vrot.lane.b32.xlu0 %v1702_v51, %s5275_s24  ;;  %v2560_v57 = vld [vmem:[#allocation2 + $0x9] sm:$0xff] }
 0x1f2   : > { %1984 = vrot.lane.b32.xlu1 %v1894_v43, %s5276_s21 }
 0x1f3   : > { %v1395_v58 = vpop.permute.xlu0 %1394 }
 0x1f4   : > { %1470 = vst.msk [vmem:[#allocation3 + $0xa8] sm:$0xff] %vm1448_vm7, %v1395_v58  ;;  %v1587_v55 = vpop.permute.xlu1 %1586 }
 0x1f5   : > { %v6201_v59 = vld [vmem:[#allocation2 + $0x48] sm:$0xff]  ;;  %1663 = vst.msk [vmem:[#allocation3 + $0xa0] sm:$0xff] %vm1642_vm8, %v1587_v55  ;;  %640 = vrot.lane.b32.xlu0 %v1701_v44, %s7279_s14  ;;  %v6206_v60 = vld [vmem:[#allocation2 + $0x50] sm:$0xff] }
 0x1f6   : > { %v2080_v63 = vld [vmem:[#allocation3 + $0x98] sm:$0xff]  ;;  %2533 = vst.msk [vmem:[#allocation3 + $0x30] sm:$0xff] %vm330_vm0, %v6201_v59  ;;  %1217 = vrot.lane.b32.xlu1 %v1702_v51, %s7278_s29  ;;  %2534 = vst.msk [vmem:[#allocation3 + $0x38] sm:$0xff] %vm330_vm0, %v6206_v60 }
 0x1f7   : > { %5006 = vmatmul.mubr.msk.f32.gmra.mrb[18].mxu0 %vm2109_vm11, %v2080_v63  ;;  %v820_v3 = vpop.permute.xlu0 %819 }
 0x1f8   : > { %893 = vst.msk [vmem:[#allocation3 + $0xb8] sm:$0xff] %vm869_vm4, %v820_v3  ;;  %v1011_v10 = vpop.permute.xlu1 %1010 }
 0x1f9   : > { %1085 = vst.msk [vmem:[#allocation3 + $0xb0] sm:$0xff] %vm1062_vm5, %v1011_v10  ;;  %1408 = vrot.lane.b32.xlu0 %v1894_v43, %s7280_s17  ;;  %v2751_v10 = vld [vmem:[#allocation2 + $0x2] sm:$0xff] }
 0x1fa   : > { %1986 = vrot.lane.b32.xlu1 %v1895_v4, %s5276_s21 }
 0x1fb   : > { %v1589_v5 = vpop.permute.xlu0 %1588 }
 0x1fc   : > { %1664 = vst.msk [vmem:[#allocation3 + $0xa8] sm:$0xff] %vm1642_vm8, %v1589_v5  ;;  %v1780_v8 = vpop.permute.xlu1 %1779 }
 0x1fd   : > { %1856 = vst.msk [vmem:[#allocation3 + $0xa0] sm:$0xff] %vm1835_vm9, %v1780_v8  ;;  %642 = vrot.lane.b32.xlu0 %v1702_v51, %s7279_s14  ;;  %v2559_v51 = vld [vmem:[#allocation2 + $0x1] sm:$0xff] }
 0x1fe   : > { %833 = vrot.lane.b32.xlu1 %v1894_v43, %s5269_s26 }
 0x1ff   : > { %v1013_v6 = vpop.permute.xlu0 %1012 }
 0x200   : > { %1086 = vst.msk [vmem:[#allocation3 + $0xb8] sm:$0xff] %vm1062_vm5, %v1013_v6  ;;  %v1204_v9 = vpop.permute.xlu1 %1203  ;;  %v2752_v6 = vld [vmem:[#allocation2 + $0xa] sm:$0xff] }
 0x201   : > { %1278 = vst.msk [vmem:[#allocation3 + $0xb0] sm:$0xff] %vm1255_vm6, %v1204_v9  ;;  %1410 = vrot.lane.b32.xlu0 %v1895_v4, %s7280_s17 }
 0x202   : > { %1602 = vrot.lane.b32.xlu1 %v1510_v7, %s5274_s23 }
 0x203   : > { %v1782_v11 = vpop.permute.xlu0 %1781 }
 0x204   : > { %1857 = vst.msk [vmem:[#allocation3 + $0xa8] sm:$0xff] %vm1835_vm9, %v1782_v11  ;;  %v1973_v53 = vpop.permute.xlu1 %1972 }
 0x205   : > { %2049 = vst.msk [vmem:[#allocation3 + $0xa0] sm:$0xff] %vm2028_vm10, %v1973_v53  ;;  %835 = vrot.lane.b32.xlu0 %v1895_v4, %s5269_s26 }
 0x206   : > { %1026 = vrot.lane.b32.xlu1 %v1510_v7, %s5271_s28 }
 0x207   : > { %v629_v17 = vpop.permute.xlu0 %628 }
 0x208   : > { %v4989_v13 = vpop.f32.mrb[6].mxu0  ;;  %701 = vst.msk [vmem:[#allocation3 + $0xc0] sm:$0xff] %vm676_vm3, %v629_v17  ;;  %v1206_v15 = vpop.permute.xlu1 %1205 }
 0x209   : > { %v2308_v16 = vadd.f32 %v4989_v13, %v6079_v42  ;;  %v2302_v18 = vpop.f32.mrb[7].mxu0  ;;  %1279 = vst.msk [vmem:[#allocation3 + $0xb8] sm:$0xff] %vm1255_vm6, %v1206_v15  ;;  %1604 = vrot.lane.b32.xlu0 %v1511_v12, %s5274_s23 }
 0x20a   : > { %v2303_v20 = vadd.f32 %v6079_v42, %v2302_v18  ;;  %1795 = vrot.lane.b32.xlu1 %v1703_v14, %s5275_s24  ;;  %v3136_v18 = vld [vmem:[#allocation2 + $0x21] sm:$0xff] }
 0x20b   : > { %v2438_v19 = vmax.f32 %v2308_v16, 0.0  ;;  %v1397_v21 = vpop.permute.xlu0 %1396 }
 0x20c   : > { %v2437_v56 = vmax.f32 %v2303_v20, 0.0  ;;  %1471 = vst.msk [vmem:[#allocation3 + $0xb0] sm:$0xff] %vm1448_vm7, %v1397_v21  ;;  %v1975_v22 = vpop.permute.xlu1 %1974  ;;  %v2081_v27 = vld [vmem:[#allocation3 + $0xa0] sm:$0xff]  ;;  %v3327_v20 = vld [vmem:[#allocation2 + $0x1a] sm:$0xff] }
 0x20d   : > { %2470 = vst.msk [vmem:[#allocation2 + $0x69] sm:$0xff] %vm330_vm0, %v2438_v19  ;;  %1028 = vrot.lane.b32.xlu0 %v1511_v12, %s5271_s28  ;;  %5008 = vmatprep.mubr.msk.f32.mxu0 %vm2109_vm11, %v2081_v27  ;;  %v3328_v27 = vld [vmem:[#allocation2 + $0x22] sm:$0xff] }
 0x20e   : > { %2469 = vst.msk [vmem:[#allocation2 + $0x61] sm:$0xff] %vm330_vm0, %v2437_v56  ;;  %1219 = vrot.lane.b32.xlu1 %v1703_v14, %s7278_s29  ;;  %v3135_v14 = vld [vmem:[#allocation2 + $0x19] sm:$0xff] }
 0x20f   : > { %2050 = vst.msk [vmem:[#allocation3 + $0xa8] sm:$0xff] %vm2028_vm10, %v1975_v22  ;;  %v631_v24 = vpop.permute.xlu0 %630 }
 0x210   : > { %702 = vst.msk [vmem:[#allocation3 + $0xc8] sm:$0xff] %vm676_vm3, %v631_v24  ;;  %v822_v28 = vpop.permute.xlu1 %821  ;;  %v4128_v24 = vld [vmem:[%s7263_s3 + $0x8] sm:$0xff] }
 0x211   : > { %894 = vst.msk [vmem:[#allocation3 + $0xc0] sm:$0xff] %vm869_vm4, %v822_v28  ;;  %1797 = vrot.lane.b32.xlu0 %v1704_v23, %s5275_s24 }
 0x212   : > { %1988 = vrot.lane.b32.xlu1 %v1896_v25, %s5276_s21 }
 0x213   : > { %v1399_v26 = vpop.permute.xlu0 %1398 }
 0x214   : > { %1472 = vst.msk [vmem:[#allocation3 + $0xb8] sm:$0xff] %vm1448_vm7, %v1399_v26  ;;  %v1591_v35 = vpop.permute.xlu1 %1590 }
 0x215   : > { %v6247_v31 = vld [vmem:[#allocation2 + $0x60] sm:$0xff]  ;;  %1665 = vst.msk [vmem:[#allocation3 + $0xb0] sm:$0xff] %vm1642_vm8, %v1591_v35  ;;  %1221 = vrot.lane.b32.xlu0 %v1704_v23, %s7278_s29  ;;  %v6252_v32 = vld [vmem:[#allocation2 + $0x68] sm:$0xff]  ;;  %v4129_v35 = vld [vmem:[%s7263_s3 + $0x10] sm:$0xff] }
 0x216   : > { %v2082_v34 = vld [vmem:[#allocation3 + $0xa8] sm:$0xff]  ;;  %2535 = vst.msk [vmem:[#allocation3 + $0x40] sm:$0xff] %vm330_vm0, %v6247_v31  ;;  %1412 = vrot.lane.b32.xlu1 %v1896_v25, %s7280_s17  ;;  %2536 = vst.msk [vmem:[#allocation3 + $0x48] sm:$0xff] %vm330_vm0, %v6252_v32  ;;  %v4127_v23 = vld [vmem:[%s7263_s3] sm:$0xff] }
 0x217   : > { %5009 = vmatmul.mubr.msk.f32.gmra.mrb[20].mxu0 %vm2109_vm11, %v2082_v34  ;;  %v824_v37 = vpop.permute.xlu0 %823  ;;  %v5126_v25 = vpack.c.bf16 %v4128_v24, %v4127_v23  ;;  %v4130_v34 = vld [vmem:[%s7263_s3 + $0x18] sm:$0xff] }
 0x218   : > { %895 = vst.msk [vmem:[#allocation3 + $0xc8] sm:$0xff] %vm869_vm4, %v824_v37  ;;  %v1015_v38 = vpop.permute.xlu1 %1014  ;;  %v3714_v24 = vld [vmem:[#allocation2 + $0x51] sm:$0xff] }
 0x219   : > { %1087 = vst.msk [vmem:[#allocation3 + $0xc0] sm:$0xff] %vm1062_vm5, %v1015_v38  ;;  %1990 = vrot.lane.b32.xlu0 %v1897_v33, %s5276_s21  ;;  %5127 = vmatprep.subr.bf16.mxu1 %v5126_v25 }
 0x21a   : > { %1414 = vrot.lane.b32.xlu1 %v1897_v33, %s7280_s17  ;;  %5129 = vmatpush3.bf16.msra.mxu1 %v5126_v25  ;;  %v5130_v33 = vpack.c.bf16 %v4130_v34, %v4129_v35  ;;  %v3905_v25 = vld [vmem:[#allocation2 + $0x4a] sm:$0xff] }
 0x21b   : > { %v1593_v40 = vpop.permute.xlu0 %1592 }
 0x21c   : > { %1666 = vst.msk [vmem:[#allocation3 + $0xb8] sm:$0xff] %vm1642_vm8, %v1593_v40  ;;  %v1784_v44 = vpop.permute.xlu1 %1783  ;;  %5131 = vmatprep.subr.bf16.mxu1 %v5130_v33 }
 0x21d   : > { %1858 = vst.msk [vmem:[#allocation3 + $0xb0] sm:$0xff] %vm1835_vm9, %v1784_v44  ;;  %1606 = vrot.lane.b32.xlu0 %v1512_v61, %s5274_s23  ;;  %v4132_v44 = vld [vmem:[%s7263_s3 + $0x28] sm:$0xff] }
 0x21e   : > { %1608 = vrot.lane.b32.xlu1 %v1513_v41, %s5274_s23  ;;  %5133 = vmatpush3.bf16.msra.mxu1 %v5130_v33  ;;  %v4131_v41 = vld [vmem:[%s7263_s3 + $0x20] sm:$0xff] }
 0x21f   : > { %v1017_v46 = vpop.permute.xlu0 %1016 }
 0x220   : > { %1088 = vst.msk [vmem:[#allocation3 + $0xc8] sm:$0xff] %vm1062_vm5, %v1017_v46  ;;  %v1208_v54 = vpop.permute.xlu1 %1207 }
 0x221   : > { %1280 = vst.msk [vmem:[#allocation3 + $0xc0] sm:$0xff] %vm1255_vm6, %v1208_v54  ;;  %1799 = vrot.lane.b32.xlu0 %v1705_v45, %s5275_s24  ;;  %v5134_v45 = vpack.c.bf16 %v4132_v44, %v4131_v41 }
 0x222   : > { %1801 = vrot.lane.b32.xlu1 %v1706_v1, %s5275_s24 }
 0x223   : > { %v1786_v48 = vpop.permute.xlu0 %1785  ;;  %5135 = vmatprep.subr.bf16.mxu1 %v5134_v45 }
 0x224   : > { %1859 = vst.msk [vmem:[#allocation3 + $0xb8] sm:$0xff] %vm1835_vm9, %v1786_v48  ;;  %v1977_v50 = vpop.permute.xlu1 %1976  ;;  %5137 = vmatpush3.bf16.msra.mxu1 %v5134_v45 }
 0x225   : > { %2051 = vst.msk [vmem:[#allocation3 + $0xb0] sm:$0xff] %vm2028_vm10, %v1977_v50  ;;  %1992 = vrot.lane.b32.xlu0 %v1898_v47, %s5276_s21  ;;  %v4134_v50 = vld [vmem:[%s7263_s3 + $0x38] sm:$0xff] }
 0x226   : > { %1994 = vrot.lane.b32.xlu1 %v1899_v49, %s5276_s21  ;;  %v4133_v49 = vld [vmem:[%s7263_s3 + $0x30] sm:$0xff] }
 0x227   : > { %v633_v52 = vpop.permute.xlu0 %632 }
 0x228   : > { %v4992_v43 = vpop.f32.mrb[8].mxu0  ;;  %703 = vst.msk [vmem:[#allocation3 + $0xd0] sm:$0xff] %vm676_vm3, %v633_v52  ;;  %v1210_v58 = vpop.permute.xlu1 %1209 }
 0x229   : > { %v2318_v55 = vadd.f32 %v4992_v43, %v6079_v42  ;;  %v2312_v63 = vpop.f32.mrb[9].mxu0  ;;  %1281 = vst.msk [vmem:[#allocation3 + $0xc8] sm:$0xff] %vm1255_vm6, %v1210_v58  ;;  %2623 = vrot.lane.b32.xlu0 %v2559_v51, %s7279_s14  ;;  %v5138_v51 = vpack.c.bf16 %v4134_v50, %v4133_v49  ;;  %v3903_v58 = vld [vmem:[#allocation2 + $0x32] sm:$0xff] }
 0x22a   : > { %v2313_v3 = vadd.f32 %v6079_v42, %v2312_v63  ;;  %2625 = vrot.lane.b32.xlu1 %v2560_v57, %s7279_s14  ;;  %v3712_v57 = vld [vmem:[#allocation2 + $0x39] sm:$0xff] }
 0x22b   : > { %v2440_v4 = vmax.f32 %v2318_v55, 0.0  ;;  %v1401_v8 = vpop.permute.xlu0 %1400  ;;  %5139 = vmatprep.subr.bf16.mxu1 %v5138_v51 }
 0x22c   : > { %v2439_v5 = vmax.f32 %v2313_v3, 0.0  ;;  %1473 = vst.msk [vmem:[#allocation3 + $0xc0] sm:$0xff] %vm1448_vm7, %v1401_v8  ;;  %v1979_v7 = vpop.permute.xlu1 %1978  ;;  %v2083_v9 = vld [vmem:[#allocation3 + $0xb0] sm:$0xff]  ;;  %5141 = vmatpush3.bf16.msra.mxu1 %v5138_v51 }
 0x22d   : > { %2472 = vst.msk [vmem:[#allocation2 + $0x81] sm:$0xff] %vm330_vm0, %v2440_v4  ;;  %2815 = vrot.lane.b32.xlu0 %v2751_v10, %s5269_s26  ;;  %5011 = vmatprep.mubr.msk.f32.mxu0 %vm2109_vm11, %v2083_v9 }
 0x22e   : > { %2471 = vst.msk [vmem:[#allocation2 + $0x79] sm:$0xff] %vm330_vm0, %v2439_v5  ;;  %2817 = vrot.lane.b32.xlu1 %v2752_v6, %s5269_s26  ;;  %v3904_v6 = vld [vmem:[#allocation2 + $0x3a] sm:$0xff] }
 0x22f   : > { %2052 = vst.msk [vmem:[#allocation3 + $0xb8] sm:$0xff] %vm2028_vm10, %v1979_v7  ;;  %v635_v11 = vpop.permute.xlu0 %634 }
 0x230   : > { %704 = vst.msk [vmem:[#allocation3 + $0xd8] sm:$0xff] %vm676_vm3, %v635_v11  ;;  %v826_v53 = vpop.permute.xlu1 %825 }
 0x231   : > { %896 = vst.msk [vmem:[#allocation3 + $0xd0] sm:$0xff] %vm869_vm4, %v826_v53  ;;  %3007 = vrot.lane.b32.xlu0 %v6103_v62, %s5271_s28 }
 0x232   : > { %3009 = vrot.lane.b32.xlu1 %v6101_v2, %s5271_s28 }
 0x233   : > { %v1403_v12 = vpop.permute.xlu0 %1402 }
 0x234   : > { %1474 = vst.msk [vmem:[#allocation3 + $0xc8] sm:$0xff] %vm1448_vm7, %v1403_v12  ;;  %v1595_v17 = vpop.permute.xlu1 %1594 }
 0x235   : > { %v6297_v15 = vld [vmem:[#allocation2 + $0x78] sm:$0xff]  ;;  %1667 = vst.msk [vmem:[#allocation3 + $0xc0] sm:$0xff] %vm1642_vm8, %v1595_v17  ;;  %3199 = vrot.lane.b32.xlu0 %v3135_v14, %s7278_s29  ;;  %v6302_v16 = vld [vmem:[#allocation2 + $0x80] sm:$0xff] }
 0x236   : > { %v2084_v13 = vld [vmem:[#allocation3 + $0xb8] sm:$0xff]  ;;  %2537 = vst.msk [vmem:[#allocation3 + $0x50] sm:$0xff] %vm330_vm0, %v6297_v15  ;;  %2627 = vrot.lane.b32.xlu1 %v3135_v14, %s7279_s14  ;;  %2538 = vst.msk [vmem:[#allocation3 + $0x58] sm:$0xff] %vm330_vm0, %v6302_v16 }
 0x237   : > { %5012 = vmatmul.mubr.msk.f32.gmra.mrb[22].mxu0 %vm2109_vm11, %v2084_v13  ;;  %v828_v2 = vpop.permute.xlu0 %827 }
 0x238   : > { %897 = vst.msk [vmem:[#allocation3 + $0xd8] sm:$0xff] %vm869_vm4, %v828_v2  ;;  %v1019_v62 = vpop.permute.xlu1 %1018 }
 0x239   : > { %1089 = vst.msk [vmem:[#allocation3 + $0xd0] sm:$0xff] %vm1062_vm5, %v1019_v62  ;;  %3201 = vrot.lane.b32.xlu0 %v3136_v18, %s7278_s29 }
 0x23a   : > { %3391 = vrot.lane.b32.xlu1 %v3327_v20, %s7280_s17 }
 0x23b   : > { %v1597_v19 = vpop.permute.xlu0 %1596 }
 0x23c   : > { %1668 = vst.msk [vmem:[#allocation3 + $0xc8] sm:$0xff] %vm1642_vm8, %v1597_v19  ;;  %v1788_v56 = vpop.permute.xlu1 %1787  ;;  %v3713_v19 = vld [vmem:[#allocation2 + $0x49] sm:$0xff] }
 0x23d   : > { %1860 = vst.msk [vmem:[#allocation3 + $0xc0] sm:$0xff] %vm1835_vm9, %v1788_v56  ;;  %2629 = vrot.lane.b32.xlu0 %v3136_v18, %s7279_s14 }
 0x23e   : > { %2819 = vrot.lane.b32.xlu1 %v3327_v20, %s5269_s26 }
 0x23f   : > { %v1021_v21 = vpop.permute.xlu0 %1020 }
 0x240   : > { %1090 = vst.msk [vmem:[#allocation3 + $0xd8] sm:$0xff] %vm1062_vm5, %v1021_v21  ;;  %v1212_v22 = vpop.permute.xlu1 %1211 }
 0x241   : > { %1282 = vst.msk [vmem:[#allocation3 + $0xd0] sm:$0xff] %vm1255_vm6, %v1212_v22  ;;  %3393 = vrot.lane.b32.xlu0 %v3328_v27, %s7280_s17 }
 0x242   : > { %3583 = vrot.lane.b32.xlu1 %v6151_v29, %s5274_s23 }
 0x243   : > { %v1790_v28 = vpop.permute.xlu0 %1789 }
 0x244   : > { %1861 = vst.msk [vmem:[#allocation3 + $0xc8] sm:$0xff] %vm1835_vm9, %v1790_v28  ;;  %v1981_v26 = vpop.permute.xlu1 %1980 }
 0x245   : > { %2053 = vst.msk [vmem:[#allocation3 + $0xc0] sm:$0xff] %vm2028_vm10, %v1981_v26  ;;  %2821 = vrot.lane.b32.xlu0 %v3328_v27, %s5269_s26 }
 0x246   : > { %3011 = vrot.lane.b32.xlu1 %v6151_v29, %s5271_s28 }
 0x247   : > { %v637_v37 = vpop.permute.xlu0 %636 }
 0x248   : > { %v4995_v38 = vpop.f32.mrb[10].mxu0  ;;  %705 = vst.msk [vmem:[#allocation3 + $0xe0] sm:$0xff] %vm676_vm3, %v637_v37  ;;  %v1214_v61 = vpop.permute.xlu1 %1213 }
 0x249   : > { %v2328_v39 = vadd.f32 %v4995_v38, %v6079_v42  ;;  %v2322_v40 = vpop.f32.mrb[11].mxu0  ;;  %1283 = vst.msk [vmem:[#allocation3 + $0xd8] sm:$0xff] %vm1255_vm6, %v1214_v61  ;;  %3585 = vrot.lane.b32.xlu0 %v6153_v30, %s5274_s23  ;;  %v3906_v38 = vld [vmem:[#allocation2 + $0x52] sm:$0xff] }
 0x24a   : > { %v2323_v29 = vadd.f32 %v6079_v42, %v2322_v40  ;;  %3775 = vrot.lane.b32.xlu1 %v3711_v36, %s5275_s24 }
 0x24b   : > { %v2442_v46 = vmax.f32 %v2328_v39, 0.0  ;;  %v1405_v54 = vpop.permute.xlu0 %1404 }
 0x24c   : > { %v2441_v1 = vmax.f32 %v2323_v29, 0.0  ;;  %1475 = vst.msk [vmem:[#allocation3 + $0xd0] sm:$0xff] %vm1448_vm7, %v1405_v54  ;;  %v1983_v47 = vpop.permute.xlu1 %1982  ;;  %v2085_v48 = vld [vmem:[#allocation3 + $0xc0] sm:$0xff] }
 0x24d   : > { %2474 = vst.msk [vmem:[#allocation2 + $0x99] sm:$0xff] %vm330_vm0, %v2442_v46  ;;  %5014 = vmatprep.mubr.msk.f32.mxu0 %vm2109_vm11, %v2085_v48  ;;  %3013 = vrot.lane.b32.xlu0 %v6153_v30, %s5271_s28  ;;  %v4135_v30 = vld [vmem:[%s7263_s3 + $0x40] sm:$0xff] }
 0x24e   : > { %2473 = vst.msk [vmem:[#allocation2 + $0x91] sm:$0xff] %vm330_vm0, %v2441_v1  ;;  %3203 = vrot.lane.b32.xlu1 %v3711_v36, %s7278_s29  ;;  %5042 = vmatprep.subr.mxu1 %v4135_v30  ;;  %v6459_v1 = vld [vmem:[%s7262_s2] ss:$0 sm:$0xff]  ;;  %v3715_v48 = vld [vmem:[#allocation2 + $0x61] sm:$0xff] }
 0x24f   : > { %2054 = vst.msk [vmem:[#allocation3 + $0xc8] sm:$0xff] %vm2028_vm10, %v1983_v47  ;;  %v639_v52 = vpop.permute.xlu0 %638  ;;  %5043 = vmatpush3.msra.mxu1 %v4135_v30  ;;  %v3716_v30 = vld [vmem:[#allocation2 + $0x69] sm:$0xff] }
 0x250   : > { %706 = vst.msk [vmem:[#allocation3 + $0xe8] sm:$0xff] %vm676_vm3, %v639_v52  ;;  %v830_v43 = vpop.permute.xlu1 %829 }
 0x251   : > { %898 = vst.msk [vmem:[#allocation3 + $0xe0] sm:$0xff] %vm869_vm4, %v830_v43  ;;  %3777 = vrot.lane.b32.xlu0 %v3712_v57, %s5275_s24 }
 0x252   : > { %3967 = vrot.lane.b32.xlu1 %v3903_v58, %s5276_s21 }
 0x253   : > { %v1407_v55 = vpop.permute.xlu0 %1406 }
 0x254   : > { %1476 = vst.msk [vmem:[#allocation3 + $0xd8] sm:$0xff] %vm1448_vm7, %v1407_v55  ;;  %v1599_v63 = vpop.permute.xlu1 %1598  ;;  %v3907_v55 = vld [vmem:[#allocation2 + $0x62] sm:$0xff] }
 0x255   : > { %v6374_v4 = vld [vmem:[#allocation2 + $0x90] sm:$0xff]  ;;  %1669 = vst.msk [vmem:[#allocation3 + $0xd0] sm:$0xff] %vm1642_vm8, %v1599_v63  ;;  %2631 = vrot.lane.b32.xlu0 %v3711_v36, %s7279_s14  ;;  %v6379_v10 = vld [vmem:[#allocation2 + $0x98] sm:$0xff] }
 0x256   : > { %v2086_v3 = vld [vmem:[#allocation3 + $0xc8] sm:$0xff]  ;;  %2539 = vst.msk [vmem:[#allocation3 + $0x60] sm:$0xff] %vm330_vm0, %v6374_v4  ;;  %3205 = vrot.lane.b32.xlu1 %v3712_v57, %s7278_s29  ;;  %2540 = vst.msk [vmem:[#allocation3 + $0x68] sm:$0xff] %vm330_vm0, %v6379_v10 }
 0x257   : > { %5015 = vmatmul.mubr.msk.f32.gmra.mrb[24].mxu0 %vm2109_vm11, %v2086_v3  ;;  %v832_v5 = vpop.permute.xlu0 %831 }
 0x258   : > { %899 = vst.msk [vmem:[#allocation3 + $0xe8] sm:$0xff] %vm869_vm4, %v832_v5  ;;  %v1023_v8 = vpop.permute.xlu1 %1022 }
 0x259   : > { %1091 = vst.msk [vmem:[#allocation3 + $0xe0] sm:$0xff] %vm1062_vm5, %v1023_v8  ;;  %3395 = vrot.lane.b32.xlu0 %v3903_v58, %s7280_s17 }
 0x25a   : > { %3969 = vrot.lane.b32.xlu1 %v3904_v6, %s5276_s21 }
 0x25b   : > { %v1601_v7 = vpop.permute.xlu0 %1600 }
 0x25c   : > { %1670 = vst.msk [vmem:[#allocation3 + $0xd8] sm:$0xff] %vm1642_vm8, %v1601_v7  ;;  %v1792_v9 = vpop.permute.xlu1 %1791 }
 0x25d   : > { %1862 = vst.msk [vmem:[#allocation3 + $0xd0] sm:$0xff] %vm1835_vm9, %v1792_v9  ;;  %2633 = vrot.lane.b32.xlu0 %v3712_v57, %s7279_s14  ;;  %v3908_v9 = vld [vmem:[#allocation2 + $0x6a] sm:$0xff] }
 0x25e   : > { %2823 = vrot.lane.b32.xlu1 %v3903_v58, %s5269_s26 }
 0x25f   : > { %v1025_v11 = vpop.permute.xlu0 %1024 }
 0x260   : > { %1092 = vst.msk [vmem:[#allocation3 + $0xe8] sm:$0xff] %vm1062_vm5, %v1025_v11  ;;  %v1216_v53 = vpop.permute.xlu1 %1215 }
 0x261   : > { %1284 = vst.msk [vmem:[#allocation3 + $0xe0] sm:$0xff] %vm1255_vm6, %v1216_v53  ;;  %3397 = vrot.lane.b32.xlu0 %v3904_v6, %s7280_s17 }
 0x262   : > { %3587 = vrot.lane.b32.xlu1 %v6201_v59, %s5274_s23 }
 0x263   : > { %v1794_v12 = vpop.permute.xlu0 %1793 }
 0x264   : > { %1863 = vst.msk [vmem:[#allocation3 + $0xd8] sm:$0xff] %vm1835_vm9, %v1794_v12  ;;  %v1985_v17 = vpop.permute.xlu1 %1984 }
 0x265   : > { %2055 = vst.msk [vmem:[#allocation3 + $0xd0] sm:$0xff] %vm2028_vm10, %v1985_v17  ;;  %2825 = vrot.lane.b32.xlu0 %v3904_v6, %s5269_s26 }
 0x266   : > { %3015 = vrot.lane.b32.xlu1 %v6201_v59, %s5271_s28 }
 0x267   : > { %v641_v13 = vpop.permute.xlu0 %640 }
 0x268   : > { %v4998_v14 = vpop.f32.mrb[12].mxu0  ;;  %707 = vst.msk [vmem:[#allocation3 + $0xf0] sm:$0xff] %vm676_vm3, %v641_v13  ;;  %v1218_v2 = vpop.permute.xlu1 %1217 }
 0x269   : > { %v2338_v62 = vadd.f32 %v4998_v14, %v6079_v42  ;;  %v2332_v18 = vpop.f32.mrb[13].mxu0  ;;  %1285 = vst.msk [vmem:[#allocation3 + $0xe8] sm:$0xff] %vm1255_vm6, %v1218_v2  ;;  %3589 = vrot.lane.b32.xlu0 %v6206_v60, %s5274_s23 }
 0x26a   : > { %v2333_v20 = vadd.f32 %v6079_v42, %v2332_v18  ;;  %3779 = vrot.lane.b32.xlu1 %v3713_v19, %s5275_s24 }
 0x26b   : > { %v2444_v56 = vmax.f32 %v2338_v62, 0.0  ;;  %v1409_v21 = vpop.permute.xlu0 %1408 }
 0x26c   : > { %v2443_v59 = vmax.f32 %v2333_v20, 0.0  ;;  %1477 = vst.msk [vmem:[#allocation3 + $0xe0] sm:$0xff] %vm1448_vm7, %v1409_v21  ;;  %v1987_v22 = vpop.permute.xlu1 %1986  ;;  %v2087_v27 = vld [vmem:[#allocation3 + $0xd0] sm:$0xff] }
 0x26d   : > { %2476 = vst.msk [vmem:[#allocation2 + $0xb1] sm:$0xff] %vm330_vm0, %v2444_v56  ;;  %5017 = vmatprep.mubr.msk.f32.mxu0 %vm2109_vm11, %v2087_v27  ;;  %3017 = vrot.lane.b32.xlu0 %v6206_v60, %s5271_s28  ;;  %v3717_v21 = vld [vmem:[#allocation2 + $0x79] sm:$0xff] }
 0x26e   : > { %2475 = vst.msk [vmem:[#allocation2 + $0xa9] sm:$0xff] %vm330_vm0, %v2443_v59  ;;  %3207 = vrot.lane.b32.xlu1 %v3713_v19, %s7278_s29 }
 0x26f   : > { %2056 = vst.msk [vmem:[#allocation3 + $0xd8] sm:$0xff] %vm2028_vm10, %v1987_v22  ;;  %v643_v42 = vpop.permute.xlu0 %642 }
 0x270   : > { %708 = vst.msk [vmem:[#allocation3 + $0xf8] sm:$0xff] %vm676_vm3, %v643_v42  ;;  %v834_v23 = vpop.permute.xlu1 %833 }
 0x271   : > { %900 = vst.msk [vmem:[#allocation3 + $0xf0] sm:$0xff] %vm869_vm4, %v834_v23  ;;  %3781 = vrot.lane.b32.xlu0 %v3714_v24, %s5275_s24 }
 0x272   : > { %3971 = vrot.lane.b32.xlu1 %v3905_v25, %s5276_s21 }
 0x273   : > { %v1411_v28 = vpop.permute.xlu0 %1410 }
 0x274   : > { %1478 = vst.msk [vmem:[#allocation3 + $0xe8] sm:$0xff] %vm1448_vm7, %v1411_v28  ;;  %v1603_v26 = vpop.permute.xlu1 %1602  ;;  %v3718_v28 = vld [vmem:[#allocation2 + $0x81] sm:$0xff] }
 0x275   : > { %v6424_v60 = vld [vmem:[#allocation2 + $0xa8] sm:$0xff]  ;;  %1671 = vst.msk [vmem:[#allocation3 + $0xe0] sm:$0xff] %vm1642_vm8, %v1603_v26  ;;  %2635 = vrot.lane.b32.xlu0 %v3713_v19, %s7279_s14  ;;  %v6429_v34 = vld [vmem:[#allocation2 + $0xb0] sm:$0xff]  ;;  %v3909_v26 = vld [vmem:[#allocation2 + $0x7a] sm:$0xff] }
 0x276   : > { %v2088_v35 = vld [vmem:[#allocation3 + $0xd8] sm:$0xff]  ;;  %2541 = vst.msk [vmem:[#allocation3 + $0x70] sm:$0xff] %vm330_vm0, %v6424_v60  ;;  %3209 = vrot.lane.b32.xlu1 %v3714_v24, %s7278_s29  ;;  %2542 = vst.msk [vmem:[#allocation3 + $0x78] sm:$0xff] %vm330_vm0, %v6429_v34 }
 0x277   : > { %5018 = vmatmul.mubr.msk.f32.gmra.mrb[26].mxu0 %vm2109_vm11, %v2088_v35  ;;  %v836_v33 = vpop.permute.xlu0 %835 }
 0x278   : > { %901 = vst.msk [vmem:[#allocation3 + $0xf8] sm:$0xff] %vm869_vm4, %v836_v33  ;;  %v1027_v37 = vpop.permute.xlu1 %1026 }
 0x279   : > { %1093 = vst.msk [vmem:[#allocation3 + $0xf0] sm:$0xff] %vm1062_vm5, %v1027_v37  ;;  %3399 = vrot.lane.b32.xlu0 %v3905_v25, %s7280_s17 }
 0x27a   : > { %3973 = vrot.lane.b32.xlu1 %v3906_v38, %s5276_s21 }
 0x27b   : > { %v1605_v61 = vpop.permute.xlu0 %1604 }
 0x27c   : > { %1672 = vst.msk [vmem:[#allocation3 + $0xe8] sm:$0xff] %vm1642_vm8, %v1605_v61  ;;  %v1796_v39 = vpop.permute.xlu1 %1795 }
 0x27d   : > { %1864 = vst.msk [vmem:[#allocation3 + $0xe0] sm:$0xff] %vm1835_vm9, %v1796_v39  ;;  %2637 = vrot.lane.b32.xlu0 %v3714_v24, %s7279_s14  ;;  %v3910_v39 = vld [vmem:[#allocation2 + $0x82] sm:$0xff] }
 0x27e   : > { %2827 = vrot.lane.b32.xlu1 %v3905_v25, %s5269_s26 }
 0x27f   : > { %v1029_v40 = vpop.permute.xlu0 %1028 }
 0x280   : > { %1094 = vst.msk [vmem:[#allocation3 + $0xf8] sm:$0xff] %vm1062_vm5, %v1029_v40  ;;  %v1220_v41 = vpop.permute.xlu1 %1219 }
 0x281   : > { %1286 = vst.msk [vmem:[#allocation3 + $0xf0] sm:$0xff] %vm1255_vm6, %v1220_v41  ;;  %3401 = vrot.lane.b32.xlu0 %v3906_v38, %s7280_s17 }
 0x282   : > { %3591 = vrot.lane.b32.xlu1 %v6247_v31, %s5274_s23 }
 0x283   : > { %v1798_v44 = vpop.permute.xlu0 %1797 }
 0x284   : > { %1865 = vst.msk [vmem:[#allocation3 + $0xe8] sm:$0xff] %vm1835_vm9, %v1798_v44  ;;  %v1989_v29 = vpop.permute.xlu1 %1988 }
 0x285   : > { %2057 = vst.msk [vmem:[#allocation3 + $0xe0] sm:$0xff] %vm2028_vm10, %v1989_v29  ;;  %2829 = vrot.lane.b32.xlu0 %v3906_v38, %s5269_s26 }
 0x286   : > { %3019 = vrot.lane.b32.xlu1 %v6247_v31, %s5271_s28 }
 0x287   : > { %v1222_v36 = vpop.permute.xlu0 %1221 }
 0x288   : > { %1287 = vst.msk [vmem:[#allocation3 + $0xf8] sm:$0xff] %vm1255_vm6, %v1222_v36  ;;  %v1413_v45 = vpop.permute.xlu1 %1412 }
 0x289   : > { %1479 = vst.msk [vmem:[#allocation3 + $0xf0] sm:$0xff] %vm1448_vm7, %v1413_v45  ;;  %3593 = vrot.lane.b32.xlu0 %v6252_v32, %s5274_s23 }
 0x28a   : > { %v5001_v46 = vpop.f32.mrb[14].mxu0  ;;  %3783 = vrot.lane.b32.xlu1 %v3715_v48, %s5275_s24 }
 0x28b   : > { %v2348_v54 = vadd.f32 %v6459_v1, %v5001_v46  ;;  %v2342_v47 = vpop.f32.mrb[15].mxu0  ;;  %v1991_v50 = vpop.permute.xlu0 %1990 }
 0x28c   : > { %v2343_v31 = vadd.f32 %v6459_v1, %v2342_v47  ;;  %2058 = vst.msk [vmem:[#allocation3 + $0xe8] sm:$0xff] %vm2028_vm10, %v1991_v50  ;;  %v1415_v52 = vpop.permute.xlu1 %1414  ;;  %v2089_v43 = vld [vmem:[#allocation3 + $0xe0] sm:$0xff] }
 0x28d   : > { %v2446_v49 = vmax.f32 %v2348_v54, 0.0  ;;  %1480 = vst.msk [vmem:[#allocation3 + $0xf8] sm:$0xff] %vm1448_vm7, %v1415_v52  ;;  %5020 = vmatprep.mubr.msk.f32.mxu0 %vm2109_vm11, %v2089_v43  ;;  %3021 = vrot.lane.b32.xlu0 %v6252_v32, %s5271_s28 }
 0x28e   : > { %v2445_v51 = vmax.f32 %v2343_v31, 0.0  ;;  %3211 = vrot.lane.b32.xlu1 %v3715_v48, %s7278_s29 }
 0x28f   : > { %2478 = vst.msk [vmem:[#allocation2 + $0xc9] sm:$0xff] %vm330_vm0, %v2446_v49  ;;  %v1607_v57 = vpop.permute.xlu0 %1606  ;;  %v3719_v49 = vld [vmem:[#allocation2 + $0x91] sm:$0xff] }
 0x290   : > { %2477 = vst.msk [vmem:[#allocation2 + $0xc1] sm:$0xff] %vm330_vm0, %v2445_v51  ;;  %v1609_v58 = vpop.permute.xlu1 %1608 }
 0x291   : > { %1673 = vst.msk [vmem:[#allocation3 + $0xf0] sm:$0xff] %vm1642_vm8, %v1607_v57  ;;  %1674 = vst.msk [vmem:[#allocation3 + $0xf8] sm:$0xff] %vm1642_vm8, %v1609_v58  ;;  %3785 = vrot.lane.b32.xlu0 %v3716_v30, %s5275_s24 }
 0x292   : > { %3975 = vrot.lane.b32.xlu1 %v3907_v55, %s5276_s21 }
 0x293   : > { %v1800_v63 = vpop.permute.xlu0 %1799  ;;  %v2090_v3 = vld [vmem:[#allocation3 + $0xe8] sm:$0xff] }
 0x294   : > { %1866 = vst.msk [vmem:[#allocation3 + $0xf0] sm:$0xff] %vm1835_vm9, %v1800_v63  ;;  %v1802_v32 = vpop.permute.xlu1 %1801  ;;  %5021 = vmatmul.mubr.msk.f32.gmra.mrb[28].mxu0 %vm2109_vm11, %v2090_v3  ;;  %v3911_v63 = vld [vmem:[#allocation2 + $0x92] sm:$0xff] }
 0x295   : > { %1867 = vst.msk [vmem:[#allocation3 + $0xf8] sm:$0xff] %vm1835_vm9, %v1802_v32  ;;  %2639 = vrot.lane.b32.xlu0 %v3715_v48, %s7279_s14 }
 0x296   : > { %3213 = vrot.lane.b32.xlu1 %v3716_v30, %s7278_s29 }
 0x297   : > { %v6482_v5 = vld [vmem:[#allocation2 + $0xc0] sm:$0xff]  ;;  %v6484_v8 = vld [vmem:[#allocation2 + $0xc8] sm:$0xff]  ;;  %v1993_v6 = vpop.permute.xlu0 %1992 }
 0x298   : > { %2543 = vst.msk [vmem:[#allocation3 + $0x80] sm:$0xff] %vm330_vm0, %v6482_v5  ;;  %2544 = vst.msk [vmem:[#allocation3 + $0x88] sm:$0xff] %vm330_vm0, %v6484_v8  ;;  %v1995_v7 = vpop.permute.xlu1 %1994 }
 0x299   : > { %2059 = vst.msk [vmem:[#allocation3 + $0xf0] sm:$0xff] %vm2028_vm10, %v1993_v6  ;;  %2060 = vst.msk [vmem:[#allocation3 + $0xf8] sm:$0xff] %vm2028_vm10, %v1995_v7  ;;  %3403 = vrot.lane.b32.xlu0 %v3907_v55, %s7280_s17 }
 0x29a   : > { %3977 = vrot.lane.b32.xlu1 %v3908_v9, %s5276_s21 }
 0x29b   : > { %v2624_v11 = vpop.permute.xlu0 %2623 }
 0x29c   : > { %2719 = vst.msk [vmem:[#allocation3] sm:$0xff] %vm676_vm3, %v2624_v11  ;;  %v2626_v53 = vpop.permute.xlu1 %2625 }
 0x29d   : > { %2720 = vst.msk [vmem:[#allocation3 + $0x8] sm:$0xff] %vm676_vm3, %v2626_v53  ;;  %2641 = vrot.lane.b32.xlu0 %v3716_v30, %s7279_s14  ;;  %v3912_v53 = vld [vmem:[#allocation2 + $0x9a] sm:$0xff] }
 0x29e   : > { %2831 = vrot.lane.b32.xlu1 %v3907_v55, %s5269_s26  ;;  %v3720_v55 = vld [vmem:[#allocation2 + $0x99] sm:$0xff] }
 0x29f   : > { %v2816_v12 = vpop.permute.xlu0 %2815 }
 0x2a0   : > { %v2091_v17 = vld [vmem:[#allocation3 + $0xf0] sm:$0xff]  ;;  %2911 = vst.msk [vmem:[#allocation3] sm:$0xff] %vm869_vm4, %v2816_v12  ;;  %v2818_v13 = vpop.permute.xlu1 %2817  ;;  %v2092_v14 = vld [vmem:[#allocation3 + $0xf8] sm:$0xff] }
 0x2a1   : > { %5023 = vmatprep.mubr.msk.f32.mxu0 %vm2109_vm11, %v2091_v17  ;;  %2912 = vst.msk [vmem:[#allocation3 + $0x8] sm:$0xff] %vm869_vm4, %v2818_v13  ;;  %3405 = vrot.lane.b32.xlu0 %v3908_v9, %s7280_s17 }
 0x2a2   : > { %5024 = vmatmul.mubr.msk.f32.gmra.mrb[30].mxu0 %vm2109_vm11, %v2092_v14  ;;  %3595 = vrot.lane.b32.xlu1 %v6297_v15, %s5274_s23 }
 0x2a3   : > { %v3008_v2 = vpop.permute.xlu0 %3007  ;;  %5096 = vmatprep.mubr.msk.f32.mxu0 %vm5278_vm13, %v5268_v0 }
 0x2a4   : > { %v3010_v62 = vpop.permute.xlu1 %3009  ;;  %3103 = vst.msk [vmem:[#allocation3] sm:$0xff] %vm1062_vm5, %v3008_v2 }
 0x2a5   : > { %3104 = vst.msk [vmem:[#allocation3 + $0x8] sm:$0xff] %vm1062_vm5, %v3010_v62  ;;  %2833 = vrot.lane.b32.xlu0 %v3908_v9, %s5269_s26 }
 0x2a6   : > { %3023 = vrot.lane.b32.xlu1 %v6297_v15, %s5271_s28 }
 0x2a7   : > { %v3200_v18 = vpop.permute.xlu0 %3199 }
 0x2a8   : > { %3295 = vst.msk [vmem:[#allocation3] sm:$0xff] %vm1255_vm6, %v3200_v18  ;;  %v2628_v20 = vpop.permute.xlu1 %2627 }
 0x2a9   : > { %2721 = vst.msk [vmem:[#allocation3 + $0x10] sm:$0xff] %vm676_vm3, %v2628_v20  ;;  %3597 = vrot.lane.b32.xlu0 %v6302_v16, %s5274_s23 }
 0x2aa   : > { %v5004_v19 = vpop.f32.mrb[16].mxu0  ;;  %3787 = vrot.lane.b32.xlu1 %v3717_v21, %s5275_s24 }
 0x2ab   : > { %v2358_v56 = vadd.f32 %v6459_v1, %v5004_v19  ;;  %v2352_v59 = vpop.f32.mrb[17].mxu0  ;;  %v3202_v15 = vpop.permute.xlu0 %3201 }
 0x2ac   : > { %v2353_v22 = vadd.f32 %v6459_v1, %v2352_v59  ;;  %3296 = vst.msk [vmem:[#allocation3 + $0x8] sm:$0xff] %vm1255_vm6, %v3202_v15  ;;  %v3392_v23 = vpop.permute.xlu1 %3391 }
 0x2ad   : > { %v2448_v27 = vmax.f32 %v2358_v56, 0.0  ;;  %3487 = vst.msk [vmem:[#allocation3] sm:$0xff] %vm1448_vm7, %v3392_v23  ;;  %3025 = vrot.lane.b32.xlu0 %v6302_v16, %s5271_s28 }
 0x2ae   : > { %v2447_v42 = vmax.f32 %v2353_v22, 0.0  ;;  %3215 = vrot.lane.b32.xlu1 %v3717_v21, %s7278_s29 }
 0x2af   : > { %2480 = vst.msk [vmem:[#allocation2 + $0xe1] sm:$0xff] %vm330_vm0, %v2448_v27  ;;  %v2630_v24 = vpop.permute.xlu0 %2629 }
 0x2b0   : > { %2479 = vst.msk [vmem:[#allocation2 + $0xd9] sm:$0xff] %vm330_vm0, %v2447_v42  ;;  %v2820_v25 = vpop.permute.xlu1 %2819 }
 0x2b1   : > { %2722 = vst.msk [vmem:[#allocation3 + $0x18] sm:$0xff] %vm676_vm3, %v2630_v24  ;;  %3789 = vrot.lane.b32.xlu0 %v3718_v28, %s5275_s24 }
 0x2b2   : > { %2913 = vst.msk [vmem:[#allocation3 + $0x10] sm:$0xff] %vm869_vm4, %v2820_v25  ;;  %3979 = vrot.lane.b32.xlu1 %v3909_v26, %s5276_s21 }
 0x2b3   : > { %v3394_v35 = vpop.permute.xlu0 %3393 }
 0x2b4   : > { %3488 = vst.msk [vmem:[#allocation3 + $0x8] sm:$0xff] %vm1448_vm7, %v3394_v35  ;;  %v3584_v16 = vpop.permute.xlu1 %3583 }
 0x2b5   : > { %3679 = vst.msk [vmem:[#allocation3] sm:$0xff] %vm1642_vm8, %v3584_v16  ;;  %2643 = vrot.lane.b32.xlu0 %v3717_v21, %s7279_s14  ;;  %v3721_v21 = vld [vmem:[#allocation2 + $0xa9] sm:$0xff] }
 0x2b6   : > { %3217 = vrot.lane.b32.xlu1 %v3718_v28, %s7278_s29 }
 0x2b7   : > { %v6532_v33 = vld [vmem:[#allocation2 + $0xd8] sm:$0xff]  ;;  %v6534_v37 = vld [vmem:[#allocation2 + $0xe0] sm:$0xff]  ;;  %v2822_v38 = vpop.permute.xlu0 %2821 }
 0x2b8   : > { %2545 = vst.msk [vmem:[#allocation3 + $0x90] sm:$0xff] %vm330_vm0, %v6532_v33  ;;  %2546 = vst.msk [vmem:[#allocation3 + $0x98] sm:$0xff] %vm330_vm0, %v6534_v37  ;;  %v3012_v61 = vpop.permute.xlu1 %3011 }
 0x2b9   : > { %2914 = vst.msk [vmem:[#allocation3 + $0x18] sm:$0xff] %vm869_vm4, %v2822_v38  ;;  %3407 = vrot.lane.b32.xlu0 %v3909_v26, %s7280_s17 }
 0x2ba   : > { %3105 = vst.msk [vmem:[#allocation3 + $0x10] sm:$0xff] %vm1062_vm5, %v3012_v61  ;;  %3981 = vrot.lane.b32.xlu1 %v3910_v39, %s5276_s21 }
 0x2bb   : > { %v3586_v40 = vpop.permute.xlu0 %3585 }
 0x2bc   : > { %3680 = vst.msk [vmem:[#allocation3 + $0x8] sm:$0xff] %vm1642_vm8, %v3586_v40  ;;  %v3776_v41 = vpop.permute.xlu1 %3775 }
 0x2bd   : > { %3871 = vst.msk [vmem:[#allocation3] sm:$0xff] %vm1835_vm9, %v3776_v41  ;;  %2645 = vrot.lane.b32.xlu0 %v3718_v28, %s7279_s14  ;;  %v3722_v28 = vld [vmem:[#allocation2 + $0xb1] sm:$0xff] }
 0x2be   : > { %2835 = vrot.lane.b32.xlu1 %v3909_v26, %s5269_s26  ;;  %v3913_v26 = vld [vmem:[#allocation2 + $0xaa] sm:$0xff]  ;;  %v3914_v41 = vld [vmem:[#allocation2 + $0xb2] sm:$0xff] }
 0x2bf   : > { %v3014_v44 = vpop.permute.xlu0 %3013 }
 0x2c0   : > { %3106 = vst.msk [vmem:[#allocation3 + $0x18] sm:$0xff] %vm1062_vm5, %v3014_v44  ;;  %v3204_v29 = vpop.permute.xlu1 %3203 }
 0x2c1   : > { %3297 = vst.msk [vmem:[#allocation3 + $0x10] sm:$0xff] %vm1255_vm6, %v3204_v29  ;;  %3409 = vrot.lane.b32.xlu0 %v3910_v39, %s7280_s17 }
 0x2c2   : > { %3599 = vrot.lane.b32.xlu1 %v6374_v4, %s5274_s23 }
 0x2c3   : > { %v3778_v36 = vpop.permute.xlu0 %3777 }
 0x2c4   : > { %3872 = vst.msk [vmem:[#allocation3 + $0x8] sm:$0xff] %vm1835_vm9, %v3778_v36  ;;  %v3968_v45 = vpop.permute.xlu1 %3967 }
 0x2c5   : > { %4063 = vst.msk [vmem:[#allocation3] sm:$0xff] %vm2028_vm10, %v3968_v45  ;;  %2837 = vrot.lane.b32.xlu0 %v3910_v39, %s5269_s26 }
 0x2c6   : > { %3027 = vrot.lane.b32.xlu1 %v6374_v4, %s5271_s28 }
 0x2c7   : > { %v2632_v46 = vpop.permute.xlu0 %2631 }
 0x2c8   : > { %v3206_v47 = vpop.permute.xlu1 %3205  ;;  %2723 = vst.msk [vmem:[#allocation3 + $0x20] sm:$0xff] %vm676_vm3, %v2632_v46 }
 0x2c9   : > { %3298 = vst.msk [vmem:[#allocation3 + $0x18] sm:$0xff] %vm1255_vm6, %v3206_v47  ;;  %3601 = vrot.lane.b32.xlu0 %v6379_v10, %s5274_s23 }
 0x2ca   : > { %v5007_v54 = vpop.f32.mrb[18].mxu0  ;;  %3791 = vrot.lane.b32.xlu1 %v3719_v49, %s5275_s24 }
 0x2cb   : > { %v2368_v48 = vadd.f32 %v6459_v1, %v5007_v54  ;;  %v2362_v31 = vpop.f32.mrb[19].mxu0  ;;  %v3396_v4 = vpop.permute.xlu0 %3395 }
 0x2cc   : > { %v2363_v50 = vadd.f32 %v6459_v1, %v2362_v31  ;;  %v3970_v43 = vpop.permute.xlu1 %3969  ;;  %3489 = vst.msk [vmem:[#allocation3 + $0x10] sm:$0xff] %vm1448_vm7, %v3396_v4  ;;  %v4095_v57 = vld [vmem:[#allocation3] sm:$0xff] }
 0x2cd   : > { %v2450_v51 = vmax.f32 %v2368_v48, 0.0  ;;  %4064 = vst.msk [vmem:[#allocation3 + $0x8] sm:$0xff] %vm2028_vm10, %v3970_v43  ;;  %5044 = vmatprep.mubr.msk.f32.mxu1 %vm2109_vm11, %v4095_v57  ;;  %3029 = vrot.lane.b32.xlu0 %v6379_v10, %s5271_s28 }
 0x2ce   : > { %v2449_v52 = vmax.f32 %v2363_v50, 0.0  ;;  %3219 = vrot.lane.b32.xlu1 %v3719_v49, %s7278_s29 }
 0x2cf   : > { %2482 = vst.msk [vmem:[#allocation2 + $0xf9] sm:$0xff] %vm330_vm0, %v2450_v51  ;;  %v2634_v58 = vpop.permute.xlu0 %2633  ;;  %v3723_v51 = vld [vmem:[#allocation2 + $0xc1] sm:$0xff] }
 0x2d0   : > { %2481 = vst.msk [vmem:[#allocation2 + $0xf1] sm:$0xff] %vm330_vm0, %v2449_v52  ;;  %v2824_v30 = vpop.permute.xlu1 %2823 }
 0x2d1   : > { %2724 = vst.msk [vmem:[#allocation3 + $0x28] sm:$0xff] %vm676_vm3, %v2634_v58  ;;  %3793 = vrot.lane.b32.xlu0 %v3720_v55, %s5275_s24 }
 0x2d2   : > { %2915 = vst.msk [vmem:[#allocation3 + $0x20] sm:$0xff] %vm869_vm4, %v2824_v30  ;;  %3983 = vrot.lane.b32.xlu1 %v3911_v63, %s5276_s21 }
 0x2d3   : > { %v3398_v3 = vpop.permute.xlu0 %3397 }
 0x2d4   : > { %v3588_v32 = vpop.permute.xlu1 %3587  ;;  %3490 = vst.msk [vmem:[#allocation3 + $0x18] sm:$0xff] %vm1448_vm7, %v3398_v3  ;;  %v4096_v10 = vld [vmem:[#allocation3 + $0x8] sm:$0xff]  ;;  %v3915_v3 = vld [vmem:[#allocation2 + $0xc2] sm:$0xff] }
 0x2d5   : > { %3681 = vst.msk [vmem:[#allocation3 + $0x10] sm:$0xff] %vm1642_vm8, %v3588_v32  ;;  %5045 = vmatmul.mubr.msk.f32.vlgmr.msra.gmra.mrb[0].mxu1 %vm2109_vm11, %v4096_v10  ;;  %2647 = vrot.lane.b32.xlu0 %v3719_v49, %s7279_s14 }
 0x2d6   : > { %3221 = vrot.lane.b32.xlu1 %v3720_v55, %s7278_s29 }
 0x2d7   : > { %v6582_v6 = vld [vmem:[#allocation2 + $0xf0] sm:$0xff]  ;;  %v6584_v7 = vld [vmem:[#allocation2 + $0xf8] sm:$0xff]  ;;  %v2826_v9 = vpop.permute.xlu0 %2825 }
 0x2d8   : > { %2547 = vst.msk [vmem:[#allocation3 + $0xa0] sm:$0xff] %vm330_vm0, %v6582_v6  ;;  %2548 = vst.msk [vmem:[#allocation3 + $0xa8] sm:$0xff] %vm330_vm0, %v6584_v7  ;;  %v3016_v11 = vpop.permute.xlu1 %3015 }
 0x2d9   : > { %2916 = vst.msk [vmem:[#allocation3 + $0x28] sm:$0xff] %vm869_vm4, %v2826_v9  ;;  %3411 = vrot.lane.b32.xlu0 %v3911_v63, %s7280_s17 }
 0x2da   : > { %3107 = vst.msk [vmem:[#allocation3 + $0x20] sm:$0xff] %vm1062_vm5, %v3016_v11  ;;  %3985 = vrot.lane.b32.xlu1 %v3912_v53, %s5276_s21 }
 0x2db   : > { %v3590_v12 = vpop.permute.xlu0 %3589 }
 0x2dc   : > { %v3780_v17 = vpop.permute.xlu1 %3779  ;;  %3682 = vst.msk [vmem:[#allocation3 + $0x18] sm:$0xff] %vm1642_vm8, %v3590_v12 }
 0x2dd   : > { %3873 = vst.msk [vmem:[#allocation3 + $0x10] sm:$0xff] %vm1835_vm9, %v3780_v17  ;;  %2649 = vrot.lane.b32.xlu0 %v3720_v55, %s7279_s14  ;;  %v3916_v17 = vld [vmem:[#allocation2 + $0xca] sm:$0xff] }
 0x2de   : > { %2839 = vrot.lane.b32.xlu1 %v3911_v63, %s5269_s26  ;;  %v3724_v63 = vld [vmem:[#allocation2 + $0xc9] sm:$0xff] }
 0x2df   : > { %v3018_v13 = vpop.permute.xlu0 %3017 }
 0x2e0   : > { %v3208_v14 = vpop.permute.xlu1 %3207  ;;  %3108 = vst.msk [vmem:[#allocation3 + $0x28] sm:$0xff] %vm1062_vm5, %v3018_v13 }
 0x2e1   : > { %3299 = vst.msk [vmem:[#allocation3 + $0x20] sm:$0xff] %vm1255_vm6, %v3208_v14  ;;  %3413 = vrot.lane.b32.xlu0 %v3912_v53, %s7280_s17 }
 0x2e2   : > { %3603 = vrot.lane.b32.xlu1 %v6424_v60, %s5274_s23 }
 0x2e3   : > { %v3782_v2 = vpop.permute.xlu0 %3781 }
 0x2e4   : > { %v3972_v62 = vpop.permute.xlu1 %3971  ;;  %3874 = vst.msk [vmem:[#allocation3 + $0x18] sm:$0xff] %vm1835_vm9, %v3782_v2 }
 0x2e5   : > { %4065 = vst.msk [vmem:[#allocation3 + $0x10] sm:$0xff] %vm2028_vm10, %v3972_v62  ;;  %2841 = vrot.lane.b32.xlu0 %v3912_v53, %s5269_s26 }
 0x2e6   : > { %3031 = vrot.lane.b32.xlu1 %v6424_v60, %s5271_s28 }
 0x2e7   : > { %v2636_v18 = vpop.permute.xlu0 %2635 }
 0x2e8   : > { %v3210_v19 = vpop.permute.xlu1 %3209  ;;  %2725 = vst.msk [vmem:[#allocation3 + $0x30] sm:$0xff] %vm676_vm3, %v2636_v18 }
 0x2e9   : > { %3300 = vst.msk [vmem:[#allocation3 + $0x28] sm:$0xff] %vm1255_vm6, %v3210_v19  ;;  %3605 = vrot.lane.b32.xlu0 %v6429_v34, %s5274_s23 }
 0x2ea   : > { %v5010_v20 = vpop.f32.mrb[20].mxu0  ;;  %3795 = vrot.lane.b32.xlu1 %v3721_v21, %s5275_s24 }
 0x2eb   : > { %v2378_v56 = vadd.f32 %v6459_v1, %v5010_v20  ;;  %v2372_v59 = vpop.f32.mrb[21].mxu0  ;;  %v3400_v60 = vpop.permute.xlu0 %3399 }
 0x2ec   : > { %v2373_v22 = vadd.f32 %v6459_v1, %v2372_v59  ;;  %v3974_v42 = vpop.permute.xlu1 %3973  ;;  %3491 = vst.msk [vmem:[#allocation3 + $0x20] sm:$0xff] %vm1448_vm7, %v3400_v60  ;;  %v4097_v23 = vld [vmem:[#allocation3 + $0x10] sm:$0xff] }
 0x2ed   : > { %v2452_v27 = vmax.f32 %v2378_v56, 0.0  ;;  %4066 = vst.msk [vmem:[#allocation3 + $0x18] sm:$0xff] %vm2028_vm10, %v3974_v42  ;;  %5047 = vmatprep.mubr.msk.f32.mxu1 %vm2109_vm11, %v4097_v23  ;;  %3033 = vrot.lane.b32.xlu0 %v6429_v34, %s5271_s28 }
 0x2ee   : > { %v2451_v15 = vmax.f32 %v2373_v22, 0.0  ;;  %3223 = vrot.lane.b32.xlu1 %v3721_v21, %s7278_s29 }
 0x2ef   : > { %2484 = vst.msk [vmem:[#allocation2 + $0x111] sm:$0xff] %vm330_vm0, %v2452_v27  ;;  %v2638_v24 = vpop.permute.xlu0 %2637  ;;  %v3725_v27 = vld [vmem:[#allocation2 + $0xd9] sm:$0xff] }
 0x2f0   : > { %2483 = vst.msk [vmem:[#allocation2 + $0x109] sm:$0xff] %vm330_vm0, %v2451_v15  ;;  %v2828_v25 = vpop.permute.xlu1 %2827 }
 0x2f1   : > { %2726 = vst.msk [vmem:[#allocation3 + $0x38] sm:$0xff] %vm676_vm3, %v2638_v24  ;;  %3797 = vrot.lane.b32.xlu0 %v3722_v28, %s5275_s24 }
 0x2f2   : > { %2917 = vst.msk [vmem:[#allocation3 + $0x30] sm:$0xff] %vm869_vm4, %v2828_v25  ;;  %3987 = vrot.lane.b32.xlu1 %v3913_v26, %s5276_s21 }
 0x2f3   : > { %v3402_v35 = vpop.permute.xlu0 %3401 }
 0x2f4   : > { %v3592_v16 = vpop.permute.xlu1 %3591  ;;  %3492 = vst.msk [vmem:[#allocation3 + $0x28] sm:$0xff] %vm1448_vm7, %v3402_v35  ;;  %v4098_v34 = vld [vmem:[#allocation3 + $0x18] sm:$0xff]  ;;  %v3917_v35 = vld [vmem:[#allocation2 + $0xda] sm:$0xff] }
 0x2f5   : > { %3683 = vst.msk [vmem:[#allocation3 + $0x20] sm:$0xff] %vm1642_vm8, %v3592_v16  ;;  %5048 = vmatmul.mubr.msk.f32.gmra.mrb[2].mxu1 %vm2109_vm11, %v4098_v34  ;;  %2651 = vrot.lane.b32.xlu0 %v3721_v21, %s7279_s14 }
 0x2f6   : > { %3225 = vrot.lane.b32.xlu1 %v3722_v28, %s7278_s29 }
 0x2f7   : > { %v6632_v38 = vld [vmem:[#allocation2 + $0x108] sm:$0xff]  ;;  %v6634_v61 = vld [vmem:[#allocation2 + $0x110] sm:$0xff]  ;;  %v2830_v39 = vpop.permute.xlu0 %2829 }
 0x2f8   : > { %2549 = vst.msk [vmem:[#allocation3 + $0xb0] sm:$0xff] %vm330_vm0, %v6632_v38  ;;  %2550 = vst.msk [vmem:[#allocation3 + $0xb8] sm:$0xff] %vm330_vm0, %v6634_v61  ;;  %v3020_v40 = vpop.permute.xlu1 %3019 }
 0x2f9   : > { %2918 = vst.msk [vmem:[#allocation3 + $0x38] sm:$0xff] %vm869_vm4, %v2830_v39  ;;  %3415 = vrot.lane.b32.xlu0 %v3913_v26, %s7280_s17 }
 0x2fa   : > { %3109 = vst.msk [vmem:[#allocation3 + $0x30] sm:$0xff] %vm1062_vm5, %v3020_v40  ;;  %3989 = vrot.lane.b32.xlu1 %v3914_v41, %s5276_s21 }
 0x2fb   : > { %v3594_v44 = vpop.permute.xlu0 %3593 }
 0x2fc   : > { %v3784_v29 = vpop.permute.xlu1 %3783  ;;  %3684 = vst.msk [vmem:[#allocation3 + $0x28] sm:$0xff] %vm1642_vm8, %v3594_v44 }
 0x2fd   : > { %3875 = vst.msk [vmem:[#allocation3 + $0x20] sm:$0xff] %vm1835_vm9, %v3784_v29  ;;  %2653 = vrot.lane.b32.xlu0 %v3722_v28, %s7279_s14  ;;  %v3918_v29 = vld [vmem:[#allocation2 + $0xe2] sm:$0xff] }
 0x2fe   : > { %2843 = vrot.lane.b32.xlu1 %v3913_v26, %s5269_s26  ;;  %v3726_v26 = vld [vmem:[#allocation2 + $0xe1] sm:$0xff] }
 0x2ff   : > { %v3022_v36 = vpop.permute.xlu0 %3021 }
 0x300   : > { %v3212_v45 = vpop.permute.xlu1 %3211  ;;  %3110 = vst.msk [vmem:[#allocation3 + $0x38] sm:$0xff] %vm1062_vm5, %v3022_v36 }
 0x301   : > { %3301 = vst.msk [vmem:[#allocation3 + $0x30] sm:$0xff] %vm1255_vm6, %v3212_v45  ;;  %3417 = vrot.lane.b32.xlu0 %v3914_v41, %s7280_s17 }
 0x302   : > { %3607 = vrot.lane.b32.xlu1 %v6482_v5, %s5274_s23 }
 0x303   : > { %v3786_v46 = vpop.permute.xlu0 %3785 }
 0x304   : > { %v3976_v54 = vpop.permute.xlu1 %3975  ;;  %3876 = vst.msk [vmem:[#allocation3 + $0x28] sm:$0xff] %vm1835_vm9, %v3786_v46 }
 0x305   : > { %4067 = vst.msk [vmem:[#allocation3 + $0x20] sm:$0xff] %vm2028_vm10, %v3976_v54  ;;  %2845 = vrot.lane.b32.xlu0 %v3914_v41, %s5269_s26 }
 0x306   : > { %3035 = vrot.lane.b32.xlu1 %v6482_v5, %s5271_s28 }
 0x307   : > { %v2640_v47 = vpop.permute.xlu0 %2639 }
 0x308   : > { %v3214_v31 = vpop.permute.xlu1 %3213  ;;  %2727 = vst.msk [vmem:[#allocation3 + $0x40] sm:$0xff] %vm676_vm3, %v2640_v47 }
 0x309   : > { %3302 = vst.msk [vmem:[#allocation3 + $0x38] sm:$0xff] %vm1255_vm6, %v3214_v31  ;;  %3609 = vrot.lane.b32.xlu0 %v6484_v8, %s5274_s23 }
 0x30a   : > { %v5013_v48 = vpop.f32.mrb[22].mxu0  ;;  %3799 = vrot.lane.b32.xlu1 %v3723_v51, %s5275_s24 }
 0x30b   : > { %v2388_v49 = vadd.f32 %v6459_v1, %v5013_v48  ;;  %v2382_v50 = vpop.f32.mrb[23].mxu0  ;;  %v3404_v5 = vpop.permute.xlu0 %3403 }
 0x30c   : > { %v2383_v4 = vadd.f32 %v6459_v1, %v2382_v50  ;;  %v3978_v57 = vpop.permute.xlu1 %3977  ;;  %3493 = vst.msk [vmem:[#allocation3 + $0x30] sm:$0xff] %vm1448_vm7, %v3404_v5  ;;  %v4099_v58 = vld [vmem:[#allocation3 + $0x20] sm:$0xff] }
 0x30d   : > { %v2454_v52 = vmax.f32 %v2388_v49, 0.0  ;;  %4068 = vst.msk [vmem:[#allocation3 + $0x28] sm:$0xff] %vm2028_vm10, %v3978_v57  ;;  %5050 = vmatprep.mubr.msk.f32.mxu1 %vm2109_vm11, %v4099_v58  ;;  %3037 = vrot.lane.b32.xlu0 %v6484_v8, %s5271_s28 }
 0x30e   : > { %v2453_v43 = vmax.f32 %v2383_v4, 0.0  ;;  %3227 = vrot.lane.b32.xlu1 %v3723_v51, %s7278_s29 }
 0x30f   : > { %2486 = vst.msk [vmem:[#allocation2 + $0x129] sm:$0xff] %vm330_vm0, %v2454_v52  ;;  %v2642_v30 = vpop.permute.xlu0 %2641  ;;  %v3727_v52 = vld [vmem:[#allocation2 + $0xf1] sm:$0xff] }
 0x310   : > { %2485 = vst.msk [vmem:[#allocation2 + $0x121] sm:$0xff] %vm330_vm0, %v2453_v43  ;;  %v2832_v55 = vpop.permute.xlu1 %2831 }
 0x311   : > { %2728 = vst.msk [vmem:[#allocation3 + $0x48] sm:$0xff] %vm676_vm3, %v2642_v30  ;;  %3801 = vrot.lane.b32.xlu0 %v3724_v63, %s5275_s24 }
 0x312   : > { %2919 = vst.msk [vmem:[#allocation3 + $0x40] sm:$0xff] %vm869_vm4, %v2832_v55  ;;  %3991 = vrot.lane.b32.xlu1 %v3915_v3, %s5276_s21 }
 0x313   : > { %v3406_v32 = vpop.permute.xlu0 %3405 }
 0x314   : > { %v3596_v10 = vpop.permute.xlu1 %3595  ;;  %3494 = vst.msk [vmem:[#allocation3 + $0x38] sm:$0xff] %vm1448_vm7, %v3406_v32  ;;  %v4100_v8 = vld [vmem:[#allocation3 + $0x28] sm:$0xff] }
 0x315   : > { %3685 = vst.msk [vmem:[#allocation3 + $0x30] sm:$0xff] %vm1642_vm8, %v3596_v10  ;;  %5051 = vmatmul.mubr.msk.f32.gmra.mrb[4].mxu1 %vm2109_vm11, %v4100_v8  ;;  %2655 = vrot.lane.b32.xlu0 %v3723_v51, %s7279_s14  ;;  %v3919_v32 = vld [vmem:[#allocation2 + $0xf2] sm:$0xff] }
 0x316   : > { %3229 = vrot.lane.b32.xlu1 %v3724_v63, %s7278_s29 }
 0x317   : > { %v6682_v9 = vld [vmem:[#allocation2 + $0x120] sm:$0xff]  ;;  %v6684_v11 = vld [vmem:[#allocation2 + $0x128] sm:$0xff]  ;;  %v2834_v53 = vpop.permute.xlu0 %2833 }
 0x318   : > { %2551 = vst.msk [vmem:[#allocation3 + $0xc0] sm:$0xff] %vm330_vm0, %v6682_v9  ;;  %2552 = vst.msk [vmem:[#allocation3 + $0xc8] sm:$0xff] %vm330_vm0, %v6684_v11  ;;  %v3024_v12 = vpop.permute.xlu1 %3023 }
 0x319   : > { %2920 = vst.msk [vmem:[#allocation3 + $0x48] sm:$0xff] %vm869_vm4, %v2834_v53  ;;  %3419 = vrot.lane.b32.xlu0 %v3915_v3, %s7280_s17 }
 0x31a   : > { %3111 = vst.msk [vmem:[#allocation3 + $0x40] sm:$0xff] %vm1062_vm5, %v3024_v12  ;;  %3993 = vrot.lane.b32.xlu1 %v3916_v17, %s5276_s21 }
 0x31b   : > { %v3598_v13 = vpop.permute.xlu0 %3597 }
 0x31c   : > { %v3788_v14 = vpop.permute.xlu1 %3787  ;;  %3686 = vst.msk [vmem:[#allocation3 + $0x38] sm:$0xff] %vm1642_vm8, %v3598_v13 }
 0x31d   : > { %3877 = vst.msk [vmem:[#allocation3 + $0x30] sm:$0xff] %vm1835_vm9, %v3788_v14  ;;  %2657 = vrot.lane.b32.xlu0 %v3724_v63, %s7279_s14  ;;  %v3920_v14 = vld [vmem:[#allocation2 + $0xfa] sm:$0xff] }
 0x31e   : > { %2847 = vrot.lane.b32.xlu1 %v3915_v3, %s5269_s26  ;;  %v3728_v3 = vld [vmem:[#allocation2 + $0xf9] sm:$0xff] }
 0x31f   : > { %v3026_v2 = vpop.permute.xlu0 %3025 }
 0x320   : > { %v3216_v62 = vpop.permute.xlu1 %3215  ;;  %3112 = vst.msk [vmem:[#allocation3 + $0x48] sm:$0xff] %vm1062_vm5, %v3026_v2 }
 0x321   : > { %3303 = vst.msk [vmem:[#allocation3 + $0x40] sm:$0xff] %vm1255_vm6, %v3216_v62  ;;  %3421 = vrot.lane.b32.xlu0 %v3916_v17, %s7280_s17 }
 0x322   : > { %3611 = vrot.lane.b32.xlu1 %v6532_v33, %s5274_s23 }
 0x323   : > { %v3790_v18 = vpop.permute.xlu0 %3789 }
 0x324   : > { %v3980_v20 = vpop.permute.xlu1 %3979  ;;  %3878 = vst.msk [vmem:[#allocation3 + $0x38] sm:$0xff] %vm1835_vm9, %v3790_v18 }
 0x325   : > { %4069 = vst.msk [vmem:[#allocation3 + $0x30] sm:$0xff] %vm2028_vm10, %v3980_v20  ;;  %2849 = vrot.lane.b32.xlu0 %v3916_v17, %s5269_s26 }
 0x326   : > { %3039 = vrot.lane.b32.xlu1 %v6532_v33, %s5271_s28 }
 0x327   : > { %v2644_v19 = vpop.permute.xlu0 %2643 }
 0x328   : > { %v3218_v59 = vpop.permute.xlu1 %3217  ;;  %2729 = vst.msk [vmem:[#allocation3 + $0x50] sm:$0xff] %vm676_vm3, %v2644_v19 }
 0x329   : > { %3304 = vst.msk [vmem:[#allocation3 + $0x48] sm:$0xff] %vm1255_vm6, %v3218_v59  ;;  %3613 = vrot.lane.b32.xlu0 %v6534_v37, %s5274_s23 }
 0x32a   : > { %v5016_v56 = vpop.f32.mrb[24].mxu0  ;;  %3803 = vrot.lane.b32.xlu1 %v3725_v27, %s5275_s24 }
 0x32b   : > { %v2398_v21 = vadd.f32 %v6459_v1, %v5016_v56  ;;  %v2392_v22 = vpop.f32.mrb[25].mxu0  ;;  %v3408_v33 = vpop.permute.xlu0 %3407 }
 0x32c   : > { %v2393_v60 = vadd.f32 %v6459_v1, %v2392_v22  ;;  %v3982_v23 = vpop.permute.xlu1 %3981  ;;  %3495 = vst.msk [vmem:[#allocation3 + $0x40] sm:$0xff] %vm1448_vm7, %v3408_v33  ;;  %v4101_v24 = vld [vmem:[#allocation3 + $0x30] sm:$0xff]  ;;  %v3729_v33 = vld [vmem:[#allocation2 + $0x109] sm:$0xff] }
 0x32d   : > { %v2456_v15 = vmax.f32 %v2398_v21, 0.0  ;;  %4070 = vst.msk [vmem:[#allocation3 + $0x38] sm:$0xff] %vm2028_vm10, %v3982_v23  ;;  %5053 = vmatprep.mubr.msk.f32.mxu1 %vm2109_vm11, %v4101_v24  ;;  %3041 = vrot.lane.b32.xlu0 %v6534_v37, %s5271_s28 }
 0x32e   : > { %v2455_v42 = vmax.f32 %v2393_v60, 0.0  ;;  %3231 = vrot.lane.b32.xlu1 %v3725_v27, %s7278_s29 }
 0x32f   : > { %2488 = vst.msk [vmem:[#allocation2 + $0x141] sm:$0xff] %vm330_vm0, %v2456_v15  ;;  %v2646_v25 = vpop.permute.xlu0 %2645 }
 0x330   : > { %2487 = vst.msk [vmem:[#allocation2 + $0x139] sm:$0xff] %vm330_vm0, %v2455_v42  ;;  %v2836_v28 = vpop.permute.xlu1 %2835 }
 0x331   : > { %2730 = vst.msk [vmem:[#allocation3 + $0x58] sm:$0xff] %vm676_vm3, %v2646_v25  ;;  %3805 = vrot.lane.b32.xlu0 %v3726_v26, %s5275_s24 }
 0x332   : > { %2921 = vst.msk [vmem:[#allocation3 + $0x50] sm:$0xff] %vm869_vm4, %v2836_v28  ;;  %3995 = vrot.lane.b32.xlu1 %v3917_v35, %s5276_s21 }
 0x333   : > { %v3410_v16 = vpop.permute.xlu0 %3409 }
 0x334   : > { %v3600_v34 = vpop.permute.xlu1 %3599  ;;  %3496 = vst.msk [vmem:[#allocation3 + $0x48] sm:$0xff] %vm1448_vm7, %v3410_v16  ;;  %v4102_v37 = vld [vmem:[#allocation3 + $0x38] sm:$0xff] }
 0x335   : > { %3687 = vst.msk [vmem:[#allocation3 + $0x40] sm:$0xff] %vm1642_vm8, %v3600_v34  ;;  %5054 = vmatmul.mubr.msk.f32.gmra.mrb[6].mxu1 %vm2109_vm11, %v4102_v37  ;;  %2659 = vrot.lane.b32.xlu0 %v3725_v27, %s7279_s14  ;;  %v3921_v16 = vld [vmem:[#allocation2 + $0x10a] sm:$0xff] }
 0x336   : > { %3233 = vrot.lane.b32.xlu1 %v3726_v26, %s7278_s29 }
 0x337   : > { %v6732_v39 = vld [vmem:[#allocation2 + $0x138] sm:$0xff]  ;;  %v6734_v40 = vld [vmem:[#allocation2 + $0x140] sm:$0xff]  ;;  %v2838_v41 = vpop.permute.xlu0 %2837 }
 0x338   : > { %2553 = vst.msk [vmem:[#allocation3 + $0xd0] sm:$0xff] %vm330_vm0, %v6732_v39  ;;  %2554 = vst.msk [vmem:[#allocation3 + $0xd8] sm:$0xff] %vm330_vm0, %v6734_v40  ;;  %v3028_v44 = vpop.permute.xlu1 %3027 }
 0x339   : > { %2922 = vst.msk [vmem:[#allocation3 + $0x58] sm:$0xff] %vm869_vm4, %v2838_v41  ;;  %3423 = vrot.lane.b32.xlu0 %v3917_v35, %s7280_s17 }
 0x33a   : > { %3113 = vst.msk [vmem:[#allocation3 + $0x50] sm:$0xff] %vm1062_vm5, %v3028_v44  ;;  %3997 = vrot.lane.b32.xlu1 %v3918_v29, %s5276_s21 }
 0x33b   : > { %v3602_v36 = vpop.permute.xlu0 %3601 }
 0x33c   : > { %v3792_v45 = vpop.permute.xlu1 %3791  ;;  %3688 = vst.msk [vmem:[#allocation3 + $0x48] sm:$0xff] %vm1642_vm8, %v3602_v36 }
 0x33d   : > { %3879 = vst.msk [vmem:[#allocation3 + $0x40] sm:$0xff] %vm1835_vm9, %v3792_v45  ;;  %2661 = vrot.lane.b32.xlu0 %v3726_v26, %s7279_s14 }
 0x33e   : > { %2851 = vrot.lane.b32.xlu1 %v3917_v35, %s5269_s26  ;;  %v3730_v35 = vld [vmem:[#allocation2 + $0x111] sm:$0xff] }
 0x33f   : > { %v3030_v46 = vpop.permute.xlu0 %3029 }
 0x340   : > { %v3220_v54 = vpop.permute.xlu1 %3219  ;;  %3114 = vst.msk [vmem:[#allocation3 + $0x58] sm:$0xff] %vm1062_vm5, %v3030_v46  ;;  %v5202_v46 = vld [vmem:[%s7262_s2] ss:$0 sm:$0xff] }
 0x341   : > { %3305 = vst.msk [vmem:[#allocation3 + $0x50] sm:$0xff] %vm1255_vm6, %v3220_v54  ;;  %3425 = vrot.lane.b32.xlu0 %v3918_v29, %s7280_s17 }
 0x342   : > { %3615 = vrot.lane.b32.xlu1 %v6582_v6, %s5274_s23 }
 0x343   : > { %v3794_v47 = vpop.permute.xlu0 %3793 }
 0x344   : > { %v3984_v48 = vpop.permute.xlu1 %3983  ;;  %3880 = vst.msk [vmem:[#allocation3 + $0x48] sm:$0xff] %vm1835_vm9, %v3794_v47 }
 0x345   : > { %4071 = vst.msk [vmem:[#allocation3 + $0x40] sm:$0xff] %vm2028_vm10, %v3984_v48  ;;  %2853 = vrot.lane.b32.xlu0 %v3918_v29, %s5269_s26 }
 0x346   : > { %3043 = vrot.lane.b32.xlu1 %v6582_v6, %s5271_s28 }
 0x347   : > { %v2648_v31 = vpop.permute.xlu0 %2647 }
 0x348   : > { %v3222_v50 = vpop.permute.xlu1 %3221  ;;  %2731 = vst.msk [vmem:[#allocation3 + $0x60] sm:$0xff] %vm676_vm3, %v2648_v31 }
 0x349   : > { %3306 = vst.msk [vmem:[#allocation3 + $0x58] sm:$0xff] %vm1255_vm6, %v3222_v50  ;;  %3617 = vrot.lane.b32.xlu0 %v6584_v7, %s5274_s23 }
 0x34a   : > { %v5019_v49 = vpop.f32.mrb[26].mxu0  ;;  %3807 = vrot.lane.b32.xlu1 %v3727_v52, %s5275_s24 }
 0x34b   : > { %v2408_v51 = vadd.f32 %v6459_v1, %v5019_v49  ;;  %v2402_v4 = vpop.f32.mrb[27].mxu0  ;;  %v3412_v6 = vpop.permute.xlu0 %3411  ;;  %v3922_v49 = vld [vmem:[#allocation2 + $0x112] sm:$0xff] }
 0x34c   : > { %v2403_v5 = vadd.f32 %v6459_v1, %v2402_v4  ;;  %v3986_v58 = vpop.permute.xlu1 %3985  ;;  %3497 = vst.msk [vmem:[#allocation3 + $0x50] sm:$0xff] %vm1448_vm7, %v3412_v6  ;;  %v4103_v30 = vld [vmem:[#allocation3 + $0x40] sm:$0xff] }
 0x34d   : > { %v2458_v43 = vmax.f32 %v2408_v51, 0.0  ;;  %4072 = vst.msk [vmem:[#allocation3 + $0x48] sm:$0xff] %vm2028_vm10, %v3986_v58  ;;  %5056 = vmatprep.mubr.msk.f32.mxu1 %vm2109_vm11, %v4103_v30  ;;  %3045 = vrot.lane.b32.xlu0 %v6584_v7, %s5271_s28  ;;  %v3731_v58 = vld [vmem:[#allocation2 + $0x121] sm:$0xff] }
 0x34e   : > { %v2457_v57 = vmax.f32 %v2403_v5, 0.0  ;;  %3235 = vrot.lane.b32.xlu1 %v3727_v52, %s7278_s29 }
 0x34f   : > { %2490 = vst.msk [vmem:[#allocation2 + $0x159] sm:$0xff] %vm330_vm0, %v2458_v43  ;;  %v2650_v55 = vpop.permute.xlu0 %2649 }
 0x350   : > { %2489 = vst.msk [vmem:[#allocation2 + $0x151] sm:$0xff] %vm330_vm0, %v2457_v57  ;;  %v2840_v63 = vpop.permute.xlu1 %2839 }
 0x351   : > { %2732 = vst.msk [vmem:[#allocation3 + $0x68] sm:$0xff] %vm676_vm3, %v2650_v55  ;;  %3809 = vrot.lane.b32.xlu0 %v3728_v3, %s5275_s24 }
 0x352   : > { %2923 = vst.msk [vmem:[#allocation3 + $0x60] sm:$0xff] %vm869_vm4, %v2840_v63  ;;  %3999 = vrot.lane.b32.xlu1 %v3919_v32, %s5276_s21 }
 0x353   : > { %v3414_v10 = vpop.permute.xlu0 %3413 }
 0x354   : > { %v3604_v8 = vpop.permute.xlu1 %3603  ;;  %3498 = vst.msk [vmem:[#allocation3 + $0x58] sm:$0xff] %vm1448_vm7, %v3414_v10  ;;  %v4104_v7 = vld [vmem:[#allocation3 + $0x48] sm:$0xff]  ;;  %v3923_v10 = vld [vmem:[#allocation2 + $0x122] sm:$0xff] }
 0x355   : > { %3689 = vst.msk [vmem:[#allocation3 + $0x50] sm:$0xff] %vm1642_vm8, %v3604_v8  ;;  %5057 = vmatmul.mubr.msk.f32.gmra.mrb[8].mxu1 %vm2109_vm11, %v4104_v7  ;;  %2663 = vrot.lane.b32.xlu0 %v3727_v52, %s7279_s14 }
 0x356   : > { %3237 = vrot.lane.b32.xlu1 %v3728_v3, %s7278_s29 }
 0x357   : > { %v6782_v53 = vld [vmem:[#allocation2 + $0x150] sm:$0xff]  ;;  %v6784_v12 = vld [vmem:[#allocation2 + $0x158] sm:$0xff]  ;;  %v2842_v17 = vpop.permute.xlu0 %2841 }
 0x358   : > { %2555 = vst.msk [vmem:[#allocation3 + $0xe0] sm:$0xff] %vm330_vm0, %v6782_v53  ;;  %2556 = vst.msk [vmem:[#allocation3 + $0xe8] sm:$0xff] %vm330_vm0, %v6784_v12  ;;  %v3032_v13 = vpop.permute.xlu1 %3031 }
 0x359   : > { %2924 = vst.msk [vmem:[#allocation3 + $0x68] sm:$0xff] %vm869_vm4, %v2842_v17  ;;  %3427 = vrot.lane.b32.xlu0 %v3919_v32, %s7280_s17 }
 0x35a   : > { %3115 = vst.msk [vmem:[#allocation3 + $0x60] sm:$0xff] %vm1062_vm5, %v3032_v13  ;;  %4001 = vrot.lane.b32.xlu1 %v3920_v14, %s5276_s21 }
 0x35b   : > { %v3606_v2 = vpop.permute.xlu0 %3605 }
 0x35c   : > { %v3796_v62 = vpop.permute.xlu1 %3795  ;;  %3690 = vst.msk [vmem:[#allocation3 + $0x58] sm:$0xff] %vm1642_vm8, %v3606_v2 }
 0x35d   : > { %3881 = vst.msk [vmem:[#allocation3 + $0x50] sm:$0xff] %vm1835_vm9, %v3796_v62  ;;  %2665 = vrot.lane.b32.xlu0 %v3728_v3, %s7279_s14 }
 0x35e   : > { %2855 = vrot.lane.b32.xlu1 %v3919_v32, %s5269_s26  ;;  %v3732_v32 = vld [vmem:[#allocation2 + $0x129] sm:$0xff] }
 0x35f   : > { %v3034_v18 = vpop.permute.xlu0 %3033 }
 0x360   : > { %v3224_v20 = vpop.permute.xlu1 %3223  ;;  %3116 = vst.msk [vmem:[#allocation3 + $0x68] sm:$0xff] %vm1062_vm5, %v3034_v18 }
 0x361   : > { %3307 = vst.msk [vmem:[#allocation3 + $0x60] sm:$0xff] %vm1255_vm6, %v3224_v20  ;;  %3429 = vrot.lane.b32.xlu0 %v3920_v14, %s7280_s17 }
 0x362   : > { %3619 = vrot.lane.b32.xlu1 %v6632_v38, %s5274_s23 }
 0x363   : > { %v3798_v19 = vpop.permute.xlu0 %3797 }
 0x364   : > { %v3988_v56 = vpop.permute.xlu1 %3987  ;;  %3882 = vst.msk [vmem:[#allocation3 + $0x58] sm:$0xff] %vm1835_vm9, %v3798_v19 }
 0x365   : > { %4073 = vst.msk [vmem:[#allocation3 + $0x50] sm:$0xff] %vm2028_vm10, %v3988_v56  ;;  %2857 = vrot.lane.b32.xlu0 %v3920_v14, %s5269_s26  ;;  %v3924_v14 = vld [vmem:[#allocation2 + $0x12a] sm:$0xff] }
 0x366   : > { %3047 = vrot.lane.b32.xlu1 %v6632_v38, %s5271_s28 }
 0x367   : > { %v5022_v59 = vpop.f32.mrb[28].mxu0  ;;  %v2652_v21 = vpop.permute.xlu0 %2651 }
 0x368   : > { %v2418_v22 = vadd.f32 %v6459_v1, %v5022_v59  ;;  %v3226_v27 = vpop.permute.xlu1 %3225  ;;  %2733 = vst.msk [vmem:[#allocation3 + $0x70] sm:$0xff] %vm676_vm3, %v2652_v21  ;;  %v2412_v60 = vpop.f32.mrb[29].mxu0  ;;  %v6906_v59 = vld [vmem:[%s7264_s4] ss:$0 sm:$0xff] }
 0x369   : > { %3308 = vst.msk [vmem:[#allocation3 + $0x68] sm:$0xff] %vm1255_vm6, %v3226_v27  ;;  %v2413_v15 = vadd.f32 %v6459_v1, %v2412_v60  ;;  %3621 = vrot.lane.b32.xlu0 %v6634_v61, %s5274_s23 }
 0x36a   : > { %v2460_v42 = vmax.f32 %v2418_v22, 0.0  ;;  %3811 = vrot.lane.b32.xlu1 %v3729_v33, %s5275_s24 }
 0x36b   : > { %v2459_v38 = vmax.f32 %v2413_v15, 0.0  ;;  %v3416_v23 = vpop.permute.xlu0 %3415 }
 0x36c   : > { %2492 = vst.msk [vmem:[#allocation2 + $0x171] sm:$0xff] %vm330_vm0, %v2460_v42  ;;  %v3990_v24 = vpop.permute.xlu1 %3989  ;;  %v4105_v25 = vld [vmem:[#allocation3 + $0x50] sm:$0xff] }
 0x36d   : > { %3499 = vst.msk [vmem:[#allocation3 + $0x60] sm:$0xff] %vm1448_vm7, %v3416_v23  ;;  %5059 = vmatprep.mubr.msk.f32.mxu1 %vm2109_vm11, %v4105_v25  ;;  %3049 = vrot.lane.b32.xlu0 %v6634_v61, %s5271_s28 }
 0x36e   : > { %2491 = vst.msk [vmem:[#allocation2 + $0x169] sm:$0xff] %vm330_vm0, %v2459_v38  ;;  %3239 = vrot.lane.b32.xlu1 %v3729_v33, %s7278_s29 }
 0x36f   : > { %4074 = vst.msk [vmem:[#allocation3 + $0x58] sm:$0xff] %vm2028_vm10, %v3990_v24  ;;  %v2654_v28 = vpop.permute.xlu0 %2653 }
 0x370   : > { %v2844_v26 = vpop.permute.xlu1 %2843  ;;  %2734 = vst.msk [vmem:[#allocation3 + $0x78] sm:$0xff] %vm676_vm3, %v2654_v28 }
 0x371   : > { %2925 = vst.msk [vmem:[#allocation3 + $0x70] sm:$0xff] %vm869_vm4, %v2844_v26  ;;  %3813 = vrot.lane.b32.xlu0 %v3730_v35, %s5275_s24 }
 0x372   : > { %4003 = vrot.lane.b32.xlu1 %v3921_v16, %s5276_s21 }
 0x373   : > { %v3418_v34 = vpop.permute.xlu0 %3417 }
 0x374   : > { %v3608_v37 = vpop.permute.xlu1 %3607  ;;  %3500 = vst.msk [vmem:[#allocation3 + $0x68] sm:$0xff] %vm1448_vm7, %v3418_v34 }
 0x375   : > { %v5025_v41 = vpop.f32.mrb[30].mxu0  ;;  %v6829_v44 = vld [vmem:[#allocation2 + $0x168] sm:$0xff]  ;;  %3691 = vst.msk [vmem:[#allocation3 + $0x60] sm:$0xff] %vm1642_vm8, %v3608_v37  ;;  %2667 = vrot.lane.b32.xlu0 %v3729_v33, %s7279_s14  ;;  %v6835_v45 = vld [vmem:[#allocation2 + $0x170] sm:$0xff]  ;;  %v3733_v33 = vld [vmem:[#allocation2 + $0x139] sm:$0xff] }
 0x376   : > { %v4106_v61 = vld [vmem:[#allocation3 + $0x58] sm:$0xff]  ;;  %v2428_v29 = vadd.f32 %v6459_v1, %v5025_v41  ;;  %v2422_v36 = vpop.f32.mrb[31].mxu0  ;;  %2557 = vst.msk [vmem:[#allocation3 + $0xf0] sm:$0xff] %vm330_vm0, %v6829_v44  ;;  %3241 = vrot.lane.b32.xlu1 %v3730_v35, %s7278_s29  ;;  %2558 = vst.msk [vmem:[#allocation3 + $0xf8] sm:$0xff] %vm330_vm0, %v6835_v45  ;;  %v3925_v41 = vld [vmem:[#allocation2 + $0x13a] sm:$0xff] }
 0x377   : > { %5060 = vmatmul.mubr.msk.f32.gmra.mrb[10].mxu1 %vm2109_vm11, %v4106_v61  ;;  %v2423_v54 = vadd.f32 %v5202_v46, %v2422_v36  ;;  %v2846_v47 = vpop.permute.xlu0 %2845  ;;  %v3734_v37 = vld [vmem:[#allocation2 + $0x141] sm:$0xff] }
 0x378   : > { %v2462_v1 = vmax.f32 %v2428_v29, 0.0  ;;  %v3036_v31 = vpop.permute.xlu1 %3035  ;;  %2926 = vst.msk [vmem:[#allocation3 + $0x78] sm:$0xff] %vm869_vm4, %v2846_v47 }
 0x379   : > { %v2461_v48 = vmax.f32 %v2423_v54, 0.0  ;;  %3117 = vst.msk [vmem:[#allocation3 + $0x70] sm:$0xff] %vm1062_vm5, %v3036_v31  ;;  %3431 = vrot.lane.b32.xlu0 %v3921_v16, %s7280_s17  ;;  %v3926_v54 = vld [vmem:[#allocation2 + $0x142] sm:$0xff] }
 0x37a   : > { %2494 = vst.msk [vmem:[#allocation2 + $0x189] sm:$0xff] %vm330_vm0, %v2462_v1  ;;  %4005 = vrot.lane.b32.xlu1 %v3922_v49, %s5276_s21 }
 0x37b   : > { %2493 = vst.msk [vmem:[#allocation2 + $0x181] sm:$0xff] %vm330_vm0, %v2461_v48  ;;  %v3610_v50 = vpop.permute.xlu0 %3609 }
 0x37c   : > { %v3800_v51 = vpop.permute.xlu1 %3799  ;;  %3692 = vst.msk [vmem:[#allocation3 + $0x68] sm:$0xff] %vm1642_vm8, %v3610_v50 }
 0x37d   : > { %3883 = vst.msk [vmem:[#allocation3 + $0x60] sm:$0xff] %vm1835_vm9, %v3800_v51  ;;  %2669 = vrot.lane.b32.xlu0 %v3730_v35, %s7279_s14 }
 0x37e   : > { %2859 = vrot.lane.b32.xlu1 %v3921_v16, %s5269_s26 }
 0x37f   : > { %v3038_v4 = vpop.permute.xlu0 %3037 }
 0x380   : > { %v3228_v52 = vpop.permute.xlu1 %3227  ;;  %3118 = vst.msk [vmem:[#allocation3 + $0x78] sm:$0xff] %vm1062_vm5, %v3038_v4 }
 0x381   : > { %3309 = vst.msk [vmem:[#allocation3 + $0x70] sm:$0xff] %vm1255_vm6, %v3228_v52  ;;  %3433 = vrot.lane.b32.xlu0 %v3922_v49, %s7280_s17 }
 0x382   : > { %3623 = vrot.lane.b32.xlu1 %v6682_v9, %s5274_s23 }
 0x383   : > { %v3802_v5 = vpop.permute.xlu0 %3801 }
 0x384   : > { %v3992_v43 = vpop.permute.xlu1 %3991  ;;  %3884 = vst.msk [vmem:[#allocation3 + $0x68] sm:$0xff] %vm1835_vm9, %v3802_v5 }
 0x385   : > { %4075 = vst.msk [vmem:[#allocation3 + $0x60] sm:$0xff] %vm2028_vm10, %v3992_v43  ;;  %2861 = vrot.lane.b32.xlu0 %v3922_v49, %s5269_s26 }
 0x386   : > { %3051 = vrot.lane.b32.xlu1 %v6682_v9, %s5271_s28 }
 0x387   : > { %v2656_v6 = vpop.permute.xlu0 %2655 }
 0x388   : > { %v3230_v57 = vpop.permute.xlu1 %3229  ;;  %2735 = vst.msk [vmem:[#allocation3 + $0x80] sm:$0xff] %vm676_vm3, %v2656_v6  ;;  %v3735_v6 = vld [vmem:[#allocation2 + $0x151] sm:$0xff] }
 0x389   : > { %3310 = vst.msk [vmem:[#allocation3 + $0x78] sm:$0xff] %vm1255_vm6, %v3230_v57  ;;  %3625 = vrot.lane.b32.xlu0 %v6684_v11, %s5274_s23 }
 0x38a   : > { %3815 = vrot.lane.b32.xlu1 %v3731_v58, %s5275_s24 }
 0x38b   : > { %v3420_v30 = vpop.permute.xlu0 %3419 }
 0x38c   : > { %v3994_v55 = vpop.permute.xlu1 %3993  ;;  %3501 = vst.msk [vmem:[#allocation3 + $0x70] sm:$0xff] %vm1448_vm7, %v3420_v30  ;;  %v4107_v63 = vld [vmem:[#allocation3 + $0x60] sm:$0xff] }
 0x38d   : > { %4076 = vst.msk [vmem:[#allocation3 + $0x68] sm:$0xff] %vm2028_vm10, %v3994_v55  ;;  %5062 = vmatprep.mubr.msk.f32.mxu1 %vm2109_vm11, %v4107_v63  ;;  %3053 = vrot.lane.b32.xlu0 %v6684_v11, %s5271_s28 }
 0x38e   : > { %3243 = vrot.lane.b32.xlu1 %v3731_v58, %s7278_s29 }
 0x38f   : > { %v2658_v9 = vpop.permute.xlu0 %2657 }
 0x390   : > { %v2848_v3 = vpop.permute.xlu1 %2847  ;;  %2736 = vst.msk [vmem:[#allocation3 + $0x88] sm:$0xff] %vm676_vm3, %v2658_v9 }
 0x391   : > { %2927 = vst.msk [vmem:[#allocation3 + $0x80] sm:$0xff] %vm869_vm4, %v2848_v3  ;;  %3817 = vrot.lane.b32.xlu0 %v3732_v32, %s5275_s24 }
 0x392   : > { %4007 = vrot.lane.b32.xlu1 %v3923_v10, %s5276_s21 }
 0x393   : > { %v3422_v8 = vpop.permute.xlu0 %3421 }
 0x394   : > { %v3612_v7 = vpop.permute.xlu1 %3611  ;;  %3502 = vst.msk [vmem:[#allocation3 + $0x78] sm:$0xff] %vm1448_vm7, %v3422_v8  ;;  %v4108_v17 = vld [vmem:[#allocation3 + $0x68] sm:$0xff] }
 0x395   : > { %3693 = vst.msk [vmem:[#allocation3 + $0x70] sm:$0xff] %vm1642_vm8, %v3612_v7  ;;  %5063 = vmatmul.mubr.msk.f32.gmra.mrb[12].mxu1 %vm2109_vm11, %v4108_v17  ;;  %2671 = vrot.lane.b32.xlu0 %v3731_v58, %s7279_s14  ;;  %v3736_v7 = vld [vmem:[#allocation2 + $0x159] sm:$0xff] }
 0x396   : > { %3245 = vrot.lane.b32.xlu1 %v3732_v32, %s7278_s29  ;;  %v3927_v17 = vld [vmem:[#allocation2 + $0x152] sm:$0xff] }
 0x397   : > { %v2850_v11 = vpop.permute.xlu0 %2849 }
 0x398   : > { %v3040_v13 = vpop.permute.xlu1 %3039  ;;  %2928 = vst.msk [vmem:[#allocation3 + $0x88] sm:$0xff] %vm869_vm4, %v2850_v11 }
 0x399   : > { %3119 = vst.msk [vmem:[#allocation3 + $0x80] sm:$0xff] %vm1062_vm5, %v3040_v13  ;;  %3435 = vrot.lane.b32.xlu0 %v3923_v10, %s7280_s17 }
 0x39a   : > { %4009 = vrot.lane.b32.xlu1 %v3924_v14, %s5276_s21 }
 0x39b   : > { %v3614_v2 = vpop.permute.xlu0 %3613 }
 0x39c   : > { %v3804_v62 = vpop.permute.xlu1 %3803  ;;  %3694 = vst.msk [vmem:[#allocation3 + $0x78] sm:$0xff] %vm1642_vm8, %v3614_v2 }
 0x39d   : > { %3885 = vst.msk [vmem:[#allocation3 + $0x70] sm:$0xff] %vm1835_vm9, %v3804_v62  ;;  %2673 = vrot.lane.b32.xlu0 %v3732_v32, %s7279_s14 }
 0x39e   : > { %2863 = vrot.lane.b32.xlu1 %v3923_v10, %s5269_s26 }
 0x39f   : > { %v3042_v18 = vpop.permute.xlu0 %3041 }
 0x3a0   : > { %v3232_v20 = vpop.permute.xlu1 %3231  ;;  %3120 = vst.msk [vmem:[#allocation3 + $0x88] sm:$0xff] %vm1062_vm5, %v3042_v18  ;;  %v3928_v18 = vld [vmem:[#allocation2 + $0x15a] sm:$0xff] }
 0x3a1   : > { %3311 = vst.msk [vmem:[#allocation3 + $0x80] sm:$0xff] %vm1255_vm6, %v3232_v20  ;;  %3437 = vrot.lane.b32.xlu0 %v3924_v14, %s7280_s17 }
 0x3a2   : > { %3627 = vrot.lane.b32.xlu1 %v6732_v39, %s5274_s23 }
 0x3a3   : > { %v3806_v19 = vpop.permute.xlu0 %3805 }
 0x3a4   : > { %v3996_v56 = vpop.permute.xlu1 %3995  ;;  %3886 = vst.msk [vmem:[#allocation3 + $0x78] sm:$0xff] %vm1835_vm9, %v3806_v19 }
 0x3a5   : > { %4077 = vst.msk [vmem:[#allocation3 + $0x70] sm:$0xff] %vm2028_vm10, %v3996_v56  ;;  %2865 = vrot.lane.b32.xlu0 %v3924_v14, %s5269_s26 }
 0x3a6   : > { %3055 = vrot.lane.b32.xlu1 %v6732_v39, %s5271_s28 }
 0x3a7   : > { %v2660_v21 = vpop.permute.xlu0 %2659 }
 0x3a8   : > { %v5046_v22 = vpop.f32.mrb[0].mxu1  ;;  %v3234_v27 = vpop.permute.xlu1 %3233  ;;  %2737 = vst.msk [vmem:[#allocation3 + $0x90] sm:$0xff] %vm676_vm3, %v2660_v21 }
 0x3a9   : > { %v4311_v60 = vadd.f32 %v5046_v22, %v6906_v59  ;;  %3312 = vst.msk [vmem:[#allocation3 + $0x88] sm:$0xff] %vm1255_vm6, %v3234_v27  ;;  %v4305_v15 = vpop.f32.mrb[1].mxu1  ;;  %3629 = vrot.lane.b32.xlu0 %v6734_v40, %s5274_s23 }
 0x3aa   : > { %v4306_v39 = vadd.f32 %v6906_v59, %v4305_v15  ;;  %3819 = vrot.lane.b32.xlu1 %v3733_v33, %s5275_s24 }
 0x3ab   : > { %v4465_v42 = vmax.f32 %v4311_v60, 0.0  ;;  %v3424_v38 = vpop.permute.xlu0 %3423 }
 0x3ac   : > { %v4464_v23 = vmax.f32 %v4306_v39, 0.0  ;;  %v3998_v24 = vpop.permute.xlu1 %3997  ;;  %3503 = vst.msk [vmem:[#allocation3 + $0x80] sm:$0xff] %vm1448_vm7, %v3424_v38  ;;  %v4109_v25 = vld [vmem:[#allocation3 + $0x70] sm:$0xff]  ;;  %v3737_v38 = vld [vmem:[#allocation2 + $0x169] sm:$0xff] }
 0x3ad   : > { %v4498_v28 = vsel %vm4496_vm12, %v4465_v42, 0.0  ;;  %4078 = vst.msk [vmem:[#allocation3 + $0x78] sm:$0xff] %vm2028_vm10, %v3998_v24  ;;  %5065 = vmatprep.mubr.msk.f32.mxu1 %vm2109_vm11, %v4109_v25  ;;  %3057 = vrot.lane.b32.xlu0 %v6734_v40, %s5271_s28 }
 0x3ae   : > { %v4497_v26 = vsel %vm4496_vm12, %v4464_v23, 0.0  ;;  %3247 = vrot.lane.b32.xlu1 %v3733_v33, %s7278_s29 }
 0x3af   : > { %v6923_v35 = vadd.f32 %v4498_v28, %v4497_v26  ;;  %v2662_v16 = vpop.permute.xlu0 %2661 }
 0x3b0   : > { %v2852_v34 = vpop.permute.xlu1 %2851  ;;  %2738 = vst.msk [vmem:[#allocation3 + $0x98] sm:$0xff] %vm676_vm3, %v2662_v16 }
 0x3b1   : > { %2929 = vst.msk [vmem:[#allocation3 + $0x90] sm:$0xff] %vm869_vm4, %v2852_v34  ;;  %3821 = vrot.lane.b32.xlu0 %v3734_v37, %s5275_s24 }
 0x3b2   : > { %4011 = vrot.lane.b32.xlu1 %v3925_v41, %s5276_s21 }
 0x3b3   : > { %v3426_v61 = vpop.permute.xlu0 %3425 }
 0x3b4   : > { %v3616_v40 = vpop.permute.xlu1 %3615  ;;  %3504 = vst.msk [vmem:[#allocation3 + $0x88] sm:$0xff] %vm1448_vm7, %v3426_v61  ;;  %v4110_v29 = vld [vmem:[#allocation3 + $0x78] sm:$0xff]  ;;  %v3738_v61 = vld [vmem:[#allocation2 + $0x171] sm:$0xff] }
 0x3b5   : > { %3695 = vst.msk [vmem:[#allocation3 + $0x80] sm:$0xff] %vm1642_vm8, %v3616_v40  ;;  %5066 = vmatmul.mubr.msk.f32.gmra.mrb[14].mxu1 %vm2109_vm11, %v4110_v29  ;;  %2675 = vrot.lane.b32.xlu0 %v3733_v33, %s7279_s14  ;;  %v3929_v40 = vld [vmem:[#allocation2 + $0x16a] sm:$0xff] }
 0x3b6   : > { %3249 = vrot.lane.b32.xlu1 %v3734_v37, %s7278_s29 }
 0x3b7   : > { %v2854_v36 = vpop.permute.xlu0 %2853 }
 0x3b8   : > { %v3044_v46 = vpop.permute.xlu1 %3043  ;;  %2930 = vst.msk [vmem:[#allocation3 + $0x98] sm:$0xff] %vm869_vm4, %v2854_v36 }
 0x3b9   : > { %3121 = vst.msk [vmem:[#allocation3 + $0x90] sm:$0xff] %vm1062_vm5, %v3044_v46  ;;  %3439 = vrot.lane.b32.xlu0 %v3925_v41, %s7280_s17 }
 0x3ba   : > { %4013 = vrot.lane.b32.xlu1 %v3926_v54, %s5276_s21 }
 0x3bb   : > { %v3618_v1 = vpop.permute.xlu0 %3617 }
 0x3bc   : > { %v3808_v47 = vpop.permute.xlu1 %3807  ;;  %3696 = vst.msk [vmem:[#allocation3 + $0x88] sm:$0xff] %vm1642_vm8, %v3618_v1 }
 0x3bd   : > { %3887 = vst.msk [vmem:[#allocation3 + $0x80] sm:$0xff] %vm1835_vm9, %v3808_v47  ;;  %2677 = vrot.lane.b32.xlu0 %v3734_v37, %s7279_s14  ;;  %v3930_v47 = vld [vmem:[#allocation2 + $0x172] sm:$0xff] }
 0x3be   : > { %2867 = vrot.lane.b32.xlu1 %v3925_v41, %s5269_s26 }
 0x3bf   : > { %v3046_v48 = vpop.permute.xlu0 %3045 }
 0x3c0   : > { %v3236_v31 = vpop.permute.xlu1 %3235  ;;  %3122 = vst.msk [vmem:[#allocation3 + $0x98] sm:$0xff] %vm1062_vm5, %v3046_v48 }
 0x3c1   : > { %3313 = vst.msk [vmem:[#allocation3 + $0x90] sm:$0xff] %vm1255_vm6, %v3236_v31  ;;  %3441 = vrot.lane.b32.xlu0 %v3926_v54, %s7280_s17 }
 0x3c2   : > { %3631 = vrot.lane.b32.xlu1 %v6782_v53, %s5274_s23 }
 0x3c3   : > { %v3810_v49 = vpop.permute.xlu0 %3809 }
 0x3c4   : > { %v4000_v50 = vpop.permute.xlu1 %3999  ;;  %3888 = vst.msk [vmem:[#allocation3 + $0x88] sm:$0xff] %vm1835_vm9, %v3810_v49 }
 0x3c5   : > { %4079 = vst.msk [vmem:[#allocation3 + $0x80] sm:$0xff] %vm2028_vm10, %v4000_v50  ;;  %2869 = vrot.lane.b32.xlu0 %v3926_v54, %s5269_s26 }
 0x3c6   : > { %3059 = vrot.lane.b32.xlu1 %v6782_v53, %s5271_s28 }
 0x3c7   : > { %v2664_v51 = vpop.permute.xlu0 %2663 }
 0x3c8   : > { %v3238_v4 = vpop.permute.xlu1 %3237  ;;  %v5049_v52 = vpop.f32.mrb[2].mxu1  ;;  %2739 = vst.msk [vmem:[#allocation3 + $0xa0] sm:$0xff] %vm676_vm3, %v2664_v51  ;;  %v3547_v51 = vld [vmem:[#allocation2 + $0x180] sm:$0xff] }
 0x3c9   : > { %3314 = vst.msk [vmem:[#allocation3 + $0x98] sm:$0xff] %vm1255_vm6, %v3238_v4  ;;  %v4321_v5 = vadd.f32 %v5049_v52, %v6906_v59  ;;  %v4315_v43 = vpop.f32.mrb[3].mxu1  ;;  %3633 = vrot.lane.b32.xlu0 %v6784_v12, %s5274_s23 }
 0x3ca   : > { %v4316_v57 = vadd.f32 %v6906_v59, %v4315_v43  ;;  %3823 = vrot.lane.b32.xlu1 %v3735_v6, %s5275_s24 }
 0x3cb   : > { %v3428_v58 = vpop.permute.xlu0 %3427  ;;  %v4467_v53 = vmax.f32 %v4321_v5, 0.0 }
 0x3cc   : > { %v4466_v30 = vmax.f32 %v4316_v57, 0.0  ;;  %v4002_v55 = vpop.permute.xlu1 %4001  ;;  %3505 = vst.msk [vmem:[#allocation3 + $0x90] sm:$0xff] %vm1448_vm7, %v3428_v58  ;;  %v4111_v63 = vld [vmem:[#allocation3 + $0x80] sm:$0xff]  ;;  %v3548_v57 = vld [vmem:[#allocation2 + $0x188] sm:$0xff] }
 0x3cd   : > { %4080 = vst.msk [vmem:[#allocation3 + $0x88] sm:$0xff] %vm2028_vm10, %v4002_v55  ;;  %5068 = vmatprep.mubr.msk.f32.mxu1 %vm2109_vm11, %v4111_v63  ;;  %3061 = vrot.lane.b32.xlu0 %v6784_v12, %s5271_s28  ;;  %v4502_v10 = vsel %vm4496_vm12, %v4467_v53, 0.0 }
 0x3ce   : > { %v4500_v9 = vsel %vm4496_vm12, %v4466_v30, 0.0  ;;  %3251 = vrot.lane.b32.xlu1 %v3735_v6, %s7278_s29  ;;  %v3739_v30 = vld [vmem:[#allocation2 + $0x181] sm:$0xff] }
 0x3cf   : > { %v4501_v3 = vadd.f32 %v4500_v9, %v6923_v35  ;;  %v2666_v32 = vpop.permute.xlu0 %2665 }
 0x3d0   : > { %v2856_v8 = vpop.permute.xlu1 %2855  ;;  %2740 = vst.msk [vmem:[#allocation3 + $0xa8] sm:$0xff] %vm676_vm3, %v2666_v32 }
 0x3d1   : > { %2931 = vst.msk [vmem:[#allocation3 + $0xa0] sm:$0xff] %vm869_vm4, %v2856_v8  ;;  %3825 = vrot.lane.b32.xlu0 %v3736_v7, %s5275_s24  ;;  %v4503_v11 = vadd.f32 %v4502_v10, %v4501_v3 }
 0x3d2   : > { %4015 = vrot.lane.b32.xlu1 %v3927_v17, %s5276_s21 }
 0x3d3   : > { %v3430_v12 = vpop.permute.xlu0 %3429 }
 0x3d4   : > { %v3620_v13 = vpop.permute.xlu1 %3619  ;;  %3506 = vst.msk [vmem:[#allocation3 + $0x98] sm:$0xff] %vm1448_vm7, %v3430_v12  ;;  %v4112_v14 = vld [vmem:[#allocation3 + $0x88] sm:$0xff] }
 0x3d5   : > { %3697 = vst.msk [vmem:[#allocation3 + $0x90] sm:$0xff] %vm1642_vm8, %v3620_v13  ;;  %5069 = vmatmul.mubr.msk.f32.gmra.mrb[16].mxu1 %vm2109_vm11, %v4112_v14  ;;  %2679 = vrot.lane.b32.xlu0 %v3735_v6, %s7279_s14  ;;  %v3740_v13 = vld [vmem:[#allocation2 + $0x189] sm:$0xff] }
 0x3d6   : > { %3253 = vrot.lane.b32.xlu1 %v3736_v7, %s7278_s29  ;;  %v3931_v14 = vld [vmem:[#allocation2 + $0x182] sm:$0xff] }
 0x3d7   : > { %v2858_v2 = vpop.permute.xlu0 %2857 }
 0x3d8   : > { %v3048_v62 = vpop.permute.xlu1 %3047  ;;  %2932 = vst.msk [vmem:[#allocation3 + $0xa8] sm:$0xff] %vm869_vm4, %v2858_v2 }
 0x3d9   : > { %3123 = vst.msk [vmem:[#allocation3 + $0xa0] sm:$0xff] %vm1062_vm5, %v3048_v62  ;;  %3443 = vrot.lane.b32.xlu0 %v3927_v17, %s7280_s17 }
 0x3da   : > { %4017 = vrot.lane.b32.xlu1 %v3928_v18, %s5276_s21 }
 0x3db   : > { %v3622_v20 = vpop.permute.xlu0 %3621 }
 0x3dc   : > { %v3812_v19 = vpop.permute.xlu1 %3811  ;;  %3698 = vst.msk [vmem:[#allocation3 + $0x98] sm:$0xff] %vm1642_vm8, %v3622_v20 }
 0x3dd   : > { %3889 = vst.msk [vmem:[#allocation3 + $0x90] sm:$0xff] %vm1835_vm9, %v3812_v19  ;;  %2681 = vrot.lane.b32.xlu0 %v3736_v7, %s7279_s14 }
 0x3de   : > { %2871 = vrot.lane.b32.xlu1 %v3927_v17, %s5269_s26 }
 0x3df   : > { %v3050_v56 = vpop.permute.xlu0 %3049 }
 0x3e0   : > { %v3240_v21 = vpop.permute.xlu1 %3239  ;;  %3124 = vst.msk [vmem:[#allocation3 + $0xa8] sm:$0xff] %vm1062_vm5, %v3050_v56 }
 0x3e1   : > { %3315 = vst.msk [vmem:[#allocation3 + $0xa0] sm:$0xff] %vm1255_vm6, %v3240_v21  ;;  %3445 = vrot.lane.b32.xlu0 %v3928_v18, %s7280_s17  ;;  %v3358_v21 = vld [vmem:[#allocation2 + $0x18a] sm:$0xff] }
 0x3e2   : > { %3635 = vrot.lane.b32.xlu1 %v6829_v44, %s5274_s23 }
 0x3e3   : > { %v3814_v22 = vpop.permute.xlu0 %3813 }
 0x3e4   : > { %v4004_v27 = vpop.permute.xlu1 %4003  ;;  %3890 = vst.msk [vmem:[#allocation3 + $0x98] sm:$0xff] %vm1835_vm9, %v3814_v22  ;;  %v3549_v22 = vld [vmem:[#allocation2 + $0x198] sm:$0xff] }
 0x3e5   : > { %4081 = vst.msk [vmem:[#allocation3 + $0x90] sm:$0xff] %vm2028_vm10, %v4004_v27  ;;  %2873 = vrot.lane.b32.xlu0 %v3928_v18, %s5269_s26 }
 0x3e6   : > { %3063 = vrot.lane.b32.xlu1 %v6829_v44, %s5271_s28 }
 0x3e7   : > { %v2668_v60 = vpop.permute.xlu0 %2667 }
 0x3e8   : > { %v3242_v15 = vpop.permute.xlu1 %3241  ;;  %2741 = vst.msk [vmem:[#allocation3 + $0xb0] sm:$0xff] %vm676_vm3, %v2668_v60  ;;  %v5052_v33 = vpop.f32.mrb[4].mxu1  ;;  %v3550_v60 = vld [vmem:[#allocation2 + $0x1a0] sm:$0xff] }
 0x3e9   : > { %3316 = vst.msk [vmem:[#allocation3 + $0xa8] sm:$0xff] %vm1255_vm6, %v3242_v15  ;;  %v4331_v39 = vadd.f32 %v5052_v33, %v6906_v59  ;;  %v4325_v42 = vpop.f32.mrb[5].mxu1  ;;  %3637 = vrot.lane.b32.xlu0 %v6835_v45, %s5274_s23  ;;  %v3741_v33 = vld [vmem:[#allocation2 + $0x199] sm:$0xff] }
 0x3ea   : > { %v4326_v23 = vadd.f32 %v6906_v59, %v4325_v42  ;;  %3827 = vrot.lane.b32.xlu1 %v3737_v38, %s5275_s24  ;;  %v3742_v42 = vld [vmem:[#allocation2 + $0x1a1] sm:$0xff] }
 0x3eb   : > { %v3432_v24 = vpop.permute.xlu0 %3431  ;;  %v4469_v44 = vmax.f32 %v4331_v39, 0.0 }
 0x3ec   : > { %v4468_v25 = vmax.f32 %v4326_v23, 0.0  ;;  %v4006_v28 = vpop.permute.xlu1 %4005  ;;  %3507 = vst.msk [vmem:[#allocation3 + $0xa0] sm:$0xff] %vm1448_vm7, %v3432_v24  ;;  %v4113_v26 = vld [vmem:[#allocation3 + $0x90] sm:$0xff] }
 0x3ed   : > { %4082 = vst.msk [vmem:[#allocation3 + $0x98] sm:$0xff] %vm2028_vm10, %v4006_v28  ;;  %5071 = vmatprep.mubr.msk.f32.mxu1 %vm2109_vm11, %v4113_v26  ;;  %3065 = vrot.lane.b32.xlu0 %v6835_v45, %s5271_s28  ;;  %v4506_v37 = vsel %vm4496_vm12, %v4469_v44, 0.0  ;;  %v3933_v23 = vld [vmem:[#allocation2 + $0x19a] sm:$0xff]  ;;  %v3934_v44 = vld [vmem:[#allocation2 + $0x1a2] sm:$0xff] }
 0x3ee   : > { %v4504_v35 = vsel %vm4496_vm12, %v4468_v25, 0.0  ;;  %3255 = vrot.lane.b32.xlu1 %v3737_v38, %s7278_s29 }
 0x3ef   : > { %v4505_v16 = vadd.f32 %v4504_v35, %v4503_v11  ;;  %v2670_v34 = vpop.permute.xlu0 %2669 }
 0x3f0   : > { %v2860_v41 = vpop.permute.xlu1 %2859  ;;  %2742 = vst.msk [vmem:[#allocation3 + $0xb8] sm:$0xff] %vm676_vm3, %v2670_v34 }
 0x3f1   : > { %2933 = vst.msk [vmem:[#allocation3 + $0xb0] sm:$0xff] %vm869_vm4, %v2860_v41  ;;  %3829 = vrot.lane.b32.xlu0 %v3738_v61, %s5275_s24  ;;  %v4507_v29 = vadd.f32 %v4506_v37, %v4505_v16 }
 0x3f2   : > { %4019 = vrot.lane.b32.xlu1 %v3929_v40, %s5276_s21 }
 0x3f3   : > { %v3434_v45 = vpop.permute.xlu0 %3433 }
 0x3f4   : > { %v3624_v36 = vpop.permute.xlu1 %3623  ;;  %3508 = vst.msk [vmem:[#allocation3 + $0xa8] sm:$0xff] %vm1448_vm7, %v3434_v45  ;;  %v4114_v46 = vld [vmem:[#allocation3 + $0x98] sm:$0xff] }
 0x3f5   : > { %3699 = vst.msk [vmem:[#allocation3 + $0xa0] sm:$0xff] %vm1642_vm8, %v3624_v36  ;;  %5072 = vmatmul.mubr.msk.f32.gmra.mrb[18].mxu1 %vm2109_vm11, %v4114_v46  ;;  %2683 = vrot.lane.b32.xlu0 %v3737_v38, %s7279_s14 }
 0x3f6   : > { %3257 = vrot.lane.b32.xlu1 %v3738_v61, %s7278_s29 }
 0x3f7   : > { %v2862_v54 = vpop.permute.xlu0 %2861 }
 0x3f8   : > { %v3052_v1 = vpop.permute.xlu1 %3051  ;;  %2934 = vst.msk [vmem:[#allocation3 + $0xb8] sm:$0xff] %vm869_vm4, %v2862_v54 }
 0x3f9   : > { %3125 = vst.msk [vmem:[#allocation3 + $0xb0] sm:$0xff] %vm1062_vm5, %v3052_v1  ;;  %3447 = vrot.lane.b32.xlu0 %v3929_v40, %s7280_s17 }
 0x3fa   : > { %4021 = vrot.lane.b32.xlu1 %v3930_v47, %s5276_s21 }
 0x3fb   : > { %v3626_v48 = vpop.permute.xlu0 %3625 }
 0x3fc   : > { %v3816_v31 = vpop.permute.xlu1 %3815  ;;  %3700 = vst.msk [vmem:[#allocation3 + $0xa8] sm:$0xff] %vm1642_vm8, %v3626_v48 }
 0x3fd   : > { %3891 = vst.msk [vmem:[#allocation3 + $0xa0] sm:$0xff] %vm1835_vm9, %v3816_v31  ;;  %2685 = vrot.lane.b32.xlu0 %v3738_v61, %s7279_s14 }
 0x3fe   : > { %2875 = vrot.lane.b32.xlu1 %v3929_v40, %s5269_s26 }
 0x3ff   : > { %v3054_v49 = vpop.permute.xlu0 %3053 }
 0x400   : > { %v3244_v50 = vpop.permute.xlu1 %3243  ;;  %3126 = vst.msk [vmem:[#allocation3 + $0xb8] sm:$0xff] %vm1062_vm5, %v3054_v49 }
 0x401   : > { %3317 = vst.msk [vmem:[#allocation3 + $0xb0] sm:$0xff] %vm1255_vm6, %v3244_v50  ;;  %3449 = vrot.lane.b32.xlu0 %v3930_v47, %s7280_s17 }
 0x402   : > { %3639 = vrot.lane.b32.xlu1 %v3547_v51, %s5274_s23 }
 0x403   : > { %v3818_v4 = vpop.permute.xlu0 %3817 }
 0x404   : > { %v4008_v52 = vpop.permute.xlu1 %4007  ;;  %3892 = vst.msk [vmem:[#allocation3 + $0xa8] sm:$0xff] %vm1835_vm9, %v3818_v4 }
 0x405   : > { %4083 = vst.msk [vmem:[#allocation3 + $0xa0] sm:$0xff] %vm2028_vm10, %v4008_v52  ;;  %2877 = vrot.lane.b32.xlu0 %v3930_v47, %s5269_s26 }
 0x406   : > { %3067 = vrot.lane.b32.xlu1 %v3547_v51, %s5271_s28 }
 0x407   : > { %v2672_v5 = vpop.permute.xlu0 %2671 }
 0x408   : > { %v3246_v43 = vpop.permute.xlu1 %3245  ;;  %2743 = vst.msk [vmem:[#allocation3 + $0xc0] sm:$0xff] %vm676_vm3, %v2672_v5  ;;  %v5055_v6 = vpop.f32.mrb[6].mxu1 }
 0x409   : > { %3318 = vst.msk [vmem:[#allocation3 + $0xb8] sm:$0xff] %vm1255_vm6, %v3246_v43  ;;  %v4341_v58 = vadd.f32 %v5055_v6, %v6906_v59  ;;  %v4335_v53 = vpop.f32.mrb[7].mxu1  ;;  %3641 = vrot.lane.b32.xlu0 %v3548_v57, %s5274_s23 }
 0x40a   : > { %v4336_v55 = vadd.f32 %v6906_v59, %v4335_v53  ;;  %3831 = vrot.lane.b32.xlu1 %v3739_v30, %s5275_s24 }
 0x40b   : > { %v3436_v63 = vpop.permute.xlu0 %3435  ;;  %v4471_v9 = vmax.f32 %v4341_v58, 0.0 }
 0x40c   : > { %v4470_v3 = vmax.f32 %v4336_v55, 0.0  ;;  %v4010_v32 = vpop.permute.xlu1 %4009  ;;  %3509 = vst.msk [vmem:[#allocation3 + $0xb0] sm:$0xff] %vm1448_vm7, %v3436_v63  ;;  %v4115_v10 = vld [vmem:[#allocation3 + $0xa0] sm:$0xff] }
 0x40d   : > { %4084 = vst.msk [vmem:[#allocation3 + $0xa8] sm:$0xff] %vm2028_vm10, %v4010_v32  ;;  %5074 = vmatprep.mubr.msk.f32.mxu1 %vm2109_vm11, %v4115_v10  ;;  %3069 = vrot.lane.b32.xlu0 %v3548_v57, %s5271_s28  ;;  %v4510_v11 = vsel %vm4496_vm12, %v4471_v9, 0.0 }
 0x40e   : > { %v4508_v8 = vsel %vm4496_vm12, %v4470_v3, 0.0  ;;  %3259 = vrot.lane.b32.xlu1 %v3739_v30, %s7278_s29 }
 0x40f   : > { %v4509_v7 = vadd.f32 %v4508_v8, %v4507_v29  ;;  %v2674_v17 = vpop.permute.xlu0 %2673 }
 0x410   : > { %v2864_v12 = vpop.permute.xlu1 %2863  ;;  %2744 = vst.msk [vmem:[#allocation3 + $0xc8] sm:$0xff] %vm676_vm3, %v2674_v17 }
 0x411   : > { %2935 = vst.msk [vmem:[#allocation3 + $0xc0] sm:$0xff] %vm869_vm4, %v2864_v12  ;;  %3833 = vrot.lane.b32.xlu0 %v3740_v13, %s5275_s24  ;;  %v4511_v2 = vadd.f32 %v4510_v11, %v4509_v7 }
 0x412   : > { %4023 = vrot.lane.b32.xlu1 %v3931_v14, %s5276_s21 }
 0x413   : > { %v3438_v62 = vpop.permute.xlu0 %3437 }
 0x414   : > { %v3628_v18 = vpop.permute.xlu1 %3627  ;;  %3510 = vst.msk [vmem:[#allocation3 + $0xb8] sm:$0xff] %vm1448_vm7, %v3438_v62  ;;  %v4116_v20 = vld [vmem:[#allocation3 + $0xa8] sm:$0xff] }
 0x415   : > { %3701 = vst.msk [vmem:[#allocation3 + $0xb0] sm:$0xff] %vm1642_vm8, %v3628_v18  ;;  %5075 = vmatmul.mubr.msk.f32.gmra.mrb[20].mxu1 %vm2109_vm11, %v4116_v20  ;;  %3261 = vrot.lane.b32.xlu0 %v3740_v13, %s7278_s29  ;;  %s323_s29 = sand.u32 1, %s5258_s10  }
 0x416   : > { %3451 = vrot.lane.b32.xlu1 %v3931_v14, %s7280_s17  ;;  %s324_s22 = scalar_lea.vmem [#allocation4], %s323_s29  ;;  %s4725_s28 = scalar_lea.sflag [#allocation5], %s323_s29 }
 0x417   : > { %v2866_v19 = vpop.permute.xlu0 %2865  ;;  %s4737_s16 = sshll.u32 %s324_s22, 4  ;;  %s7220_s16 = int_to_ptr.vmem [resolvable:$true] %s4737_s16 }
 0x418   : > { %v3056_v56 = vpop.permute.xlu1 %3055  ;;  %2936 = vst.msk [vmem:[#allocation3 + $0xc8] sm:$0xff] %vm869_vm4, %v2866_v19 }
 0x419   : > { %3127 = vst.msk [vmem:[#allocation3 + $0xc0] sm:$0xff] %vm1062_vm5, %v3056_v56  ;;  %4025 = vrot.lane.b32.xlu0 %v3358_v21, %s5276_s21 }
 0x41a   : > { %3453 = vrot.lane.b32.xlu1 %v3358_v21, %s7280_s17  ;;  %s4866_s17 = sshll.u32 %s5351_s13, 4  ;;  %s5279_s13 = smov [#allocation4]  }
 0x41b   : > { %v3630_v27 = vpop.permute.xlu0 %3629  ;;  %s7218_s26 = scalar_lea.hbm %s7269_s9, %s4866_s17 }
 0x41c   : > { %v3820_v15 = vpop.permute.xlu1 %3819  ;;  %3702 = vst.msk [vmem:[#allocation3 + $0xb8] sm:$0xff] %vm1642_vm8, %v3630_v27 }
 0x41d   : > { %3893 = vst.msk [vmem:[#allocation3 + $0xb0] sm:$0xff] %vm1835_vm9, %v3820_v15  ;;  %3643 = vrot.lane.b32.xlu0 %v3549_v22, %s5274_s23 }
 0x41e   : > { %3645 = vrot.lane.b32.xlu1 %v3550_v60, %s5274_s23  ;;  %s5204_s23 = scalar_lea.vmem %s7220_s16, 16 }
 0x41f   : > { %v3058_v39 = vpop.permute.xlu0 %3057  ;;  %p5205_p11 = scmp.ne.s32.totalorder %s7220_s16, %s5204_s23 }
 0x420   : > { %v3248_v38 = vpop.permute.xlu1 %3247  ;;  %3128 = vst.msk [vmem:[#allocation3 + $0xc8] sm:$0xff] %vm1062_vm5, %v3058_v39 }
 0x421   : > { %3319 = vst.msk [vmem:[#allocation3 + $0xc0] sm:$0xff] %vm1255_vm6, %v3248_v38  ;;  %3835 = vrot.lane.b32.xlu0 %v3741_v33, %s5275_s24  ;;  %p5206_p12 = pnand %p5205_p11, %p5368_p5 }
 0x422   : > { %3837 = vrot.lane.b32.xlu1 %v3742_v42, %s5275_s24  ;;  %s5208_s24 = sshll.u32 %s5279_s13, 4  ;;  %s5209_s24 = int_to_ptr.vmem [resolvable:$false] %s5208_s24 }
 0x423   : > { %v3822_v24 = vpop.permute.xlu0 %3821  ;;  %p5207_p13 = pneg %p5206_p12  ;;  %p5211_p0 = scmp.lt.s32.totalorder %s7220_s16, %s5209_s24 }
 0x424   : > { %v4012_v25 = vpop.permute.xlu1 %4011  ;;  %3894 = vst.msk [vmem:[#allocation3 + $0xb8] sm:$0xff] %vm1835_vm9, %v3822_v24 }
 0x425   : > { %4085 = vst.msk [vmem:[#allocation3 + $0xb0] sm:$0xff] %vm2028_vm10, %v4012_v25  ;;  %4027 = vrot.lane.b32.xlu0 %v3933_v23, %s5276_s21 }
 0x426   : > { %4029 = vrot.lane.b32.xlu1 %v3934_v44, %s5276_s21  ;;  %s5210_s21 = scalar_lea.vmem %s5209_s24, 32 }
 0x427   : > { %v2676_v28 = vpop.permute.xlu0 %2675  ;;  %p5212_p1 = scmp.lt.s32.totalorder %s5210_s21, %s5204_s23 }
 0x428   : > { %v3250_v26 = vpop.permute.xlu1 %3249  ;;  %2745 = vst.msk [vmem:[#allocation3 + $0xd0] sm:$0xff] %vm676_vm3, %v2676_v28  ;;  %v5058_v35 = vpop.f32.mrb[8].mxu1 }
 0x429   : > { %3320 = vst.msk [vmem:[#allocation3 + $0xc8] sm:$0xff] %vm1255_vm6, %v3250_v26  ;;  %v4351_v16 = vadd.f32 %v5058_v35, %v6906_v59  ;;  %v4345_v34 = vpop.f32.mrb[9].mxu1  ;;  %p5213_p2 = por %p5212_p1, %p5211_p0 }
 0x42a   : > { %v4346_v37 = vadd.f32 %v6906_v59, %v4345_v34 }
 0x42b   : > { %v3440_v41 = vpop.permute.xlu0 %3439  ;;  %v4473_v61 = vmax.f32 %v4351_v16, 0.0  ;;  %p5214_p3 = pnand %p5213_p2, %p5207_p13 }
 0x42c   : > { %v4472_v40 = vmax.f32 %v4346_v37, 0.0  ;;  %v4014_v29 = vpop.permute.xlu1 %4013  ;;  %3511 = vst.msk [vmem:[#allocation3 + $0xc0] sm:$0xff] %vm1448_vm7, %v3440_v41  ;;  %v4117_v45 = vld [vmem:[#allocation3 + $0xb0] sm:$0xff] }
 0x42d   : > { %4086 = vst.msk [vmem:[#allocation3 + $0xb8] sm:$0xff] %vm2028_vm10, %v4014_v29  ;;  %5077 = vmatprep.mubr.msk.f32.mxu1 %vm2109_vm11, %v4117_v45  ;;  %v4514_v1 = vsel %vm4496_vm12, %v4473_v61, 0.0 }
 0x42e   : > { %v4512_v36 = vsel %vm4496_vm12, %v4472_v40, 0.0 }
 0x42f   : > { %v4513_v46 = vadd.f32 %v4512_v36, %v4511_v2  ;;  %v2678_v54 = vpop.permute.xlu0 %2677 }
 0x430   : > { %v2868_v47 = vpop.permute.xlu1 %2867  ;;  %2746 = vst.msk [vmem:[#allocation3 + $0xd8] sm:$0xff] %vm676_vm3, %v2678_v54 }
 0x431   : > { %2937 = vst.msk [vmem:[#allocation3 + $0xd0] sm:$0xff] %vm869_vm4, %v2868_v47  ;;  %v4515_v48 = vadd.f32 %v4514_v1, %v4513_v46 }
 0x433   : > { %v3442_v31 = vpop.permute.xlu0 %3441 }
 0x434   : > { %v3632_v49 = vpop.permute.xlu1 %3631  ;;  %3512 = vst.msk [vmem:[#allocation3 + $0xc8] sm:$0xff] %vm1448_vm7, %v3442_v31  ;;  %v4118_v50 = vld [vmem:[#allocation3 + $0xb8] sm:$0xff] }
 0x435   : > { %3703 = vst.msk [vmem:[#allocation3 + $0xc0] sm:$0xff] %vm1642_vm8, %v3632_v49  ;;  %5078 = vmatmul.mubr.msk.f32.gmra.mrb[22].mxu1 %vm2109_vm11, %v4118_v50 }
 0x437   : > { %v2870_v51 = vpop.permute.xlu0 %2869 }
 0x438   : > { %v3060_v4 = vpop.permute.xlu1 %3059  ;;  %2938 = vst.msk [vmem:[#allocation3 + $0xd8] sm:$0xff] %vm869_vm4, %v2870_v51 }
 0x439   : > { %3129 = vst.msk [vmem:[#allocation3 + $0xd0] sm:$0xff] %vm1062_vm5, %v3060_v4 }
 0x43b   : > { %v3634_v52 = vpop.permute.xlu0 %3633 }
 0x43c   : > { %v3824_v5 = vpop.permute.xlu1 %3823  ;;  %3704 = vst.msk [vmem:[#allocation3 + $0xc8] sm:$0xff] %vm1642_vm8, %v3634_v52 }
 0x43d   : > { %3895 = vst.msk [vmem:[#allocation3 + $0xc0] sm:$0xff] %vm1835_vm9, %v3824_v5 }
 0x43f   : > { %v3062_v43 = vpop.permute.xlu0 %3061 }
 0x440   : > { %v3252_v6 = vpop.permute.xlu1 %3251  ;;  %3130 = vst.msk [vmem:[#allocation3 + $0xd8] sm:$0xff] %vm1062_vm5, %v3062_v43 }
 0x441   : > { %3321 = vst.msk [vmem:[#allocation3 + $0xd0] sm:$0xff] %vm1255_vm6, %v3252_v6 }
 0x443   : > { %v3826_v57 = vpop.permute.xlu0 %3825 }
 0x444   : > { %v4016_v58 = vpop.permute.xlu1 %4015  ;;  %3896 = vst.msk [vmem:[#allocation3 + $0xc8] sm:$0xff] %vm1835_vm9, %v3826_v57 }
 0x445   : > { %4087 = vst.msk [vmem:[#allocation3 + $0xc0] sm:$0xff] %vm2028_vm10, %v4016_v58 }
 0x447   : > { %v2680_v53 = vpop.permute.xlu0 %2679 }
 0x448   : > { %v3254_v30 = vpop.permute.xlu1 %3253  ;;  %2747 = vst.msk [vmem:[#allocation3 + $0xe0] sm:$0xff] %vm676_vm3, %v2680_v53 }
 0x449   : > { %3322 = vst.msk [vmem:[#allocation3 + $0xd8] sm:$0xff] %vm1255_vm6, %v3254_v30 }
 0x44a   : > { %v5061_v55 = vpop.f32.mrb[10].mxu1 }
 0x44b   : > { %v4361_v63 = vadd.f32 %v5061_v55, %v6906_v59  ;;  %v4355_v9 = vpop.f32.mrb[11].mxu1  ;;  %v3444_v32 = vpop.permute.xlu0 %3443 }
 0x44c   : > { %v4356_v3 = vadd.f32 %v6906_v59, %v4355_v9  ;;  %v4018_v7 = vpop.permute.xlu1 %4017  ;;  %3513 = vst.msk [vmem:[#allocation3 + $0xd0] sm:$0xff] %vm1448_vm7, %v3444_v32  ;;  %v4119_v17 = vld [vmem:[#allocation3 + $0xc0] sm:$0xff] }
 0x44d   : > { %v4475_v10 = vmax.f32 %v4361_v63, 0.0  ;;  %4088 = vst.msk [vmem:[#allocation3 + $0xc8] sm:$0xff] %vm2028_vm10, %v4018_v7  ;;  %5080 = vmatprep.mubr.msk.f32.mxu1 %vm2109_vm11, %v4119_v17 }
 0x44e   : > { %v4474_v8 = vmax.f32 %v4356_v3, 0.0 }
 0x44f   : > { %v2682_v13 = vpop.permute.xlu0 %2681  ;;  %v4518_v14 = vsel %vm4496_vm12, %v4475_v10, 0.0 }
 0x450   : > { %v4516_v11 = vsel %vm4496_vm12, %v4474_v8, 0.0  ;;  %v2872_v2 = vpop.permute.xlu1 %2871  ;;  %2748 = vst.msk [vmem:[#allocation3 + $0xe8] sm:$0xff] %vm676_vm3, %v2682_v13 }
 0x451   : > { %v4517_v12 = vadd.f32 %v4516_v11, %v4515_v48  ;;  %2939 = vst.msk [vmem:[#allocation3 + $0xe0] sm:$0xff] %vm869_vm4, %v2872_v2 }
 0x453   : > { %v4519_v62 = vadd.f32 %v4518_v14, %v4517_v12  ;;  %v3446_v18 = vpop.permute.xlu0 %3445 }
 0x454   : > { %v3636_v20 = vpop.permute.xlu1 %3635  ;;  %3514 = vst.msk [vmem:[#allocation3 + $0xd8] sm:$0xff] %vm1448_vm7, %v3446_v18  ;;  %v4120_v19 = vld [vmem:[#allocation3 + $0xc8] sm:$0xff] }
 0x455   : > { %3705 = vst.msk [vmem:[#allocation3 + $0xd0] sm:$0xff] %vm1642_vm8, %v3636_v20  ;;  %5081 = vmatmul.mubr.msk.f32.gmra.mrb[24].mxu1 %vm2109_vm11, %v4120_v19 }
 0x457   : > { %v2874_v56 = vpop.permute.xlu0 %2873 }
 0x458   : > { %v3064_v21 = vpop.permute.xlu1 %3063  ;;  %2940 = vst.msk [vmem:[#allocation3 + $0xe8] sm:$0xff] %vm869_vm4, %v2874_v56 }
 0x459   : > { %3131 = vst.msk [vmem:[#allocation3 + $0xe0] sm:$0xff] %vm1062_vm5, %v3064_v21 }
 0x45b   : > { %v3638_v22 = vpop.permute.xlu0 %3637 }
 0x45c   : > { %v3828_v27 = vpop.permute.xlu1 %3827  ;;  %3706 = vst.msk [vmem:[#allocation3 + $0xd8] sm:$0xff] %vm1642_vm8, %v3638_v22 }
 0x45d   : > { %3897 = vst.msk [vmem:[#allocation3 + $0xd0] sm:$0xff] %vm1835_vm9, %v3828_v27 }
 0x45f   : > { %v3066_v60 = vpop.permute.xlu0 %3065 }
 0x460   : > { %v3256_v15 = vpop.permute.xlu1 %3255  ;;  %3132 = vst.msk [vmem:[#allocation3 + $0xe8] sm:$0xff] %vm1062_vm5, %v3066_v60 }
 0x461   : > { %3323 = vst.msk [vmem:[#allocation3 + $0xe0] sm:$0xff] %vm1255_vm6, %v3256_v15 }
 0x463   : > { %v3830_v33 = vpop.permute.xlu0 %3829 }
 0x464   : > { %v4020_v39 = vpop.permute.xlu1 %4019  ;;  %3898 = vst.msk [vmem:[#allocation3 + $0xd8] sm:$0xff] %vm1835_vm9, %v3830_v33 }
 0x465   : > { %4089 = vst.msk [vmem:[#allocation3 + $0xd0] sm:$0xff] %vm2028_vm10, %v4020_v39 }
 0x467   : > { %v2684_v42 = vpop.permute.xlu0 %2683 }
 0x468   : > { %v3258_v38 = vpop.permute.xlu1 %3257  ;;  %2749 = vst.msk [vmem:[#allocation3 + $0xf0] sm:$0xff] %vm676_vm3, %v2684_v42  ;;  %v5064_v23 = vpop.f32.mrb[12].mxu1 }
 0x469   : > { %3324 = vst.msk [vmem:[#allocation3 + $0xe8] sm:$0xff] %vm1255_vm6, %v3258_v38  ;;  %v4371_v24 = vadd.f32 %v5064_v23, %v6906_v59  ;;  %v4365_v44 = vpop.f32.mrb[13].mxu1 }
 0x46a   : > { %v4366_v25 = vadd.f32 %v6906_v59, %v4365_v44 }
 0x46b   : > { %v3448_v28 = vpop.permute.xlu0 %3447  ;;  %v4477_v26 = vmax.f32 %v4371_v24, 0.0 }
 0x46c   : > { %v4476_v35 = vmax.f32 %v4366_v25, 0.0  ;;  %v4022_v16 = vpop.permute.xlu1 %4021  ;;  %3515 = vst.msk [vmem:[#allocation3 + $0xe0] sm:$0xff] %vm1448_vm7, %v3448_v28  ;;  %v4121_v34 = vld [vmem:[#allocation3 + $0xd0] sm:$0xff] }
 0x46d   : > { %4090 = vst.msk [vmem:[#allocation3 + $0xd8] sm:$0xff] %vm2028_vm10, %v4022_v16  ;;  %5083 = vmatprep.mubr.msk.f32.mxu1 %vm2109_vm11, %v4121_v34  ;;  %v4522_v40 = vsel %vm4496_vm12, %v4477_v26, 0.0  ;;  %v4568_v16 = vld [vmem:[%s7265_s5 + $0x8] sm:$0xff] }
 0x46e   : > { %v4520_v37 = vsel %vm4496_vm12, %v4476_v35, 0.0  ;;  %v4567_v35 = vld [vmem:[%s7265_s5] sm:$0xff] }
 0x46f   : > { %v4521_v41 = vadd.f32 %v4520_v37, %v4519_v62  ;;  %v2686_v61 = vpop.permute.xlu0 %2685  ;;  %v5277_v37 = vmov 0.0|0.0  }
 0x470   : > { %v2876_v29 = vpop.permute.xlu1 %2875  ;;  %2750 = vst.msk [vmem:[#allocation3 + $0xf8] sm:$0xff] %vm676_vm3, %v2686_v61  ;;  %5142 = vmatprep.subr.bf16.mxu0 %v5277_v37  ;;  %5145 = vmatprep.subr.bf16.mxu1 %v5277_v37 }
 0x471   : > { %2941 = vst.msk [vmem:[#allocation3 + $0xf0] sm:$0xff] %vm869_vm4, %v2876_v29  ;;  %v4523_v45 = vadd.f32 %v4522_v40, %v4521_v41  ;;  %v5143_v41 = vpack.c.bf16 %v4568_v16, %v4567_v35 }
 0x473   : > { %v3450_v36 = vpop.permute.xlu0 %3449  ;;  %5144 = vmatpush3.bf16.msra.mxu0 %v5143_v41 }
 0x474   : > { %v3640_v46 = vpop.permute.xlu1 %3639  ;;  %3516 = vst.msk [vmem:[#allocation3 + $0xe8] sm:$0xff] %vm1448_vm7, %v3450_v36  ;;  %v4122_v54 = vld [vmem:[#allocation3 + $0xd8] sm:$0xff] }
 0x475   : > { %3707 = vst.msk [vmem:[#allocation3 + $0xe0] sm:$0xff] %vm1642_vm8, %v3640_v46  ;;  %5084 = vmatmul.mubr.msk.f32.gmra.mrb[26].mxu1 %vm2109_vm11, %v4122_v54 }
 0x477   : > { %v2878_v1 = vpop.permute.xlu0 %2877 }
 0x478   : > { %v3068_v47 = vpop.permute.xlu1 %3067  ;;  %2942 = vst.msk [vmem:[#allocation3 + $0xf8] sm:$0xff] %vm869_vm4, %v2878_v1 }
 0x479   : > { %3133 = vst.msk [vmem:[#allocation3 + $0xf0] sm:$0xff] %vm1062_vm5, %v3068_v47 }
 0x47b   : > { %v3642_v48 = vpop.permute.xlu0 %3641 }
 0x47c   : > { %v3832_v31 = vpop.permute.xlu1 %3831  ;;  %3708 = vst.msk [vmem:[#allocation3 + $0xe8] sm:$0xff] %vm1642_vm8, %v3642_v48 }
 0x47d   : > { %3899 = vst.msk [vmem:[#allocation3 + $0xe0] sm:$0xff] %vm1835_vm9, %v3832_v31 }
 0x47f   : > { %v3070_v49 = vpop.permute.xlu0 %3069 }
 0x480   : > { %v3260_v50 = vpop.permute.xlu1 %3259  ;;  %3134 = vst.msk [vmem:[#allocation3 + $0xf8] sm:$0xff] %vm1062_vm5, %v3070_v49 }
 0x481   : > { %3325 = vst.msk [vmem:[#allocation3 + $0xf0] sm:$0xff] %vm1255_vm6, %v3260_v50 }
 0x483   : > { %v3834_v51 = vpop.permute.xlu0 %3833 }
 0x484   : > { %v4024_v4 = vpop.permute.xlu1 %4023  ;;  %3900 = vst.msk [vmem:[#allocation3 + $0xe8] sm:$0xff] %vm1835_vm9, %v3834_v51 }
 0x485   : > { %4091 = vst.msk [vmem:[#allocation3 + $0xe0] sm:$0xff] %vm2028_vm10, %v4024_v4 }
 0x487   : > { %v3262_v52 = vpop.permute.xlu0 %3261 }
 0x488   : > { %v3452_v5 = vpop.permute.xlu1 %3451  ;;  %3326 = vst.msk [vmem:[#allocation3 + $0xf8] sm:$0xff] %vm1255_vm6, %v3262_v52  ;;  %v5067_v43 = vpop.f32.mrb[14].mxu1 }
 0x489   : > { %3517 = vst.msk [vmem:[#allocation3 + $0xf0] sm:$0xff] %vm1448_vm7, %v3452_v5  ;;  %v4381_v6 = vadd.f32 %v5067_v43, %v6906_v59  ;;  %v4375_v57 = vpop.f32.mrb[15].mxu1  ;;  %v4644_v43 = vld [vmem:[%s7267_s7] sm:$0xff] }
 0x48a   : > { %v4376_v58 = vadd.f32 %v6906_v59, %v4375_v57  ;;  %v4646_v57 = vld [vmem:[%s7267_s7 + $0x10] sm:$0xff] }
 0x48b   : > { %v4026_v53 = vpop.permute.xlu0 %4025  ;;  %v4479_v30 = vmax.f32 %v4381_v6, 0.0  ;;  %v4645_v6 = vld [vmem:[%s7267_s7 + $0x8] sm:$0xff] }
 0x48c   : > { %v4478_v55 = vmax.f32 %v4376_v58, 0.0  ;;  %v3454_v63 = vpop.permute.xlu1 %3453  ;;  %4092 = vst.msk [vmem:[#allocation3 + $0xe8] sm:$0xff] %vm2028_vm10, %v4026_v53  ;;  %v4123_v9 = vld [vmem:[#allocation3 + $0xe0] sm:$0xff]  ;;  %v5146_v53 = vpack.c.bf16 %v4645_v6, %v4644_v43 }
 0x48d   : > { %3518 = vst.msk [vmem:[#allocation3 + $0xf8] sm:$0xff] %vm1448_vm7, %v3454_v63  ;;  %5086 = vmatprep.mubr.msk.f32.mxu1 %vm2109_vm11, %v4123_v9  ;;  %v4526_v8 = vsel %vm4496_vm12, %v4479_v30, 0.0  ;;  %v4647_v30 = vld [vmem:[%s7267_s7 + $0x18] sm:$0xff] }
 0x48e   : > { %v4524_v3 = vsel %vm4496_vm12, %v4478_v55, 0.0  ;;  %5147 = vmatpush3.bf16.msra.mxu1 %v5146_v53  ;;  %v5149_v63 = vpack.c.bf16 %v4647_v30, %v4646_v57 }
 0x48f   : > { %v4525_v32 = vadd.f32 %v4524_v3, %v4523_v45  ;;  %v3644_v10 = vpop.permute.xlu0 %3643  ;;  %5148 = vmatprep.subr.bf16.mxu1 %v5277_v37 }
 0x490   : > { %3709 = vst.msk [vmem:[#allocation3 + $0xf0] sm:$0xff] %vm1642_vm8, %v3644_v10  ;;  %v3646_v7 = vpop.permute.xlu1 %3645 }
 0x491   : > { %3710 = vst.msk [vmem:[#allocation3 + $0xf8] sm:$0xff] %vm1642_vm8, %v3646_v7  ;;  %v4527_v17 = vadd.f32 %v4526_v8, %v4525_v32 }
 0x492   : > { %5150 = vmatpush3.bf16.msra.mxu1 %v5149_v63 }
 0x493   : > { %v3836_v11 = vpop.permute.xlu0 %3835  ;;  %v4124_v12 = vld [vmem:[#allocation3 + $0xe8] sm:$0xff] }
 0x494   : > { %3901 = vst.msk [vmem:[#allocation3 + $0xf0] sm:$0xff] %vm1835_vm9, %v3836_v11  ;;  %v3838_v13 = vpop.permute.xlu1 %3837  ;;  %5087 = vmatmul.mubr.msk.f32.gmra.mrb[28].mxu1 %vm2109_vm11, %v4124_v12 }
 0x495   : > { %3902 = vst.msk [vmem:[#allocation3 + $0xf8] sm:$0xff] %vm1835_vm9, %v3838_v13 }
 0x497   : > { %v4028_v14 = vpop.permute.xlu0 %4027 }
 0x498   : > { %4093 = vst.msk [vmem:[#allocation3 + $0xf0] sm:$0xff] %vm2028_vm10, %v4028_v14  ;;  %v4030_v2 = vpop.permute.xlu1 %4029 }
 0x499   : > { %4094 = vst.msk [vmem:[#allocation3 + $0xf8] sm:$0xff] %vm2028_vm10, %v4030_v2 }
 0x49f   : > { %v4125_v62 = vld [vmem:[#allocation3 + $0xf0] sm:$0xff] }
 0x4a0   : > { %5089 = vmatprep.mubr.msk.f32.mxu1 %vm2109_vm11, %v4125_v62  ;;  %v4126_v18 = vld [vmem:[#allocation3 + $0xf8] sm:$0xff]  ;;  %v5203_v62 = vld [vmem:[%s7264_s4] ss:$0 sm:$0xff] }
 0x4a1   : > { %5090 = vmatmul.mubr.msk.f32.gmra.mrb[30].mxu1 %vm2109_vm11, %v4126_v18 }
 0x4a2   : > { %5107 = vmatprep.mubr.msk.f32.mxu1 %vm5278_vm13, %v5268_v0 }
 0x4a8   : > { %v5070_v20 = vpop.f32.mrb[16].mxu1 }
 0x4a9   : > { %v4391_v19 = vadd.f32 %v5070_v20, %v6906_v59  ;;  %v4385_v56 = vpop.f32.mrb[17].mxu1 }
 0x4aa   : > { %v4386_v21 = vadd.f32 %v6906_v59, %v4385_v56 }
 0x4ab   : > { %v4481_v22 = vmax.f32 %v4391_v19, 0.0 }
 0x4ac   : > { %v4480_v27 = vmax.f32 %v4386_v21, 0.0 }
 0x4ad   : > { %v4530_v33 = vsel %vm4496_vm12, %v4481_v22, 0.0 }
 0x4ae   : > { %v4528_v60 = vsel %vm4496_vm12, %v4480_v27, 0.0 }
 0x4af   : > { %v4529_v15 = vadd.f32 %v4528_v60, %v4527_v17 }
 0x4b1   : > { %v4531_v39 = vadd.f32 %v4530_v33, %v4529_v15 }
 0x4c8   : > { %v5073_v42 = vpop.f32.mrb[18].mxu1 }
 0x4c9   : > { %v4401_v38 = vadd.f32 %v5073_v42, %v6906_v59  ;;  %v4395_v23 = vpop.f32.mrb[19].mxu1 }
 0x4ca   : > { %v4396_v24 = vadd.f32 %v6906_v59, %v4395_v23 }
 0x4cb   : > { %v4483_v44 = vmax.f32 %v4401_v38, 0.0 }
 0x4cc   : > { %v4482_v25 = vmax.f32 %v4396_v24, 0.0 }
 0x4cd   : > { %v4534_v34 = vsel %vm4496_vm12, %v4483_v44, 0.0 }
 0x4ce   : > { %v4532_v28 = vsel %vm4496_vm12, %v4482_v25, 0.0 }
 0x4cf   : > { %v4533_v26 = vadd.f32 %v4532_v28, %v4531_v39 }
 0x4d1   : > { %v4535_v61 = vadd.f32 %v4534_v34, %v4533_v26 }
 0x4e8   : > { %v5076_v40 = vpop.f32.mrb[20].mxu1 }
 0x4e9   : > { %v4411_v29 = vadd.f32 %v5076_v40, %v6906_v59  ;;  %v4405_v45 = vpop.f32.mrb[21].mxu1 }
 0x4ea   : > { %v4406_v36 = vadd.f32 %v6906_v59, %v4405_v45 }
 0x4eb   : > { %v4485_v46 = vmax.f32 %v4411_v29, 0.0 }
 0x4ec   : > { %v4484_v54 = vmax.f32 %v4406_v36, 0.0 }
 0x4ed   : > { %v4538_v48 = vsel %vm4496_vm12, %v4485_v46, 0.0 }
 0x4ee   : > { %v4536_v1 = vsel %vm4496_vm12, %v4484_v54, 0.0 }
 0x4ef   : > { %v4537_v47 = vadd.f32 %v4536_v1, %v4535_v61 }
 0x4f1   : > { %v4539_v31 = vadd.f32 %v4538_v48, %v4537_v47 }
 0x508   : > { %v5079_v49 = vpop.f32.mrb[22].mxu1 }
 0x509   : > { %v4421_v50 = vadd.f32 %v5079_v49, %v6906_v59  ;;  %v4415_v51 = vpop.f32.mrb[23].mxu1  ;;  %v4569_v49 = vld [vmem:[%s7266_s6] sm:$0x1] }
 0x50a   : > { %v4416_v4 = vadd.f32 %v6906_v59, %v4415_v51 }
 0x50b   : > { %v4487_v52 = vmax.f32 %v4421_v50, 0.0 }
 0x50c   : > { %v4486_v5 = vmax.f32 %v4416_v4, 0.0 }
 0x50d   : > { %v4542_v55 = vsel %vm4496_vm12, %v4487_v52, 0.0 }
 0x50e   : > { %v4540_v58 = vsel %vm4496_vm12, %v4486_v5, 0.0  ;;  %v4648_v5 = vld [vmem:[%s7268_s8] sm:$0x1] }
 0x50f   : > { %v4541_v0 = vadd.f32 %v4540_v58, %v4539_v31 }
 0x511   : > { %v4543_v9 = vadd.f32 %v4542_v55, %v4541_v0 }
 0x528   : > { %v5082_v3 = vpop.f32.mrb[24].mxu1 }
 0x529   : > { %v4431_v32 = vadd.f32 %v5082_v3, %v6906_v59  ;;  %v4425_v10 = vpop.f32.mrb[25].mxu1 }
 0x52a   : > { %v4426_v8 = vadd.f32 %v6906_v59, %v4425_v10 }
 0x52b   : > { %v4489_v7 = vmax.f32 %v4431_v32, 0.0 }
 0x52c   : > { %v4488_v17 = vmax.f32 %v4426_v8, 0.0 }
 0x52d   : > { %v4546_v13 = vsel %vm4496_vm12, %v4489_v7, 0.0 }
 0x52e   : > { %v4544_v11 = vsel %vm4496_vm12, %v4488_v17, 0.0 }
 0x52f   : > { %v4545_v12 = vadd.f32 %v4544_v11, %v4543_v9 }
 0x531   : > { %v4547_v14 = vadd.f32 %v4546_v13, %v4545_v12 }
 0x548   : > { %v5085_v2 = vpop.f32.mrb[26].mxu1 }
 0x549   : > { %v4441_v18 = vadd.f32 %v5203_v62, %v5085_v2  ;;  %v4435_v20 = vpop.f32.mrb[27].mxu1 }
 0x54a   : > { %v4436_v19 = vadd.f32 %v5203_v62, %v4435_v20 }
 0x54b   : > { %v4491_v56 = vmax.f32 %v4441_v18, 0.0 }
 0x54c   : > { %v4490_v21 = vmax.f32 %v4436_v19, 0.0 }
 0x54d   : > { %v4550_v27 = vsel %vm4496_vm12, %v4491_v56, 0.0 }
 0x54e   : > { %v4548_v59 = vsel %vm4496_vm12, %v4490_v21, 0.0 }
 0x54f   : > { %v4549_v22 = vadd.f32 %v4548_v59, %v4547_v14 }
 0x551   : > { %v4551_v60 = vadd.f32 %v4550_v27, %v4549_v22 }
 0x567   : > { %v5088_v15 = vpop.f32.mrb[28].mxu1 }
 0x568   : > { %v4451_v33 = vadd.f32 %v5203_v62, %v5088_v15  ;;  %v4445_v39 = vpop.f32.mrb[29].mxu1 }
 0x569   : > { %v4446_v42 = vadd.f32 %v5203_v62, %v4445_v39 }
 0x56a   : > { %v4493_v38 = vmax.f32 %v4451_v33, 0.0 }
 0x56b   : > { %v4492_v23 = vmax.f32 %v4446_v42, 0.0 }
 0x56c   : > { %v4554_v25 = vsel %vm4496_vm12, %v4493_v38, 0.0 }
 0x56d   : > { %v4552_v24 = vsel %vm4496_vm12, %v4492_v23, 0.0 }
 0x56e   : > { %v4553_v44 = vadd.f32 %v4552_v24, %v4551_v60 }
 0x570   : > { %v4555_v28 = vadd.f32 %v4554_v25, %v4553_v44 }
 0x574   : > { %v5091_v26 = vpop.f32.mrb[30].mxu1 }
 0x575   : > { %v4461_v35 = vadd.f32 %v5203_v62, %v5091_v26  ;;  %v4455_v16 = vpop.f32.mrb[31].mxu1 }
 0x576   : > { %v4456_v34 = vadd.f32 %v5203_v62, %v4455_v16 }
 0x577   : > { %v4495_v37 = vmax.f32 %v4461_v35, 0.0 }
 0x578   : > { %v4494_v41 = vmax.f32 %v4456_v34, 0.0 }
 0x579   : > { %v4558_v29 = vsel %vm4496_vm12, %v4495_v37, 0.0 }
 0x57a   : > { %v4556_v61 = vsel %vm4496_vm12, %v4494_v41, 0.0 }
 0x57b   : > { %v4557_v40 = vadd.f32 %v4556_v61, %v4555_v28 }
 0x57d   : > { %v4559_v45 = vadd.f32 %v4558_v29, %v4557_v40 }
 0x57f   : > { %v4560_v36 = vrot.slane %v4559_v45, 4 }
 0x581   : > { %v4561_v46 = vadd.f32 %v4560_v36, %v4559_v45 }
 0x583   : > { %v4562_v54 = vrot.slane %v4561_v46, 2 }
 0x585   : > { %v4563_v1 = vadd.f32 %v4562_v54, %v4561_v46 }
 0x587   : > { %v4564_v47 = vrot.slane %v4563_v1, 1 }
 0x589   : > { %v4565_v48 = vadd.f32 %v4564_v47, %v4563_v1 }
 0x58b   : > { %v4566_v31 = vmul.f32 0.00390625, %v4565_v48 }
 0x58d   : > { %5097 = vmatmul.mubr.msk.f32.vlgmr.msra.gmra.mrb[32].mxu0 %vm4496_vm12, %v4566_v31 }
 0x660   : > { %v4639_v50 = vpop.f32.mrb[32].mxu0 }
 0x661   : > { %v4640_v51 = vadd.f32 %v4639_v50, %v4569_v49  ;;  %v5098_v4 = vpop.f32.mrb[33].mxu0 }
 0x663   : > { %v4643_v52 = vmax.f32 %v4640_v51, 0.0 }
 0x665   : > { %5108 = vmatmul.mubr.msk.f32.vlgmr.msra.gmra.mrb[32].mxu1 %vm4649_vm14, %v4643_v52 }
 0x738   : > { %v4719_v43 = vpop.f32.mrb[32].mxu1 }
 0x739   : > { %v4720_v6 = vadd.f32 %v4719_v43, %v4648_v5  ;;  %v5109_v57 = vpop.f32.mrb[33].mxu1 }
 0x73b   : > { %4723 = vst [vmem:[%s324_s22] sm:$0x1] %v4720_v6 }
 0x73c   : > { %5217 = shalt.err (!%p5214_p3)
}
 0x73d   : > { %s5218_s29 = scalar_lea.hbm %s7218_s26, 16  ;;  %s5222_s22 = scalar_lea.hbm %s7269_s9, 32 }
 0x73e   : > { %p5219_p4 = scmp.ne.s32.totalorder %s7218_s26, %s5218_s29  ;;  %p5223_p9 = scmp.lt.u32.totalorder %s7218_s26, %s7269_s9 }
 0x73f   : > { %p5224_p10 = scmp.lt.u32.totalorder %s5222_s22, %s5218_s29  ;;  %p5226_p12 = scmp.lt.u32.totalorder %s5218_s29, %s7218_s26 }
 0x740   : > { %p5220_p7 = pnand %p5219_p4, %p5368_p5 }
 0x741   : > { %p5225_p11 = por %p5224_p10, %p5223_p9 }
 0x742   : > { %p5221_p8 = pneg %p5220_p7 }
 0x743   : > { %p5227_p13 = por %p5226_p12, %p5225_p11 }
 0x745   : > { %p5228_p0 = pnand %p5227_p13, %p5221_p8 }
 0x747   : > { %5231 = shalt.err (!%p5228_p0)
}
 0x748   : > { %5151 = dma.vmem_to_hbm [thread:$0]  (%p5368_p5), %s7220_s16, 16, %s7218_s26, %s4725_s28  }
 0x749 PF: > { %p5157_p1 = scmp.ge.s32.totalorder %s5266_s12, 2  ;;  %s4749_s23 = sand.u32 1, %s5254_s30  }
 0x74a   : > { %s4750_s13 = scalar_lea.sflag [#allocation5], %s4749_s23 }
 0x74b   : > { %p5154_p2 = pnand %p5157_p1, %p5372_p6 }
 0x74d   : > { %5249 = dma.done.wait (!%p5154_p2), %s4750_s13, 16  }
 0x74e   : > { %5251 = vsyncadd (!%p5154_p2), %s4750_s13, 4294967280  ;;  %p19_p3 = scmp.ge.s32.totalorder %s5355_s15, 4   ;;  %s7281_s30 = smov %s5258_s10 }
 0x74f   : > { %s7282_s10 = smov %s5262_s11  ;;  %s7283_s11 = smov %s5366_s18 }
 0x750   : > { %s7284_s12 = smov %s5355_s15  ;;  %21 = sbr.rel (!%p19_p3) target bundleno = 3 (0x3), region = 93 }
 0x757   :  { %4754 = vsyncpa [#allocation5], 1 }
 0x758   :  { %4756 = vsyncpa [#allocation5 + $0x1], 1 }

</bundles_post_ra>
